<compile_context>
chip_gen: v5e
topology: v5e:2x2
jax: 0.10.0
libtpu: 0.0.40
codegen_flags: <defaults>
</compile_context>

<pallas_src>
import jax
import jax.numpy as jnp
from jax.experimental import pallas as pl
from jax.experimental.pallas import tpu as pltpu

_VMEM_LIMIT = 32 * 1024 * 1024  # fits every generation (v7x has 64 MiB/TC)


def _round_up(x, m):
    return ((x + m - 1) // m) * m


# ----------------------------- tiled MXU matmul -----------------------------

def _matmul_kernel_single_k(a_ref, b_ref, o_ref):
    # Whole contraction in one step: write straight to the output tile.
    o_ref[...] = jnp.dot(a_ref[...], b_ref[...],
                         preferred_element_type=jnp.float32).astype(o_ref.dtype)


def _matmul_kernel_acc(a_ref, b_ref, o_ref, acc_ref):
    @pl.when(pl.program_id(2) == 0)
    def _():
        acc_ref[...] = jnp.zeros_like(acc_ref)

    acc_ref[...] += jnp.dot(a_ref[...], b_ref[...],
                            preferred_element_type=jnp.float32)

    @pl.when(pl.program_id(2) == pl.num_programs(2) - 1)
    def _():
        o_ref[...] = acc_ref[...].astype(o_ref.dtype)


def pallas_matmul(a, b, *, tm=256, tn=512, tk=512,
                  compute_dtype=jnp.bfloat16, out_dtype=jnp.float32):
    """(M, K) @ (K, N) -> (M, N), bf16 MXU inputs, f32 accumulation."""
    M, K = a.shape
    K2, N = b.shape
    assert K == K2
    a = a.astype(compute_dtype)
    b = b.astype(compute_dtype)

    tm = min(tm, _round_up(M, 8))
    tn = min(tn, _round_up(N, 128))          # lane-dense output tiles
    if K <= tk:                              # small contraction: single K step
        tk = _round_up(K, 16)                # clean bf16 sublane packing
    Mp, Np, Kp = _round_up(M, tm), _round_up(N, tn), _round_up(K, tk)

    if (Mp, Kp) != (M, K):
        a = jnp.pad(a, ((0, Mp - M), (0, Kp - K)))
    if (Kp, Np) != (K, N):
        b = jnp.pad(b, ((0, Kp - K), (0, Np - N)))

    if Kp == tk:
        # Fast path: no K grid axis, no scratch accumulator.
        out = pl.pallas_call(
            _matmul_kernel_single_k,
            out_shape=jax.ShapeDtypeStruct((Mp, Np), out_dtype),
            grid=(Mp // tm, Np // tn),
            in_specs=[pl.BlockSpec((tm, tk), lambda i, j: (i, 0)),
                      pl.BlockSpec((tk, tn), lambda i, j: (0, j))],
            out_specs=pl.BlockSpec((tm, tn), lambda i, j: (i, j)),
            compiler_params=pltpu.CompilerParams(
                dimension_semantics=("parallel", "parallel"),
                vmem_limit_bytes=_VMEM_LIMIT),
        )(a, b)
    else:
        out = pl.pallas_call(
            _matmul_kernel_acc,
            out_shape=jax.ShapeDtypeStruct((Mp, Np), out_dtype),
            grid=(Mp // tm, Np // tn, Kp // tk),
            in_specs=[pl.BlockSpec((tm, tk), lambda i, j, k: (i, k)),
                      pl.BlockSpec((tk, tn), lambda i, j, k: (k, j))],
            out_specs=pl.BlockSpec((tm, tn), lambda i, j, k: (i, j)),
            scratch_shapes=[pltpu.VMEM((tm, tn), jnp.float32)],
            compiler_params=pltpu.CompilerParams(
                dimension_semantics=("parallel", "parallel", "arbitrary"),
                vmem_limit_bytes=_VMEM_LIMIT),
        )(a, b)

    if (Mp, Np) != (M, N):
        out = out[:M, :N]
    return out


# ----------------------- BatchNorm (train) + ReLU, NHWC ----------------------

def _bn_stats_kernel(x_ref, sum_ref, sq_ref):
    @pl.when(pl.program_id(0) == 0)
    def _():
        sum_ref[...] = jnp.zeros_like(sum_ref)
        sq_ref[...] = jnp.zeros_like(sq_ref)
    x = x_ref[...]
    sum_ref[...] += jnp.sum(x, axis=0, keepdims=True)
    sq_ref[...] += jnp.sum(x * x, axis=0, keepdims=True)


def _bn_apply_kernel(x_ref, scale_ref, shift_ref, o_ref):
    y = x_ref[...] * scale_ref[...] + shift_ref[...]
    o_ref[...] = jnp.maximum(y, 0.0).astype(o_ref.dtype)


def _pad_rows(x2, tm):
    M, _ = x2.shape
    Mp = _round_up(M, tm)
    if Mp != M:
        x2 = jnp.pad(x2, ((0, Mp - M), (0, 0)))
    return x2, Mp


def pallas_bn_stats(x2, tm=512):
    M, C = x2.shape
    tm = min(tm, _round_up(M, 8))
    x2, Mp = _pad_rows(x2, tm)            # zero rows: contribute 0 to sum/sumsq
    return pl.pallas_call(
        _bn_stats_kernel,
        out_shape=(jax.ShapeDtypeStruct((1, C), jnp.float32),
                   jax.ShapeDtypeStruct((1, C), jnp.float32)),
        grid=(Mp // tm,),
        in_specs=[pl.BlockSpec((tm, C), lambda i: (i, 0))],
        out_specs=(pl.BlockSpec((1, C), lambda i: (0, 0)),
                   pl.BlockSpec((1, C), lambda i: (0, 0))),
        compiler_params=pltpu.CompilerParams(
            dimension_semantics=("arbitrary",),
            vmem_limit_bytes=_VMEM_LIMIT),
    )(x2)


def pallas_scale_shift_relu(x2, scale, shift, tm=512, out_dtype=jnp.bfloat16):
    M, C = x2.shape
    tm = min(tm, _round_up(M, 8))
    xp, Mp = _pad_rows(x2, tm)
    y = pl.pallas_call(
        _bn_apply_kernel,
        out_shape=jax.ShapeDtypeStruct((Mp, C), out_dtype),
        grid=(Mp // tm,),
        in_specs=[pl.BlockSpec((tm, C), lambda i: (i, 0)),
                  pl.BlockSpec((1, C), lambda i: (0, 0)),
                  pl.BlockSpec((1, C), lambda i: (0, 0))],
        out_specs=pl.BlockSpec((tm, C), lambda i: (i, 0)),
        compiler_params=pltpu.CompilerParams(
            dimension_semantics=("parallel",),
            vmem_limit_bytes=_VMEM_LIMIT),
    )(xp, scale, shift)
    return y[:M] if Mp != M else y


def bn_relu_nhwc(x, gamma, beta, eps=1e-5):
    """Training-mode BatchNorm2d + ReLU on an NHWC tensor; emits bf16."""
    N, H, W, C = x.shape
    M = N * H * W
    x2 = x.reshape(M, C).astype(jnp.float32)
    s, sq = pallas_bn_stats(x2)
    mean = s / M
    var = jnp.maximum(sq / M - mean * mean, 0.0)      # biased batch variance
    scale = gamma.reshape(1, C) * jax.lax.rsqrt(var + eps)
    shift = beta.reshape(1, C) - mean * scale
    y = pallas_scale_shift_relu(x2, scale, shift)
    return y.reshape(N, H, W, C)


# ---------------------------------- Tanh ------------------------------------

def _tanh_kernel(x_ref, o_ref):
    o_ref[...] = jnp.tanh(x_ref[...])


def pallas_tanh(x, *, lane=512, tr=128):
    shape = x.shape
    flat = x.reshape(-1).astype(jnp.float32)
    L = flat.shape[0]
    Lp = _round_up(L, lane * 8)
    if Lp != L:
        flat = jnp.pad(flat, (0, Lp - L))
    R = Lp // lane
    tr = min(tr, R)
    Rp = _round_up(R, tr)
    if Rp != R:
        flat = jnp.pad(flat, (0, (Rp - R) * lane))
    x2 = flat.reshape(Rp, lane)
    y = pl.pallas_call(
        _tanh_kernel,
        out_shape=jax.ShapeDtypeStruct((Rp, lane), jnp.float32),
        grid=(Rp // tr,),
        in_specs=[pl.BlockSpec((tr, lane), lambda i: (i, 0))],
        out_specs=pl.BlockSpec((tr, lane), lambda i: (i, 0)),
        compiler_params=pltpu.CompilerParams(
            dimension_semantics=("parallel",),
            vmem_limit_bytes=_VMEM_LIMIT),
    )(x2)
    return y.reshape(-1)[:L].reshape(shape)


# ------------------------- ConvTranspose2d (no bias) -------------------------

def _col2im_s2_k4(y, padding):
    """Phase-grouped col2im for stride=2, K=4.  y: (N,H,W,4,4,OC) NHWC taps."""
    N, H, W, _, _, OC = y.shape
    H1, W1 = H + 1, W + 1

    def phase(py, px):
        t00 = y[:, :, :, py,     px,     :]
        t20 = y[:, :, :, py + 2, px,     :]
        t02 = y[:, :, :, py,     px + 2, :]
        t22 = y[:, :, :, py + 2, px + 2, :]
        pad = lambda t, top, left: jnp.pad(
            t, ((0, 0), (top, 1 - top), (left, 1 - left), (0, 0)))
        return pad(t00, 0, 0) + pad(t20, 1, 0) + pad(t02, 0, 1) + pad(t22, 1, 1)

    # P[n, i, py, j, px, c] = phase(py, px)[n, i, j, c]  -> depth-to-space
    P = jnp.stack([jnp.stack([phase(0, 0), phase(0, 1)], axis=3),
                   jnp.stack([phase(1, 0), phase(1, 1)], axis=3)], axis=2)
    full = P.reshape(N, 2 * H1, 2 * W1, OC)
    Hf, Wf = 2 * H1, 2 * W1
    return full[:, padding:Hf - padding, padding:Wf - padding, :]


def _col2im_generic(y, stride, padding):
    # Fallback (not hit by this model's layer configuration).
    N, H, W, K, _, OC = y.shape
    Hf = (H - 1) * stride + K
    Wf = (W - 1) * stride + K
    out = jnp.zeros((N, Hf, Wf, OC), jnp.float32)
    for ky in range(K):
        for kx in range(K):
            out = out.at[:, ky:ky + stride * H:stride,
                         kx:kx + stride * W:stride, :].add(y[:, :, :, ky, kx, :])
    return out[:, padding:Hf - padding, padding:Wf - padding, :]


def conv_transpose2d_nhwc(x, w, stride, padding):
    """x: (N,H,W,IC) NHWC;  w: (IC,OC,K,K) PyTorch ConvTranspose2d layout."""
    N, H, W, IC = x.shape
    _, OC, K, _ = w.shape
    xm = x.reshape(N * H * W, IC)
    wm = jnp.transpose(w, (0, 2, 3, 1)).reshape(IC, K * K * OC)  # lane = (ky,kx,oc)
    y = pallas_matmul(xm, wm).reshape(N, H, W, K, K, OC)

    if H == 1 and W == 1 and stride == 1 and padding == 0:
        return y.reshape(N, K, K, OC)                 # first layer: pure reshape
    if stride == 2 and K == 4:
        return _col2im_s2_k4(y, padding)
    # TODO(synk): overlap/interleave re-layout (col2im) stays as dense XLA glue;
    # no clean rectangular-BlockSpec equivalent for the strided scatter-add.
    return _col2im_generic(y, stride, padding)


# -------------------------------- Generator ----------------------------------

def init_generator_params(key, in_chans, hidden_chans, out_chans):
    h = hidden_chans
    layer_defs = [
        (in_chans, h * 16, 4, 1, 0),
        (h * 16, h * 8, 4, 2, 1),
        (h * 8, h * 4, 4, 2, 1),
        (h * 4, h * 2, 4, 2, 1),
        (h * 2, out_chans, 4, 2, 1),
    ]
    params = []
    for li, (ic, oc, k, s, p) in enumerate(layer_defs):
        key, sub = jax.random.split(key)
        w = 0.02 * jax.random.normal(sub, (ic, oc, k, k), jnp.float32)
        prm = {"w": w, "stride": s, "padding": p}
        if li < len(layer_defs) - 1:                  # BatchNorm2d defaults
            prm["gamma"] = jnp.ones((oc,), jnp.float32)
            prm["beta"] = jnp.zeros((oc,), jnp.float32)
        params.append(prm)
    return params


def generator_forward(params, z):
    # z: (N, IC, 1, 1) NCHW -> NHWC; stay NHWC until the final output.
    x = jnp.transpose(z, (0, 2, 3, 1))
    for prm in params[:-1]:
        x = conv_transpose2d_nhwc(x, prm["w"], prm["stride"], prm["padding"])
        x = bn_relu_nhwc(x, prm["gamma"], prm["beta"])
    prm = params[-1]
    x = conv_transpose2d_nhwc(x, prm["w"], prm["stride"], prm["padding"])
    x = pallas_tanh(x)
    return jnp.transpose(x, (0, 3, 1, 2))             # back to NCHW interface


# ----------------------------- pure-JAX reference ----------------------------

def _ref_conv_transpose(x, w, s, p):
    K = w.shape[2]
    wf = jnp.flip(w, (2, 3)).transpose(1, 0, 2, 3)    # (OC, IC, K, K)
    return jax.lax.conv_general_dilated(
        x, wf, window_strides=(1, 1),
        padding=[(K - 1 - p, K - 1 - p)] * 2,
        lhs_dilation=(s, s),
        dimension_numbers=("NCHW", "OIHW", "NCHW"))


def _ref_forward(params, x):
    for prm in params[:-1]:
        x = _ref_conv_transpose(x, prm["w"], prm["stride"], prm["padding"])
        mean = x.mean(axis=(0, 2, 3), keepdims=True)
        var = ((x - mean) ** 2).mean(axis=(0, 2, 3), keepdims=True)
        xh = (x - mean) / jnp.sqrt(var + 1e-5)
        xh = xh * prm["gamma"].reshape(1, -1, 1, 1) + prm["beta"].reshape(1, -1, 1, 1)
        x = jnp.maximum(xh, 0.0)
    prm = params[-1]
    x = _ref_conv_transpose(x, prm["w"], prm["stride"], prm["padding"])
    return jnp.tanh(x)


if __name__ == "__main__":
    key = jax.random.PRNGKey(0)
    batch, in_chans, hidden_chans, out_chans = 2, 4, 4, 3
    pkey, zkey = jax.random.split(key)
    params = init_generator_params(pkey, in_chans, hidden_chans, out_chans)
    z = jax.random.normal(zkey, (batch, in_chans, 1, 1), jnp.float32)

    fwd = jax.jit(lambda zz: generator_forward(params, zz))
    out = jax.block_until_ready(fwd(z))
    assert out.shape == (batch, out_chans, 64, 64), out.shape

    ref = jax.block_until_ready(_ref_forward(params, z))
    err = float(jnp.max(jnp.abs(out - ref)))
    # bf16 MXU inputs with f32 accumulation -> relaxed tolerance vs f32 reference.
    assert err < 5e-2, err

    print("KERNEL_OK")
</pallas_src>

<mosaic_0001>
module attributes {stable_mosaic.version = 11 : i64} {
  func.func @_matmul_kernel_single_k(%arg0: i32, %arg1: i32, %arg2: memref<8x16xbf16, #tpu.memory_space<vmem>>, %arg3: memref<16x512xbf16, #tpu.memory_space<vmem>>, %arg4: memref<8x512xf32, #tpu.memory_space<vmem>>) attributes {dimension_semantics = [#tpu.dimension_semantics<parallel>, #tpu.dimension_semantics<parallel>], iteration_bounds = array<i64: 1, 2>, scalar_prefetch = 0 : i64, scratch_operands = 0 : i64, tpu.core_type = #tpu.core_type<tc>, window_params = [{transform_indices = @transform_0, window_bounds = array<i64: 8, 16>}, {transform_indices = @transform_1, window_bounds = array<i64: 16, 512>}, {transform_indices = @transform_2, window_bounds = array<i64: 8, 512>}]} {
    %c0 = arith.constant 0 : index
    %c0_0 = arith.constant 0 : index
    %0 = vector.load %arg2[%c0, %c0_0] : memref<8x16xbf16, #tpu.memory_space<vmem>>, vector<8x16xbf16>
    %c0_1 = arith.constant 0 : index
    %c0_2 = arith.constant 0 : index
    %1 = vector.load %arg3[%c0_1, %c0_2] : memref<16x512xbf16, #tpu.memory_space<vmem>>, vector<16x512xbf16>
    %cst = arith.constant dense<0.000000e+00> : vector<8x512xf32>
    %2 = tpu.matmul %0, %1, %cst {dimension_numbers = #tpu.dot_dimension_numbers<[1], [0], [0], [1], [0, 0, 1, 1], [], []>} : vector<8x16xbf16>, vector<16x512xbf16>, vector<8x512xf32> -> vector<8x512xf32>
    %c0_3 = arith.constant 0 : index
    %c0_4 = arith.constant 0 : index
    %3 = vector.load %arg4[%c0_3, %c0_4] : memref<8x512xf32, #tpu.memory_space<vmem>>, vector<8x512xf32>
    tpu.vector_store %arg4[%c0_3, %c0_4], %2 {strides = array<i32>} : memref<8x512xf32, #tpu.memory_space<vmem>>, vector<8x512xf32>,
    return
  }
  func.func @transform_0(%arg0: i32, %arg1: i32) -> (i32, i32) {
    %c0_i32 = arith.constant 0 : i32
    %c0_i32_0 = arith.constant 0 : i32
    return %arg0, %c0_i32 : i32, i32
  }
  func.func @transform_1(%arg0: i32, %arg1: i32) -> (i32, i32) {
    %c0_i32 = arith.constant 0 : i32
    %c0_i32_0 = arith.constant 0 : i32
    return %c0_i32, %arg1 : i32, i32
  }
  func.func @transform_2(%arg0: i32, %arg1: i32) -> (i32, i32) {
    %c0_i32 = arith.constant 0 : i32
    return %arg0, %arg1 : i32, i32
  }
}

module attributes {stable_mosaic.version = 11 : i64} {
  func.func @_bn_stats_kernel(%arg0: i32, %arg1: memref<32x64xf32, #tpu.memory_space<vmem>>, %arg2: memref<1x64xf32, #tpu.memory_space<vmem>>, %arg3: memref<1x64xf32, #tpu.memory_space<vmem>>) attributes {dimension_semantics = [#tpu.dimension_semantics<arbitrary>], iteration_bounds = array<i64: 1>, scalar_prefetch = 0 : i64, scratch_operands = 0 : i64, tpu.core_type = #tpu.core_type<tc>, window_params = [{transform_indices = @transform_0, window_bounds = array<i64: 32, 64>}, {pipeline_mode = #tpu.pipeline_mode<synchronous>, transform_indices = @transform_1, window_bounds = array<i64: 1, 64>}, {pipeline_mode = #tpu.pipeline_mode<synchronous>, transform_indices = @transform_2, window_bounds = array<i64: 1, 64>}]} {
    %c0_i32 = arith.constant 0 : i32
    %0 = arith.cmpi eq, %arg0, %c0_i32 : i32
    %1 = arith.extui %0 : i1 to i32
    %c0_i32_0 = arith.constant 0 : i32
    %2 = arith.cmpi ne, %1, %c0_i32_0 : i32
    scf.if %2 {
      %cst_11 = arith.constant 0.000000e+00 : f32
      %15 = vector.broadcast %cst_11 : f32 to vector<1x64xf32>
      %c0_12 = arith.constant 0 : index
      %c0_13 = arith.constant 0 : index
      %16 = vector.load %arg2[%c0_12, %c0_13] : memref<1x64xf32, #tpu.memory_space<vmem>>, vector<1x64xf32>
      tpu.vector_store %arg2[%c0_12, %c0_13], %15 {strides = array<i32>} : memref<1x64xf32, #tpu.memory_space<vmem>>, vector<1x64xf32>,
      %cst_14 = arith.constant 0.000000e+00 : f32
      %17 = vector.broadcast %cst_14 : f32 to vector<1x64xf32>
      %c0_15 = arith.constant 0 : index
      %c0_16 = arith.constant 0 : index
      %18 = vector.load %arg3[%c0_15, %c0_16] : memref<1x64xf32, #tpu.memory_space<vmem>>, vector<1x64xf32>
      tpu.vector_store %arg3[%c0_15, %c0_16], %17 {strides = array<i32>} : memref<1x64xf32, #tpu.memory_space<vmem>>, vector<1x64xf32>,
    } else {
    }
    %c0 = arith.constant 0 : index
    %c0_1 = arith.constant 0 : index
    %3 = vector.load %arg1[%c0, %c0_1] : memref<32x64xf32, #tpu.memory_space<vmem>>, vector<32x64xf32>
    %c0_2 = arith.constant 0 : index
    %c0_3 = arith.constant 0 : index
    %4 = vector.load %arg2[%c0_2, %c0_3] : memref<1x64xf32, #tpu.memory_space<vmem>>, vector<1x64xf32>
    %cst = arith.constant dense<0.000000e+00> : vector<64xf32>
    %5 = vector.multi_reduction <add>, %3, %cst [0] : vector<32x64xf32> to vector<64xf32>
    %6 = vector.shape_cast %5 : vector<64xf32> to vector<1x64xf32>
    %7 = arith.addf %4, %6 : vector<1x64xf32>
    %c0_4 = arith.constant 0 : index
    %c0_5 = arith.constant 0 : index
    %8 = vector.load %arg2[%c0_4, %c0_5] : memref<1x64xf32, #tpu.memory_space<vmem>>, vector<1x64xf32>
    tpu.vector_store %arg2[%c0_4, %c0_5], %7 {strides = array<i32>} : memref<1x64xf32, #tpu.memory_space<vmem>>, vector<1x64xf32>,
    %c0_6 = arith.constant 0 : index
    %c0_7 = arith.constant 0 : index
    %9 = vector.load %arg3[%c0_6, %c0_7] : memref<1x64xf32, #tpu.memory_space<vmem>>, vector<1x64xf32>
    %10 = arith.mulf %3, %3 : vector<32x64xf32>
    %cst_8 = arith.constant dense<0.000000e+00> : vector<64xf32>
    %11 = vector.multi_reduction <add>, %10, %cst_8 [0] : vector<32x64xf32> to vector<64xf32>
    %12 = vector.shape_cast %11 : vector<64xf32> to vector<1x64xf32>
    %13 = arith.addf %9, %12 : vector<1x64xf32>
    %c0_9 = arith.constant 0 : index
    %c0_10 = arith.constant 0 : index
    %14 = vector.load %arg3[%c0_9, %c0_10] : memref<1x64xf32, #tpu.memory_space<vmem>>, vector<1x64xf32>
    tpu.vector_store %arg3[%c0_9, %c0_10], %13 {strides = array<i32>} : memref<1x64xf32, #tpu.memory_space<vmem>>, vector<1x64xf32>,
    return
  }
  func.func @transform_0(%arg0: i32) -> (i32, i32) {
    %c0_i32 = arith.constant 0 : i32
    %c0_i32_0 = arith.constant 0 : i32
    return %arg0, %c0_i32 : i32, i32
  }
  func.func @transform_1(%arg0: i32) -> (i32, i32) {
    %c0_i32 = arith.constant 0 : i32
    %c0_i32_0 = arith.constant 0 : i32
    %c0_i32_1 = arith.constant 0 : i32
    return %c0_i32, %c0_i32_0 : i32, i32
  }
  func.func @transform_2(%arg0: i32) -> (i32, i32) {
    %c0_i32 = arith.constant 0 : i32
    %c0_i32_0 = arith.constant 0 : i32
    %c0_i32_1 = arith.constant 0 : i32
    return %c0_i32, %c0_i32_0 : i32, i32
  }
}

module attributes {stable_mosaic.version = 11 : i64} {
  func.func @_bn_apply_kernel(%arg0: i32, %arg1: memref<32x64xf32, #tpu.memory_space<vmem>>, %arg2: memref<1x64xf32, #tpu.memory_space<vmem>>, %arg3: memref<1x64xf32, #tpu.memory_space<vmem>>, %arg4: memref<32x64xbf16, #tpu.memory_space<vmem>>) attributes {dimension_semantics = [#tpu.dimension_semantics<parallel>], iteration_bounds = array<i64: 1>, scalar_prefetch = 0 : i64, scratch_operands = 0 : i64, tpu.core_type = #tpu.core_type<tc>, window_params = [{transform_indices = @transform_0, window_bounds = array<i64: 32, 64>}, {pipeline_mode = #tpu.pipeline_mode<synchronous>, transform_indices = @transform_1, window_bounds = array<i64: 1, 64>}, {pipeline_mode = #tpu.pipeline_mode<synchronous>, transform_indices = @transform_2, window_bounds = array<i64: 1, 64>}, {transform_indices = @transform_3, window_bounds = array<i64: 32, 64>}]} {
    %c0 = arith.constant 0 : index
    %c0_0 = arith.constant 0 : index
    %0 = vector.load %arg1[%c0, %c0_0] : memref<32x64xf32, #tpu.memory_space<vmem>>, vector<32x64xf32>
    %c0_1 = arith.constant 0 : index
    %c0_2 = arith.constant 0 : index
    %1 = vector.load %arg2[%c0_1, %c0_2] : memref<1x64xf32, #tpu.memory_space<vmem>>, vector<1x64xf32>
    %2 = vector.broadcast %1 : vector<1x64xf32> to vector<32x64xf32>
    %3 = arith.mulf %0, %2 : vector<32x64xf32>
    %c0_3 = arith.constant 0 : index
    %c0_4 = arith.constant 0 : index
    %4 = vector.load %arg3[%c0_3, %c0_4] : memref<1x64xf32, #tpu.memory_space<vmem>>, vector<1x64xf32>
    %5 = vector.broadcast %4 : vector<1x64xf32> to vector<32x64xf32>
    %6 = arith.addf %3, %5 : vector<32x64xf32>
    %cst = arith.constant 0.000000e+00 : f32
    %7 = vector.broadcast %cst : f32 to vector<32x64xf32>
    %8 = arith.maximumf %6, %7 : vector<32x64xf32>
    %9 = arith.truncf %8 : vector<32x64xf32> to vector<32x64xbf16>
    %c0_5 = arith.constant 0 : index
    %c0_6 = arith.constant 0 : index
    %10 = vector.load %arg4[%c0_5, %c0_6] : memref<32x64xbf16, #tpu.memory_space<vmem>>, vector<32x64xbf16>
    tpu.vector_store %arg4[%c0_5, %c0_6], %9 {strides = array<i32>} : memref<32x64xbf16, #tpu.memory_space<vmem>>, vector<32x64xbf16>,
    return
  }
  func.func @transform_0(%arg0: i32) -> (i32, i32) {
    %c0_i32 = arith.constant 0 : i32
    %c0_i32_0 = arith.constant 0 : i32
    return %arg0, %c0_i32 : i32, i32
  }
  func.func @transform_1(%arg0: i32) -> (i32, i32) {
    %c0_i32 = arith.constant 0 : i32
    %c0_i32_0 = arith.constant 0 : i32
    %c0_i32_1 = arith.constant 0 : i32
    return %c0_i32, %c0_i32_0 : i32, i32
  }
  func.func @transform_2(%arg0: i32) -> (i32, i32) {
    %c0_i32 = arith.constant 0 : i32
    %c0_i32_0 = arith.constant 0 : i32
    %c0_i32_1 = arith.constant 0 : i32
    return %c0_i32, %c0_i32_0 : i32, i32
  }
  func.func @transform_3(%arg0: i32) -> (i32, i32) {
    %c0_i32 = arith.constant 0 : i32
    %c0_i32_0 = arith.constant 0 : i32
    return %arg0, %c0_i32 : i32, i32
  }
}

module attributes {stable_mosaic.version = 11 : i64} {
  func.func @_matmul_kernel_single_k(%arg0: i32, %arg1: i32, %arg2: memref<32x64xbf16, #tpu.memory_space<vmem>>, %arg3: memref<64x512xbf16, #tpu.memory_space<vmem>>, %arg4: memref<32x512xf32, #tpu.memory_space<vmem>>) attributes {dimension_semantics = [#tpu.dimension_semantics<parallel>, #tpu.dimension_semantics<parallel>], iteration_bounds = array<i64: 1, 1>, scalar_prefetch = 0 : i64, scratch_operands = 0 : i64, tpu.core_type = #tpu.core_type<tc>, window_params = [{transform_indices = @transform_0, window_bounds = array<i64: 32, 64>}, {transform_indices = @transform_1, window_bounds = array<i64: 64, 512>}, {transform_indices = @transform_2, window_bounds = array<i64: 32, 512>}]} {
    %c0 = arith.constant 0 : index
    %c0_0 = arith.constant 0 : index
    %0 = vector.load %arg2[%c0, %c0_0] : memref<32x64xbf16, #tpu.memory_space<vmem>>, vector<32x64xbf16>
    %c0_1 = arith.constant 0 : index
    %c0_2 = arith.constant 0 : index
    %1 = vector.load %arg3[%c0_1, %c0_2] : memref<64x512xbf16, #tpu.memory_space<vmem>>, vector<64x512xbf16>
    %cst = arith.constant dense<0.000000e+00> : vector<32x512xf32>
    %2 = tpu.matmul %0, %1, %cst {dimension_numbers = #tpu.dot_dimension_numbers<[1], [0], [0], [1], [0, 0, 1, 1], [], []>} : vector<32x64xbf16>, vector<64x512xbf16>, vector<32x512xf32> -> vector<32x512xf32>
    %c0_3 = arith.constant 0 : index
    %c0_4 = arith.constant 0 : index
    %3 = vector.load %arg4[%c0_3, %c0_4] : memref<32x512xf32, #tpu.memory_space<vmem>>, vector<32x512xf32>
    tpu.vector_store %arg4[%c0_3, %c0_4], %2 {strides = array<i32>} : memref<32x512xf32, #tpu.memory_space<vmem>>, vector<32x512xf32>,
    return
  }
  func.func @transform_0(%arg0: i32, %arg1: i32) -> (i32, i32) {
    %c0_i32 = arith.constant 0 : i32
    %c0_i32_0 = arith.constant 0 : i32
    return %arg0, %c0_i32 : i32, i32
  }
  func.func @transform_1(%arg0: i32, %arg1: i32) -> (i32, i32) {
    %c0_i32 = arith.constant 0 : i32
    %c0_i32_0 = arith.constant 0 : i32
    return %c0_i32, %arg1 : i32, i32
  }
  func.func @transform_2(%arg0: i32, %arg1: i32) -> (i32, i32) {
    %c0_i32 = arith.constant 0 : i32
    return %arg0, %arg1 : i32, i32
  }
}

module attributes {stable_mosaic.version = 11 : i64} {
  func.func @_bn_apply_kernel(%arg0: i32, %arg1: memref<128x32xf32, #tpu.memory_space<vmem>>, %arg2: memref<1x32xf32, #tpu.memory_space<vmem>>, %arg3: memref<1x32xf32, #tpu.memory_space<vmem>>, %arg4: memref<128x32xbf16, #tpu.memory_space<vmem>>) attributes {dimension_semantics = [#tpu.dimension_semantics<parallel>], iteration_bounds = array<i64: 1>, scalar_prefetch = 0 : i64, scratch_operands = 0 : i64, tpu.core_type = #tpu.core_type<tc>, window_params = [{transform_indices = @transform_0, window_bounds = array<i64: 128, 32>}, {pipeline_mode = #tpu.pipeline_mode<synchronous>, transform_indices = @transform_1, window_bounds = array<i64: 1, 32>}, {pipeline_mode = #tpu.pipeline_mode<synchronous>, transform_indices = @transform_2, window_bounds = array<i64: 1, 32>}, {transform_indices = @transform_3, window_bounds = array<i64: 128, 32>}]} {
    %c0 = arith.constant 0 : index
    %c0_0 = arith.constant 0 : index
    %0 = vector.load %arg1[%c0, %c0_0] : memref<128x32xf32, #tpu.memory_space<vmem>>, vector<128x32xf32>
    %c0_1 = arith.constant 0 : index
    %c0_2 = arith.constant 0 : index
    %1 = vector.load %arg2[%c0_1, %c0_2] : memref<1x32xf32, #tpu.memory_space<vmem>>, vector<1x32xf32>
    %2 = vector.broadcast %1 : vector<1x32xf32> to vector<128x32xf32>
    %3 = arith.mulf %0, %2 : vector<128x32xf32>
    %c0_3 = arith.constant 0 : index
    %c0_4 = arith.constant 0 : index
    %4 = vector.load %arg3[%c0_3, %c0_4] : memref<1x32xf32, #tpu.memory_space<vmem>>, vector<1x32xf32>
    %5 = vector.broadcast %4 : vector<1x32xf32> to vector<128x32xf32>
    %6 = arith.addf %3, %5 : vector<128x32xf32>
    %cst = arith.constant 0.000000e+00 : f32
    %7 = vector.broadcast %cst : f32 to vector<128x32xf32>
    %8 = arith.maximumf %6, %7 : vector<128x32xf32>
    %9 = arith.truncf %8 : vector<128x32xf32> to vector<128x32xbf16>
    %c0_5 = arith.constant 0 : index
    %c0_6 = arith.constant 0 : index
    %10 = vector.load %arg4[%c0_5, %c0_6] : memref<128x32xbf16, #tpu.memory_space<vmem>>, vector<128x32xbf16>
    tpu.vector_store %arg4[%c0_5, %c0_6], %9 {strides = array<i32>} : memref<128x32xbf16, #tpu.memory_space<vmem>>, vector<128x32xbf16>,
    return
  }
  func.func @transform_0(%arg0: i32) -> (i32, i32) {
    %c0_i32 = arith.constant 0 : i32
    %c0_i32_0 = arith.constant 0 : i32
    return %arg0, %c0_i32 : i32, i32
  }
  func.func @transform_1(%arg0: i32) -> (i32, i32) {
    %c0_i32 = arith.constant 0 : i32
    %c0_i32_0 = arith.constant 0 : i32
    %c0_i32_1 = arith.constant 0 : i32
    return %c0_i32, %c0_i32_0 : i32, i32
  }
  func.func @transform_2(%arg0: i32) -> (i32, i32) {
    %c0_i32 = arith.constant 0 : i32
    %c0_i32_0 = arith.constant 0 : i32
    %c0_i32_1 = arith.constant 0 : i32
    return %c0_i32, %c0_i32_0 : i32, i32
  }
  func.func @transform_3(%arg0: i32) -> (i32, i32) {
    %c0_i32 = arith.constant 0 : i32
    %c0_i32_0 = arith.constant 0 : i32
    return %arg0, %c0_i32 : i32, i32
  }
}

module attributes {stable_mosaic.version = 11 : i64} {
  func.func @_matmul_kernel_single_k(%arg0: i32, %arg1: i32, %arg2: memref<128x32xbf16, #tpu.memory_space<vmem>>, %arg3: memref<32x256xbf16, #tpu.memory_space<vmem>>, %arg4: memref<128x256xf32, #tpu.memory_space<vmem>>) attributes {dimension_semantics = [#tpu.dimension_semantics<parallel>, #tpu.dimension_semantics<parallel>], iteration_bounds = array<i64: 1, 1>, scalar_prefetch = 0 : i64, scratch_operands = 0 : i64, tpu.core_type = #tpu.core_type<tc>, window_params = [{transform_indices = @transform_0, window_bounds = array<i64: 128, 32>}, {transform_indices = @transform_1, window_bounds = array<i64: 32, 256>}, {transform_indices = @transform_2, window_bounds = array<i64: 128, 256>}]} {
    %c0 = arith.constant 0 : index
    %c0_0 = arith.constant 0 : index
    %0 = vector.load %arg2[%c0, %c0_0] : memref<128x32xbf16, #tpu.memory_space<vmem>>, vector<128x32xbf16>
    %c0_1 = arith.constant 0 : index
    %c0_2 = arith.constant 0 : index
    %1 = vector.load %arg3[%c0_1, %c0_2] : memref<32x256xbf16, #tpu.memory_space<vmem>>, vector<32x256xbf16>
    %cst = arith.constant dense<0.000000e+00> : vector<128x256xf32>
    %2 = tpu.matmul %0, %1, %cst {dimension_numbers = #tpu.dot_dimension_numbers<[1], [0], [0], [1], [0, 0, 1, 1], [], []>} : vector<128x32xbf16>, vector<32x256xbf16>, vector<128x256xf32> -> vector<128x256xf32>
    %c0_3 = arith.constant 0 : index
    %c0_4 = arith.constant 0 : index
    %3 = vector.load %arg4[%c0_3, %c0_4] : memref<128x256xf32, #tpu.memory_space<vmem>>, vector<128x256xf32>
    tpu.vector_store %arg4[%c0_3, %c0_4], %2 {strides = array<i32>} : memref<128x256xf32, #tpu.memory_space<vmem>>, vector<128x256xf32>,
    return
  }
  func.func @transform_0(%arg0: i32, %arg1: i32) -> (i32, i32) {
    %c0_i32 = arith.constant 0 : i32
    %c0_i32_0 = arith.constant 0 : i32
    return %arg0, %c0_i32 : i32, i32
  }
  func.func @transform_1(%arg0: i32, %arg1: i32) -> (i32, i32) {
    %c0_i32 = arith.constant 0 : i32
    %c0_i32_0 = arith.constant 0 : i32
    return %c0_i32, %arg1 : i32, i32
  }
  func.func @transform_2(%arg0: i32, %arg1: i32) -> (i32, i32) {
    %c0_i32 = arith.constant 0 : i32
    return %arg0, %arg1 : i32, i32
  }
}

module attributes {stable_mosaic.version = 11 : i64} {
  func.func @_bn_stats_kernel(%arg0: i32, %arg1: memref<128x32xf32, #tpu.memory_space<vmem>>, %arg2: memref<1x32xf32, #tpu.memory_space<vmem>>, %arg3: memref<1x32xf32, #tpu.memory_space<vmem>>) attributes {dimension_semantics = [#tpu.dimension_semantics<arbitrary>], iteration_bounds = array<i64: 1>, scalar_prefetch = 0 : i64, scratch_operands = 0 : i64, tpu.core_type = #tpu.core_type<tc>, window_params = [{transform_indices = @transform_0, window_bounds = array<i64: 128, 32>}, {pipeline_mode = #tpu.pipeline_mode<synchronous>, transform_indices = @transform_1, window_bounds = array<i64: 1, 32>}, {pipeline_mode = #tpu.pipeline_mode<synchronous>, transform_indices = @transform_2, window_bounds = array<i64: 1, 32>}]} {
    %c0_i32 = arith.constant 0 : i32
    %0 = arith.cmpi eq, %arg0, %c0_i32 : i32
    %1 = arith.extui %0 : i1 to i32
    %c0_i32_0 = arith.constant 0 : i32
    %2 = arith.cmpi ne, %1, %c0_i32_0 : i32
    scf.if %2 {
      %cst_11 = arith.constant 0.000000e+00 : f32
      %15 = vector.broadcast %cst_11 : f32 to vector<1x32xf32>
      %c0_12 = arith.constant 0 : index
      %c0_13 = arith.constant 0 : index
      %16 = vector.load %arg2[%c0_12, %c0_13] : memref<1x32xf32, #tpu.memory_space<vmem>>, vector<1x32xf32>
      tpu.vector_store %arg2[%c0_12, %c0_13], %15 {strides = array<i32>} : memref<1x32xf32, #tpu.memory_space<vmem>>, vector<1x32xf32>,
      %cst_14 = arith.constant 0.000000e+00 : f32
      %17 = vector.broadcast %cst_14 : f32 to vector<1x32xf32>
      %c0_15 = arith.constant 0 : index
      %c0_16 = arith.constant 0 : index
      %18 = vector.load %arg3[%c0_15, %c0_16] : memref<1x32xf32, #tpu.memory_space<vmem>>, vector<1x32xf32>
      tpu.vector_store %arg3[%c0_15, %c0_16], %17 {strides = array<i32>} : memref<1x32xf32, #tpu.memory_space<vmem>>, vector<1x32xf32>,
    } else {
    }
    %c0 = arith.constant 0 : index
    %c0_1 = arith.constant 0 : index
    %3 = vector.load %arg1[%c0, %c0_1] : memref<128x32xf32, #tpu.memory_space<vmem>>, vector<128x32xf32>
    %c0_2 = arith.constant 0 : index
    %c0_3 = arith.constant 0 : index
    %4 = vector.load %arg2[%c0_2, %c0_3] : memref<1x32xf32, #tpu.memory_space<vmem>>, vector<1x32xf32>
    %cst = arith.constant dense<0.000000e+00> : vector<32xf32>
    %5 = vector.multi_reduction <add>, %3, %cst [0] : vector<128x32xf32> to vector<32xf32>
    %6 = vector.shape_cast %5 : vector<32xf32> to vector<1x32xf32>
    %7 = arith.addf %4, %6 : vector<1x32xf32>
    %c0_4 = arith.constant 0 : index
    %c0_5 = arith.constant 0 : index
    %8 = vector.load %arg2[%c0_4, %c0_5] : memref<1x32xf32, #tpu.memory_space<vmem>>, vector<1x32xf32>
    tpu.vector_store %arg2[%c0_4, %c0_5], %7 {strides = array<i32>} : memref<1x32xf32, #tpu.memory_space<vmem>>, vector<1x32xf32>,
    %c0_6 = arith.constant 0 : index
    %c0_7 = arith.constant 0 : index
    %9 = vector.load %arg3[%c0_6, %c0_7] : memref<1x32xf32, #tpu.memory_space<vmem>>, vector<1x32xf32>
    %10 = arith.mulf %3, %3 : vector<128x32xf32>
    %cst_8 = arith.constant dense<0.000000e+00> : vector<32xf32>
    %11 = vector.multi_reduction <add>, %10, %cst_8 [0] : vector<128x32xf32> to vector<32xf32>
    %12 = vector.shape_cast %11 : vector<32xf32> to vector<1x32xf32>
    %13 = arith.addf %9, %12 : vector<1x32xf32>
    %c0_9 = arith.constant 0 : index
    %c0_10 = arith.constant 0 : index
    %14 = vector.load %arg3[%c0_9, %c0_10] : memref<1x32xf32, #tpu.memory_space<vmem>>, vector<1x32xf32>
    tpu.vector_store %arg3[%c0_9, %c0_10], %13 {strides = array<i32>} : memref<1x32xf32, #tpu.memory_space<vmem>>, vector<1x32xf32>,
    return
  }
  func.func @transform_0(%arg0: i32) -> (i32, i32) {
    %c0_i32 = arith.constant 0 : i32
    %c0_i32_0 = arith.constant 0 : i32
    return %arg0, %c0_i32 : i32, i32
  }
  func.func @transform_1(%arg0: i32) -> (i32, i32) {
    %c0_i32 = arith.constant 0 : i32
    %c0_i32_0 = arith.constant 0 : i32
    %c0_i32_1 = arith.constant 0 : i32
    return %c0_i32, %c0_i32_0 : i32, i32
  }
  func.func @transform_2(%arg0: i32) -> (i32, i32) {
    %c0_i32 = arith.constant 0 : i32
    %c0_i32_0 = arith.constant 0 : i32
    %c0_i32_1 = arith.constant 0 : i32
    return %c0_i32, %c0_i32_0 : i32, i32
  }
}

module attributes {stable_mosaic.version = 11 : i64} {
  func.func @_bn_stats_kernel(%arg0: i32, %arg1: memref<512x16xf32, #tpu.memory_space<vmem>>, %arg2: memref<1x16xf32, #tpu.memory_space<vmem>>, %arg3: memref<1x16xf32, #tpu.memory_space<vmem>>) attributes {dimension_semantics = [#tpu.dimension_semantics<arbitrary>], iteration_bounds = array<i64: 1>, scalar_prefetch = 0 : i64, scratch_operands = 0 : i64, tpu.core_type = #tpu.core_type<tc>, window_params = [{transform_indices = @transform_0, window_bounds = array<i64: 512, 16>}, {pipeline_mode = #tpu.pipeline_mode<synchronous>, transform_indices = @transform_1, window_bounds = array<i64: 1, 16>}, {pipeline_mode = #tpu.pipeline_mode<synchronous>, transform_indices = @transform_2, window_bounds = array<i64: 1, 16>}]} {
    %c0_i32 = arith.constant 0 : i32
    %0 = arith.cmpi eq, %arg0, %c0_i32 : i32
    %1 = arith.extui %0 : i1 to i32
    %c0_i32_0 = arith.constant 0 : i32
    %2 = arith.cmpi ne, %1, %c0_i32_0 : i32
    scf.if %2 {
      %cst_11 = arith.constant 0.000000e+00 : f32
      %15 = vector.broadcast %cst_11 : f32 to vector<1x16xf32>
      %c0_12 = arith.constant 0 : index
      %c0_13 = arith.constant 0 : index
      %16 = vector.load %arg2[%c0_12, %c0_13] : memref<1x16xf32, #tpu.memory_space<vmem>>, vector<1x16xf32>
      tpu.vector_store %arg2[%c0_12, %c0_13], %15 {strides = array<i32>} : memref<1x16xf32, #tpu.memory_space<vmem>>, vector<1x16xf32>,
      %cst_14 = arith.constant 0.000000e+00 : f32
      %17 = vector.broadcast %cst_14 : f32 to vector<1x16xf32>
      %c0_15 = arith.constant 0 : index
      %c0_16 = arith.constant 0 : index
      %18 = vector.load %arg3[%c0_15, %c0_16] : memref<1x16xf32, #tpu.memory_space<vmem>>, vector<1x16xf32>
      tpu.vector_store %arg3[%c0_15, %c0_16], %17 {strides = array<i32>} : memref<1x16xf32, #tpu.memory_space<vmem>>, vector<1x16xf32>,
    } else {
    }
    %c0 = arith.constant 0 : index
    %c0_1 = arith.constant 0 : index
    %3 = vector.load %arg1[%c0, %c0_1] : memref<512x16xf32, #tpu.memory_space<vmem>>, vector<512x16xf32>
    %c0_2 = arith.constant 0 : index
    %c0_3 = arith.constant 0 : index
    %4 = vector.load %arg2[%c0_2, %c0_3] : memref<1x16xf32, #tpu.memory_space<vmem>>, vector<1x16xf32>
    %cst = arith.constant dense<0.000000e+00> : vector<16xf32>
    %5 = vector.multi_reduction <add>, %3, %cst [0] : vector<512x16xf32> to vector<16xf32>
    %6 = vector.shape_cast %5 : vector<16xf32> to vector<1x16xf32>
    %7 = arith.addf %4, %6 : vector<1x16xf32>
    %c0_4 = arith.constant 0 : index
    %c0_5 = arith.constant 0 : index
    %8 = vector.load %arg2[%c0_4, %c0_5] : memref<1x16xf32, #tpu.memory_space<vmem>>, vector<1x16xf32>
    tpu.vector_store %arg2[%c0_4, %c0_5], %7 {strides = array<i32>} : memref<1x16xf32, #tpu.memory_space<vmem>>, vector<1x16xf32>,
    %c0_6 = arith.constant 0 : index
    %c0_7 = arith.constant 0 : index
    %9 = vector.load %arg3[%c0_6, %c0_7] : memref<1x16xf32, #tpu.memory_space<vmem>>, vector<1x16xf32>
    %10 = arith.mulf %3, %3 : vector<512x16xf32>
    %cst_8 = arith.constant dense<0.000000e+00> : vector<16xf32>
    %11 = vector.multi_reduction <add>, %10, %cst_8 [0] : vector<512x16xf32> to vector<16xf32>
    %12 = vector.shape_cast %11 : vector<16xf32> to vector<1x16xf32>
    %13 = arith.addf %9, %12 : vector<1x16xf32>
    %c0_9 = arith.constant 0 : index
    %c0_10 = arith.constant 0 : index
    %14 = vector.load %arg3[%c0_9, %c0_10] : memref<1x16xf32, #tpu.memory_space<vmem>>, vector<1x16xf32>
    tpu.vector_store %arg3[%c0_9, %c0_10], %13 {strides = array<i32>} : memref<1x16xf32, #tpu.memory_space<vmem>>, vector<1x16xf32>,
    return
  }
  func.func @transform_0(%arg0: i32) -> (i32, i32) {
    %c0_i32 = arith.constant 0 : i32
    %c0_i32_0 = arith.constant 0 : i32
    return %arg0, %c0_i32 : i32, i32
  }
  func.func @transform_1(%arg0: i32) -> (i32, i32) {
    %c0_i32 = arith.constant 0 : i32
    %c0_i32_0 = arith.constant 0 : i32
    %c0_i32_1 = arith.constant 0 : i32
    return %c0_i32, %c0_i32_0 : i32, i32
  }
  func.func @transform_2(%arg0: i32) -> (i32, i32) {
    %c0_i32 = arith.constant 0 : i32
    %c0_i32_0 = arith.constant 0 : i32
    %c0_i32_1 = arith.constant 0 : i32
    return %c0_i32, %c0_i32_0 : i32, i32
  }
}

module attributes {stable_mosaic.version = 11 : i64} {
  func.func @_bn_apply_kernel(%arg0: i32, %arg1: memref<512x16xf32, #tpu.memory_space<vmem>>, %arg2: memref<1x16xf32, #tpu.memory_space<vmem>>, %arg3: memref<1x16xf32, #tpu.memory_space<vmem>>, %arg4: memref<512x16xbf16, #tpu.memory_space<vmem>>) attributes {dimension_semantics = [#tpu.dimension_semantics<parallel>], iteration_bounds = array<i64: 1>, scalar_prefetch = 0 : i64, scratch_operands = 0 : i64, tpu.core_type = #tpu.core_type<tc>, window_params = [{transform_indices = @transform_0, window_bounds = array<i64: 512, 16>}, {pipeline_mode = #tpu.pipeline_mode<synchronous>, transform_indices = @transform_1, window_bounds = array<i64: 1, 16>}, {pipeline_mode = #tpu.pipeline_mode<synchronous>, transform_indices = @transform_2, window_bounds = array<i64: 1, 16>}, {transform_indices = @transform_3, window_bounds = array<i64: 512, 16>}]} {
    %c0 = arith.constant 0 : index
    %c0_0 = arith.constant 0 : index
    %0 = vector.load %arg1[%c0, %c0_0] : memref<512x16xf32, #tpu.memory_space<vmem>>, vector<512x16xf32>
    %c0_1 = arith.constant 0 : index
    %c0_2 = arith.constant 0 : index
    %1 = vector.load %arg2[%c0_1, %c0_2] : memref<1x16xf32, #tpu.memory_space<vmem>>, vector<1x16xf32>
    %2 = vector.broadcast %1 : vector<1x16xf32> to vector<512x16xf32>
    %3 = arith.mulf %0, %2 : vector<512x16xf32>
    %c0_3 = arith.constant 0 : index
    %c0_4 = arith.constant 0 : index
    %4 = vector.load %arg3[%c0_3, %c0_4] : memref<1x16xf32, #tpu.memory_space<vmem>>, vector<1x16xf32>
    %5 = vector.broadcast %4 : vector<1x16xf32> to vector<512x16xf32>
    %6 = arith.addf %3, %5 : vector<512x16xf32>
    %cst = arith.constant 0.000000e+00 : f32
    %7 = vector.broadcast %cst : f32 to vector<512x16xf32>
    %8 = arith.maximumf %6, %7 : vector<512x16xf32>
    %9 = arith.truncf %8 : vector<512x16xf32> to vector<512x16xbf16>
    %c0_5 = arith.constant 0 : index
    %c0_6 = arith.constant 0 : index
    %10 = vector.load %arg4[%c0_5, %c0_6] : memref<512x16xbf16, #tpu.memory_space<vmem>>, vector<512x16xbf16>
    tpu.vector_store %arg4[%c0_5, %c0_6], %9 {strides = array<i32>} : memref<512x16xbf16, #tpu.memory_space<vmem>>, vector<512x16xbf16>,
    return
  }
  func.func @transform_0(%arg0: i32) -> (i32, i32) {
    %c0_i32 = arith.constant 0 : i32
    %c0_i32_0 = arith.constant 0 : i32
    return %arg0, %c0_i32 : i32, i32
  }
  func.func @transform_1(%arg0: i32) -> (i32, i32) {
    %c0_i32 = arith.constant 0 : i32
    %c0_i32_0 = arith.constant 0 : i32
    %c0_i32_1 = arith.constant 0 : i32
    return %c0_i32, %c0_i32_0 : i32, i32
  }
  func.func @transform_2(%arg0: i32) -> (i32, i32) {
    %c0_i32 = arith.constant 0 : i32
    %c0_i32_0 = arith.constant 0 : i32
    %c0_i32_1 = arith.constant 0 : i32
    return %c0_i32, %c0_i32_0 : i32, i32
  }
  func.func @transform_3(%arg0: i32) -> (i32, i32) {
    %c0_i32 = arith.constant 0 : i32
    %c0_i32_0 = arith.constant 0 : i32
    return %arg0, %c0_i32 : i32, i32
  }
}

module attributes {stable_mosaic.version = 11 : i64} {
  func.func @_matmul_kernel_single_k(%arg0: i32, %arg1: i32, %arg2: memref<256x16xbf16, #tpu.memory_space<vmem>>, %arg3: memref<16x128xbf16, #tpu.memory_space<vmem>>, %arg4: memref<256x128xf32, #tpu.memory_space<vmem>>) attributes {dimension_semantics = [#tpu.dimension_semantics<parallel>, #tpu.dimension_semantics<parallel>], iteration_bounds = array<i64: 2, 1>, scalar_prefetch = 0 : i64, scratch_operands = 0 : i64, tpu.core_type = #tpu.core_type<tc>, window_params = [{transform_indices = @transform_0, window_bounds = array<i64: 256, 16>}, {transform_indices = @transform_1, window_bounds = array<i64: 16, 128>}, {transform_indices = @transform_2, window_bounds = array<i64: 256, 128>}]} {
    %c0 = arith.constant 0 : index
    %c0_0 = arith.constant 0 : index
    %0 = vector.load %arg2[%c0, %c0_0] : memref<256x16xbf16, #tpu.memory_space<vmem>>, vector<256x16xbf16>
    %c0_1 = arith.constant 0 : index
    %c0_2 = arith.constant 0 : index
    %1 = vector.load %arg3[%c0_1, %c0_2] : memref<16x128xbf16, #tpu.memory_space<vmem>>, vector<16x128xbf16>
    %cst = arith.constant dense<0.000000e+00> : vector<256x128xf32>
    %2 = tpu.matmul %0, %1, %cst {dimension_numbers = #tpu.dot_dimension_numbers<[1], [0], [0], [1], [0, 0, 1, 1], [], []>} : vector<256x16xbf16>, vector<16x128xbf16>, vector<256x128xf32> -> vector<256x128xf32>
    %c0_3 = arith.constant 0 : index
    %c0_4 = arith.constant 0 : index
    %3 = vector.load %arg4[%c0_3, %c0_4] : memref<256x128xf32, #tpu.memory_space<vmem>>, vector<256x128xf32>
    tpu.vector_store %arg4[%c0_3, %c0_4], %2 {strides = array<i32>} : memref<256x128xf32, #tpu.memory_space<vmem>>, vector<256x128xf32>,
    return
  }
  func.func @transform_0(%arg0: i32, %arg1: i32) -> (i32, i32) {
    %c0_i32 = arith.constant 0 : i32
    %c0_i32_0 = arith.constant 0 : i32
    return %arg0, %c0_i32 : i32, i32
  }
  func.func @transform_1(%arg0: i32, %arg1: i32) -> (i32, i32) {
    %c0_i32 = arith.constant 0 : i32
    %c0_i32_0 = arith.constant 0 : i32
    return %c0_i32, %arg1 : i32, i32
  }
  func.func @transform_2(%arg0: i32, %arg1: i32) -> (i32, i32) {
    %c0_i32 = arith.constant 0 : i32
    return %arg0, %arg1 : i32, i32
  }
}

module attributes {stable_mosaic.version = 11 : i64} {
  func.func @_bn_stats_kernel(%arg0: i32, %arg1: memref<512x8xf32, #tpu.memory_space<vmem>>, %arg2: memref<1x8xf32, #tpu.memory_space<vmem>>, %arg3: memref<1x8xf32, #tpu.memory_space<vmem>>) attributes {dimension_semantics = [#tpu.dimension_semantics<arbitrary>], iteration_bounds = array<i64: 4>, scalar_prefetch = 0 : i64, scratch_operands = 0 : i64, tpu.core_type = #tpu.core_type<tc>, window_params = [{transform_indices = @transform_0, window_bounds = array<i64: 512, 8>}, {pipeline_mode = #tpu.pipeline_mode<synchronous>, transform_indices = @transform_1, window_bounds = array<i64: 1, 8>}, {pipeline_mode = #tpu.pipeline_mode<synchronous>, transform_indices = @transform_2, window_bounds = array<i64: 1, 8>}]} {
    %c0_i32 = arith.constant 0 : i32
    %0 = arith.cmpi eq, %arg0, %c0_i32 : i32
    %1 = arith.extui %0 : i1 to i32
    %c0_i32_0 = arith.constant 0 : i32
    %2 = arith.cmpi ne, %1, %c0_i32_0 : i32
    scf.if %2 {
      %cst_11 = arith.constant 0.000000e+00 : f32
      %15 = vector.broadcast %cst_11 : f32 to vector<1x8xf32>
      %c0_12 = arith.constant 0 : index
      %c0_13 = arith.constant 0 : index
      %16 = vector.load %arg2[%c0_12, %c0_13] : memref<1x8xf32, #tpu.memory_space<vmem>>, vector<1x8xf32>
      tpu.vector_store %arg2[%c0_12, %c0_13], %15 {strides = array<i32>} : memref<1x8xf32, #tpu.memory_space<vmem>>, vector<1x8xf32>,
      %cst_14 = arith.constant 0.000000e+00 : f32
      %17 = vector.broadcast %cst_14 : f32 to vector<1x8xf32>
      %c0_15 = arith.constant 0 : index
      %c0_16 = arith.constant 0 : index
      %18 = vector.load %arg3[%c0_15, %c0_16] : memref<1x8xf32, #tpu.memory_space<vmem>>, vector<1x8xf32>
      tpu.vector_store %arg3[%c0_15, %c0_16], %17 {strides = array<i32>} : memref<1x8xf32, #tpu.memory_space<vmem>>, vector<1x8xf32>,
    } else {
    }
    %c0 = arith.constant 0 : index
    %c0_1 = arith.constant 0 : index
    %3 = vector.load %arg1[%c0, %c0_1] : memref<512x8xf32, #tpu.memory_space<vmem>>, vector<512x8xf32>
    %c0_2 = arith.constant 0 : index
    %c0_3 = arith.constant 0 : index
    %4 = vector.load %arg2[%c0_2, %c0_3] : memref<1x8xf32, #tpu.memory_space<vmem>>, vector<1x8xf32>
    %cst = arith.constant dense<0.000000e+00> : vector<8xf32>
    %5 = vector.multi_reduction <add>, %3, %cst [0] : vector<512x8xf32> to vector<8xf32>
    %6 = vector.shape_cast %5 : vector<8xf32> to vector<1x8xf32>
    %7 = arith.addf %4, %6 : vector<1x8xf32>
    %c0_4 = arith.constant 0 : index
    %c0_5 = arith.constant 0 : index
    %8 = vector.load %arg2[%c0_4, %c0_5] : memref<1x8xf32, #tpu.memory_space<vmem>>, vector<1x8xf32>
    tpu.vector_store %arg2[%c0_4, %c0_5], %7 {strides = array<i32>} : memref<1x8xf32, #tpu.memory_space<vmem>>, vector<1x8xf32>,
    %c0_6 = arith.constant 0 : index
    %c0_7 = arith.constant 0 : index
    %9 = vector.load %arg3[%c0_6, %c0_7] : memref<1x8xf32, #tpu.memory_space<vmem>>, vector<1x8xf32>
    %10 = arith.mulf %3, %3 : vector<512x8xf32>
    %cst_8 = arith.constant dense<0.000000e+00> : vector<8xf32>
    %11 = vector.multi_reduction <add>, %10, %cst_8 [0] : vector<512x8xf32> to vector<8xf32>
    %12 = vector.shape_cast %11 : vector<8xf32> to vector<1x8xf32>
    %13 = arith.addf %9, %12 : vector<1x8xf32>
    %c0_9 = arith.constant 0 : index
    %c0_10 = arith.constant 0 : index
    %14 = vector.load %arg3[%c0_9, %c0_10] : memref<1x8xf32, #tpu.memory_space<vmem>>, vector<1x8xf32>
    tpu.vector_store %arg3[%c0_9, %c0_10], %13 {strides = array<i32>} : memref<1x8xf32, #tpu.memory_space<vmem>>, vector<1x8xf32>,
    return
  }
  func.func @transform_0(%arg0: i32) -> (i32, i32) {
    %c0_i32 = arith.constant 0 : i32
    %c0_i32_0 = arith.constant 0 : i32
    return %arg0, %c0_i32 : i32, i32
  }
  func.func @transform_1(%arg0: i32) -> (i32, i32) {
    %c0_i32 = arith.constant 0 : i32
    %c0_i32_0 = arith.constant 0 : i32
    %c0_i32_1 = arith.constant 0 : i32
    return %c0_i32, %c0_i32_0 : i32, i32
  }
  func.func @transform_2(%arg0: i32) -> (i32, i32) {
    %c0_i32 = arith.constant 0 : i32
    %c0_i32_0 = arith.constant 0 : i32
    %c0_i32_1 = arith.constant 0 : i32
    return %c0_i32, %c0_i32_0 : i32, i32
  }
}

module attributes {stable_mosaic.version = 11 : i64} {
  func.func @_bn_apply_kernel(%arg0: i32, %arg1: memref<512x8xf32, #tpu.memory_space<vmem>>, %arg2: memref<1x8xf32, #tpu.memory_space<vmem>>, %arg3: memref<1x8xf32, #tpu.memory_space<vmem>>, %arg4: memref<512x8xbf16, #tpu.memory_space<vmem>>) attributes {dimension_semantics = [#tpu.dimension_semantics<parallel>], iteration_bounds = array<i64: 4>, scalar_prefetch = 0 : i64, scratch_operands = 0 : i64, tpu.core_type = #tpu.core_type<tc>, window_params = [{transform_indices = @transform_0, window_bounds = array<i64: 512, 8>}, {pipeline_mode = #tpu.pipeline_mode<synchronous>, transform_indices = @transform_1, window_bounds = array<i64: 1, 8>}, {pipeline_mode = #tpu.pipeline_mode<synchronous>, transform_indices = @transform_2, window_bounds = array<i64: 1, 8>}, {transform_indices = @transform_3, window_bounds = array<i64: 512, 8>}]} {
    %c0 = arith.constant 0 : index
    %c0_0 = arith.constant 0 : index
    %0 = vector.load %arg1[%c0, %c0_0] : memref<512x8xf32, #tpu.memory_space<vmem>>, vector<512x8xf32>
    %c0_1 = arith.constant 0 : index
    %c0_2 = arith.constant 0 : index
    %1 = vector.load %arg2[%c0_1, %c0_2] : memref<1x8xf32, #tpu.memory_space<vmem>>, vector<1x8xf32>
    %2 = vector.broadcast %1 : vector<1x8xf32> to vector<512x8xf32>
    %3 = arith.mulf %0, %2 : vector<512x8xf32>
    %c0_3 = arith.constant 0 : index
    %c0_4 = arith.constant 0 : index
    %4 = vector.load %arg3[%c0_3, %c0_4] : memref<1x8xf32, #tpu.memory_space<vmem>>, vector<1x8xf32>
    %5 = vector.broadcast %4 : vector<1x8xf32> to vector<512x8xf32>
    %6 = arith.addf %3, %5 : vector<512x8xf32>
    %cst = arith.constant 0.000000e+00 : f32
    %7 = vector.broadcast %cst : f32 to vector<512x8xf32>
    %8 = arith.maximumf %6, %7 : vector<512x8xf32>
    %9 = arith.truncf %8 : vector<512x8xf32> to vector<512x8xbf16>
    %c0_5 = arith.constant 0 : index
    %c0_6 = arith.constant 0 : index
    %10 = vector.load %arg4[%c0_5, %c0_6] : memref<512x8xbf16, #tpu.memory_space<vmem>>, vector<512x8xbf16>
    tpu.vector_store %arg4[%c0_5, %c0_6], %9 {strides = array<i32>} : memref<512x8xbf16, #tpu.memory_space<vmem>>, vector<512x8xbf16>,
    return
  }
  func.func @transform_0(%arg0: i32) -> (i32, i32) {
    %c0_i32 = arith.constant 0 : i32
    %c0_i32_0 = arith.constant 0 : i32
    return %arg0, %c0_i32 : i32, i32
  }
  func.func @transform_1(%arg0: i32) -> (i32, i32) {
    %c0_i32 = arith.constant 0 : i32
    %c0_i32_0 = arith.constant 0 : i32
    %c0_i32_1 = arith.constant 0 : i32
    return %c0_i32, %c0_i32_0 : i32, i32
  }
  func.func @transform_2(%arg0: i32) -> (i32, i32) {
    %c0_i32 = arith.constant 0 : i32
    %c0_i32_0 = arith.constant 0 : i32
    %c0_i32_1 = arith.constant 0 : i32
    return %c0_i32, %c0_i32_0 : i32, i32
  }
  func.func @transform_3(%arg0: i32) -> (i32, i32) {
    %c0_i32 = arith.constant 0 : i32
    %c0_i32_0 = arith.constant 0 : i32
    return %arg0, %c0_i32 : i32, i32
  }
}

module attributes {stable_mosaic.version = 11 : i64} {
  func.func @_matmul_kernel_single_k(%arg0: i32, %arg1: i32, %arg2: memref<256x16xbf16, #tpu.memory_space<vmem>>, %arg3: memref<16x128xbf16, #tpu.memory_space<vmem>>, %arg4: memref<256x128xf32, #tpu.memory_space<vmem>>) attributes {dimension_semantics = [#tpu.dimension_semantics<parallel>, #tpu.dimension_semantics<parallel>], iteration_bounds = array<i64: 8, 1>, scalar_prefetch = 0 : i64, scratch_operands = 0 : i64, tpu.core_type = #tpu.core_type<tc>, window_params = [{transform_indices = @transform_0, window_bounds = array<i64: 256, 16>}, {transform_indices = @transform_1, window_bounds = array<i64: 16, 128>}, {transform_indices = @transform_2, window_bounds = array<i64: 256, 128>}]} {
    %c0 = arith.constant 0 : index
    %c0_0 = arith.constant 0 : index
    %0 = vector.load %arg2[%c0, %c0_0] : memref<256x16xbf16, #tpu.memory_space<vmem>>, vector<256x16xbf16>
    %c0_1 = arith.constant 0 : index
    %c0_2 = arith.constant 0 : index
    %1 = vector.load %arg3[%c0_1, %c0_2] : memref<16x128xbf16, #tpu.memory_space<vmem>>, vector<16x128xbf16>
    %cst = arith.constant dense<0.000000e+00> : vector<256x128xf32>
    %2 = tpu.matmul %0, %1, %cst {dimension_numbers = #tpu.dot_dimension_numbers<[1], [0], [0], [1], [0, 0, 1, 1], [], []>} : vector<256x16xbf16>, vector<16x128xbf16>, vector<256x128xf32> -> vector<256x128xf32>
    %c0_3 = arith.constant 0 : index
    %c0_4 = arith.constant 0 : index
    %3 = vector.load %arg4[%c0_3, %c0_4] : memref<256x128xf32, #tpu.memory_space<vmem>>, vector<256x128xf32>
    tpu.vector_store %arg4[%c0_3, %c0_4], %2 {strides = array<i32>} : memref<256x128xf32, #tpu.memory_space<vmem>>, vector<256x128xf32>,
    return
  }
  func.func @transform_0(%arg0: i32, %arg1: i32) -> (i32, i32) {
    %c0_i32 = arith.constant 0 : i32
    %c0_i32_0 = arith.constant 0 : i32
    return %arg0, %c0_i32 : i32, i32
  }
  func.func @transform_1(%arg0: i32, %arg1: i32) -> (i32, i32) {
    %c0_i32 = arith.constant 0 : i32
    %c0_i32_0 = arith.constant 0 : i32
    return %c0_i32, %arg1 : i32, i32
  }
  func.func @transform_2(%arg0: i32, %arg1: i32) -> (i32, i32) {
    %c0_i32 = arith.constant 0 : i32
    return %arg0, %arg1 : i32, i32
  }
}

module attributes {stable_mosaic.version = 11 : i64} {
  func.func @_tanh_kernel(%arg0: i32, %arg1: memref<48x512xf32, #tpu.memory_space<vmem>>, %arg2: memref<48x512xf32, #tpu.memory_space<vmem>>) attributes {dimension_semantics = [#tpu.dimension_semantics<parallel>], iteration_bounds = array<i64: 1>, scalar_prefetch = 0 : i64, scratch_operands = 0 : i64, tpu.core_type = #tpu.core_type<tc>, window_params = [{transform_indices = @transform_0, window_bounds = array<i64: 48, 512>}, {transform_indices = @transform_1, window_bounds = array<i64: 48, 512>}]} {
    %c0 = arith.constant 0 : index
    %c0_0 = arith.constant 0 : index
    %0 = vector.load %arg1[%c0, %c0_0] : memref<48x512xf32, #tpu.memory_space<vmem>>, vector<48x512xf32>
    %1 = math.tanh %0 : vector<48x512xf32>
    %c0_1 = arith.constant 0 : index
    %c0_2 = arith.constant 0 : index
    %2 = vector.load %arg2[%c0_1, %c0_2] : memref<48x512xf32, #tpu.memory_space<vmem>>, vector<48x512xf32>
    tpu.vector_store %arg2[%c0_1, %c0_2], %1 {strides = array<i32>} : memref<48x512xf32, #tpu.memory_space<vmem>>, vector<48x512xf32>,
    return
  }
  func.func @transform_0(%arg0: i32) -> (i32, i32) {
    %c0_i32 = arith.constant 0 : i32
    %c0_i32_0 = arith.constant 0 : i32
    return %arg0, %c0_i32 : i32, i32
  }
  func.func @transform_1(%arg0: i32) -> (i32, i32) {
    %c0_i32 = arith.constant 0 : i32
    %c0_i32_0 = arith.constant 0 : i32
    return %arg0, %c0_i32 : i32, i32
  }
}

</mosaic_0001>

<bundles_post_ra>
// kernel: _lambda_.14
= control target key start
LH: loop header
LB: loop body
LE: loop exit
PB: predicated region body
PF: predicated region fallthrough
CT: control target
= control target key end

     0   :  { %7 = vsyncpa [#allocation3], 0  ;;  %s687_s0 = inlined_call_operand.vmem [shape: bf16[8,16], index: 0, kind: input, shape index: {}]   ;;  %s688_s1 = inlined_call_operand.hbm [shape: bf16[16,1024], index: 1, kind: input, shape index: {}]   ;;  %s689_s2 = inlined_call_operand.vmem [shape: f32[8,1024], index: 2, kind: output, shape index: {}]  }
   0x1   :  { %9 = vsyncpa [#allocation3 + $0x1], 0  ;;  %s597_s9 = smov 0   ;;  %s599_s10 = smov 0  }
   0x2   :  { %s601_s11 = smov 0   ;;  %s603_s12 = smov 0  }
   0x3   :  { %s605_s13 = smov 0   ;;  %s607_s14 = smov 0  }
   0x4 LB: > { %s400_s15 = sadd.s32 4294967295, %s577_s14   ;;  %s24_s16 = sadd.s32 1, %s573_s13  ;;  %s577_s14 = sphi %s607_s14, %s15_s14   ;;  %s573_s13 = sphi %s605_s13, %s696_s13   ;;  %s569_s12 = sphi %s603_s12, %s695_s12   ;;  %s565_s11 = sphi %s601_s11, %s694_s11   ;;  %s561_s10 = sphi %s599_s10, %s693_s10   ;;  %s557_s9 = sphi %s597_s9, %s692_s9  }
   0x5   : > { %p25_p0 = scmp.ge.s32.totalorder %s24_s16, 2  ;;  %s60_s17 = sadd.s32 1, %s565_s11 }
   0x6   : > { %p67_p1 = scmp.ne.s32.totalorder %s565_s11, %s561_s10  ;;  %p68_p2 = scmp.eq.s32.totalorder %s577_s14, 0 }
   0x7   : > { %s698_s16 = smov (%p25_p0, %s24_s16), 0  ;;  %p73_p4 = scmp.ne.s32.totalorder %s561_s10, %s557_s9 }
   0x8   : > { %p633_p3 = por %p68_p2, %p67_p1  ;;  %s57_s19 = ssub.s32 %s573_s13, %s698_s16 }
   0x9   : > { %p74_p5 = scmp.eq.s32.totalorder %s400_s15, 0  ;;  %p58_p6 = scmp.eq.s32.totalorder %s57_s19, 0 }
   0xa   : > { %p445_p8 = scmp.lt.s32.totalorder %s577_s14, 2  ;;  %s132_s22 = sand.u32 1, %s565_s11  }
   0xb   : > { %p640_p7 = por %p74_p5, %p73_p4  ;;  %s434_s23 = sshll.u32 %s573_s13, 4 }
   0xc   : > { %s646_s21 = scalar_select %p58_p6, %s565_s11, %s60_s17  }
   0xd   : > { %s405_s24 = sshll.u32 %s132_s22, 5  ;;  %s141_s27 = scalar_lea.hbm %s688_s1, %s434_s23 }
   0xe   : > { %s142_s28 = sshll.u32 %s141_s27, 4  ;;  %s136_s29 = scalar_lea.vmem [#allocation2], %s405_s24  ;;  %s143_s28 = int_to_ptr.hbm [resolvable:$true] %s142_s28 }
   0xf   : > { %s144_s30 = sshll.u32 %s136_s29, 4  ;;  %p442_p9 = pnand %p445_p8, %p633_p3  ;;  %s145_s30 = int_to_ptr.vmem [resolvable:$true] %s144_s30 }
  0x10   : > { %p408_p10 = scmp.ge.s32.totalorder %s577_s14, 1  ;;  %s133_s3 = scalar_lea.sflag [#allocation3], %s132_s22 }
  0x11   : > { %s579_s4 = smov 512   ;;  %s580_s5 = smov 256  }
  0x12   : > { %s581_s6 = smov 16   ;;  %p152_p11 = scmp.lt.s32.totalorder %s577_s14, 3 }
  0x13   : > { %444 = dma.hbm_to_vmem [thread:$0]  (!%p442_p9), %s143_s28, 512, %s145_s30, %s133_s3, %s579_s4, %s580_s5, %s581_s6  }
  0x14   : > { %p153_p12 = pnand %p408_p10, %p152_p11 }
  0x15   : > { %s158_s7 = sand.u32 (!%p153_p12), 1, %s561_s10  }
  0x16   : > { %156 = sbr.rel (%p153_p12) target bundleno = 176 (0xb0), region = 28  ;;  %s409_s8 = sshll.u32 (!%p153_p12), %s158_s7, 5 }
  0x17   : > { %s159_s9 = scalar_lea.sflag (!%p153_p12), [#allocation3], %s158_s7  ;;  %s162_s15 = scalar_lea.vmem (!%p153_p12), [#allocation2], %s409_s8 }
  0x1b   : > { %552 = dma.done.wait (%p640_p7), %s159_s9, 512  }
  0x1c   : > { %554 = vsyncadd (%p640_p7), %s159_s9, 4294966784  ;;  %v414_v0 = vld [vmem:[%s162_s15] sm:$0xf]  ;;  %v437_v1 = vld [vmem:[%s162_s15 + $0xc] sm:$0xf0]  ;;  %vm233_vm0 = vcmask 130048  }
  0x1d   : > { %v435_v2 = vld [vmem:[%s162_s15 + $0x4] sm:$0xf]  ;;  %v415_v3 = vor.u32 %v437_v1, %v414_v0  ;;  %v416_v4 = vld [vmem:[%s162_s15 + $0x10] sm:$0xf0]  ;;  %v422_v5 = vld [vmem:[%s162_s15 + $0x8] sm:$0xf] }
  0x1e   : > { %v438_v6 = vld [vmem:[%s162_s15 + $0x14] sm:$0xf0]  ;;  %v419_v7 = vor.u32 %v435_v2, %v416_v4  ;;  %v436_v9 = vld [vmem:[%s162_s15 + $0xc] sm:$0xf]  ;;  %v424_v10 = vld [vmem:[%s162_s15 + $0x18] sm:$0xf0] }
  0x1f   : > { %v423_v8 = vor.u32 %v438_v6, %v422_v5  ;;  %244 = vmatpush.bf16.msra.mxu0 %v415_v3  ;;  %v427_v11 = vor.u32 %v436_v9, %v424_v10  ;;  %v208_v12 = vld [vmem:[%s687_s0] sm:$0xf]  ;;  %s410_s19 = sshll.u32 %s569_s12, 2 }
  0x20   : > { %257 = vmatpush.bf16.msra.mxu1 %v419_v7  ;;  %p200_p13 = scmp.lt.s32.totalorder %s410_s19, 7 }
  0x21   : > { %270 = vmatpush.bf16.msra.mxu2 %v423_v8  ;;  %283 = vmatpush.bf16.msra.mxu3 %v427_v11 }
  0x22   : > { %428 = vmatmul.msk.bf16.vlgmr.msra.gmra.mxu0 %vm233_vm0, %v208_v12  ;;  %s700_s19 = smov (!%p200_p13, %s410_s19), 7 }
  0x23   : > { %429 = vmatmul.msk.bf16.vlgmr.msra.gmra.mxu1 %vm233_vm0, %v208_v12  ;;  %s411_s20 = sshll.u32 %s700_s19, 3 }
  0x24   : > { %430 = vmatmul.msk.bf16.vlgmr.msra.gmra.mxu2 %vm233_vm0, %v208_v12  ;;  %431 = vmatmul.msk.bf16.vlgmr.msra.gmra.mxu3 %vm233_vm0, %v208_v12  ;;  %s205_s24 = scalar_lea.vmem %s689_s2, %s411_s20 }
  0x9f   : > { %v246_v13 = vpop.f32.mrf.mxu0 }
  0xa0   : > { %289 = vst [vmem:[%s205_s24] sm:$0xff] %v246_v13  ;;  %v259_v14 = vpop.f32.mrf.mxu1 }
  0xa1   : > { %290 = vst [vmem:[%s205_s24 + $0x8] sm:$0xff] %v259_v14 }
  0xa7   : > { %v272_v15 = vpop.f32.mrf.mxu2  ;;  %v285_v16 = vpop.f32.mrf.mxu3 }
  0xa8   : > { %291 = vst [vmem:[%s205_s24 + $0x10] sm:$0xff] %v272_v15  ;;  %v248_v17 = vpop.f32.mrf.mxu0  ;;  %v261_v18 = vpop.f32.mrf.mxu1 }
  0xa9   : > { %292 = vst [vmem:[%s205_s24 + $0x18] sm:$0xff] %v285_v16 }
  0xaf   : > { %v274_v19 = vpop.f32.mrf.mxu2  ;;  %v287_v20 = vpop.f32.mrf.mxu3 }
  0xb0 PF: > { %s15_s14 = sadd.s32 1, %s577_s14   ;;  %s692_s9 = smov %s561_s10 }
  0xb1   : > { %p12_p0 = scmp.ge.s32.totalorder %s15_s14, 4   ;;  %s693_s10 = smov %s565_s11 }
  0xb2   : > { %s694_s11 = smov %s646_s21  ;;  %s695_s12 = smov %s573_s13 }
  0xb3   : > { %s696_s13 = smov %s698_s16  ;;  %14 = sbr.rel (!%p12_p0) target bundleno = 4 (0x4), region = 71 }
  0xb8   :  { %323 = vsyncpa [#allocation3], 1 }
  0xb9   :  { %325 = vsyncpa [#allocation3 + $0x1], 1 }

// kernel: _lambda_.15
= control target key start
LH: loop header
LB: loop body
LE: loop exit
PB: predicated region body
PF: predicated region fallthrough
CT: control target
= control target key end

     0   :  { %vm14_vm0 = vcmask 516096   ;;  %vm22_vm1 = vcmask 523264   ;;  %v68_v0 = vmov 0.0   ;;  %s126_s0 = inlined_call_operand.vmem [shape: f32[32,64], index: 0, kind: input, shape index: {}]   ;;  %s127_s1 = inlined_call_operand.vmem [shape: f32[1,64], index: 1, kind: output, shape index: {0}]   ;;  %s128_s2 = inlined_call_operand.vmem [shape: f32[1,64], index: 2, kind: output, shape index: {1}]  }
   0x1   :  { %15 = vst.msk [vmem:[%s127_s1] sm:$0x1] %vm14_vm0, %v68_v0  ;;  %v17_v1 = vld [vmem:[%s126_s0] sm:$0xff]  ;;  %v18_v2 = vld [vmem:[%s126_s0 + $0x8] sm:$0xff]  ;;  %v19_v3 = vld [vmem:[%s126_s0 + $0x10] sm:$0xff] }
   0x2   :  { %v20_v4 = vld [vmem:[%s126_s0 + $0x18] sm:$0xff]  ;;  %v23_v5 = vsel %vm22_vm1, %v17_v1, 0.0  ;;  %v24_v6 = vsel %vm22_vm1, %v18_v2, 0.0  ;;  %v26_v7 = vsel %vm22_vm1, %v19_v3, 0.0  ;;  %16 = vst.msk [vmem:[%s128_s2] sm:$0x1] %vm14_vm0, %v68_v0  ;;  %v40_v8 = vmul.f32 %v17_v1, %v17_v1 }
   0x3   :  { %v25_v9 = vadd.f32 %v24_v6, %v23_v5  ;;  %v41_v10 = vmul.f32 %v18_v2, %v18_v2  ;;  %v42_v11 = vmul.f32 %v19_v3, %v19_v3  ;;  %v28_v12 = vsel %vm22_vm1, %v20_v4, 0.0 }
   0x4   :  { %v43_v13 = vmul.f32 %v20_v4, %v20_v4  ;;  %v44_v14 = vsel %vm22_vm1, %v40_v8, 0.0 }
   0x5   :  { %v27_v15 = vadd.f32 %v26_v7, %v25_v9  ;;  %v45_v16 = vsel %vm22_vm1, %v41_v10, 0.0  ;;  %v47_v17 = vsel %vm22_vm1, %v42_v11, 0.0 }
   0x6   :  { %v46_v18 = vadd.f32 %v45_v16, %v44_v14  ;;  %v49_v20 = vsel %vm22_vm1, %v43_v13, 0.0 }
   0x7   :  { %v29_v19 = vadd.f32 %v28_v12, %v27_v15 }
   0x8   :  { %v48_v21 = vadd.f32 %v47_v17, %v46_v18  ;;  %v21_v31 = vld [vmem:[%s127_s1] sm:$0x1] }
   0x9   :  { %v30_v22 = vrot.slane %v29_v19, 4  ;;  %v39_v36 = vld [vmem:[%s128_s2] sm:$0x1] }
   0xa   :  { %v50_v23 = vadd.f32 %v49_v20, %v48_v21 }
   0xb   :  { %v31_v24 = vadd.f32 %v30_v22, %v29_v19 }
   0xc   :  { %v51_v25 = vrot.slane %v50_v23, 4 }
   0xd   :  { %v32_v26 = vrot.slane %v31_v24, 2 }
   0xe   :  { %v52_v27 = vadd.f32 %v51_v25, %v50_v23 }
   0xf   :  { %v33_v28 = vadd.f32 %v32_v26, %v31_v24 }
  0x10   :  { %v53_v29 = vrot.slane %v52_v27, 2 }
  0x11   :  { %v34_v30 = vrot.slane %v33_v28, 1 }
  0x12   :  { %v54_v32 = vadd.f32 %v53_v29, %v52_v27 }
  0x13   :  { %v35_v33 = vadd.f32 %v34_v30, %v33_v28 }
  0x14   :  { %v55_v34 = vrot.slane %v54_v32, 1 }
  0x15   :  { %v36_v35 = vadd.f32 %v35_v33, %v21_v31 }
  0x16   :  { %v56_v37 = vadd.f32 %v55_v34, %v54_v32 }
  0x17   :  { %38 = vst.msk [vmem:[%s127_s1] sm:$0x1] %vm14_vm0, %v36_v35 }
  0x18   :  { %v57_v38 = vadd.f32 %v56_v37, %v39_v36 }
  0x1a   :  { %58 = vst.msk [vmem:[%s128_s2] sm:$0x1] %vm14_vm0, %v57_v38 }

// kernel: _lambda_.17
= control target key start
LH: loop header
LB: loop body
LE: loop exit
PB: predicated region body
PF: predicated region fallthrough
CT: control target
= control target key end

     0   :  { %7 = vsyncpa [#allocation3], 0  ;;  %s369_s12 = smov [#allocation2]   ;;  %s370_s14 = smov 256   ;;  %s444_s0 = inlined_call_operand.vmem [shape: bf16[32,64], index: 0, kind: input, shape index: {}]   ;;  %s445_s1 = inlined_call_operand.hbm [shape: bf16[64,512], index: 1, kind: input, shape index: {}]   ;;  %s446_s2 = inlined_call_operand.vmem [shape: f32[32,512], index: 2, kind: output, shape index: {}]  }
   0x1   :  { %s14_s11 = sshll.u32 %s445_s1, 4  ;;  %s16_s13 = sshll.u32 %s369_s12, 4  ;;  %s15_s11 = int_to_ptr.hbm [resolvable:$true] %s14_s11  ;;  %s17_s13 = int_to_ptr.vmem [resolvable:$true] %s16_s13 }
   0x2   :  { %s371_s15 = smov 16  }
   0x3   :  { %22 = dma.hbm_to_vmem [thread:$0]  %s15_s11, 2048, %s17_s13, [#allocation3], %s370_s14, %s370_s14, %s371_s15  }
   0x4   :  { %367 = dma.done.wait [#allocation3], 2048  }
   0x5   :  { %368 = vsyncadd [#allocation3], 4294965248  ;;  %v300_v0 = vld [vmem:[#allocation2 + $0x60] sm:$0xf]  ;;  %v338_v1 = vld [vmem:[#allocation2 + $0x6c] sm:$0xf0] }
   0x6   :  { %v336_v2 = vld [vmem:[#allocation2 + $0x64] sm:$0xf]  ;;  %v301_v3 = vor.u32 %v338_v1, %v300_v0  ;;  %v302_v4 = vld [vmem:[#allocation2 + $0x70] sm:$0xf0]  ;;  %v308_v5 = vld [vmem:[#allocation2 + $0x68] sm:$0xf] }
   0x7   :  { %v339_v6 = vld [vmem:[#allocation2 + $0x74] sm:$0xf0]  ;;  %v305_v7 = vor.u32 %v336_v2, %v302_v4  ;;  %v337_v9 = vld [vmem:[#allocation2 + $0x6c] sm:$0xf]  ;;  %v310_v10 = vld [vmem:[#allocation2 + $0x78] sm:$0xf0] }
   0x8   :  { %v309_v8 = vor.u32 %v339_v6, %v308_v5  ;;  %v284_v11 = vld [vmem:[#allocation2 + $0x40] sm:$0xf]  ;;  %149 = vmatpush.bf16.msra.mxu0 %v301_v3  ;;  %v313_v12 = vor.u32 %v337_v9, %v310_v10  ;;  %v334_v13 = vld [vmem:[#allocation2 + $0x4c] sm:$0xf0]  ;;  %v332_v14 = vld [vmem:[#allocation2 + $0x44] sm:$0xf] }
   0x9   :  { %v286_v15 = vld [vmem:[#allocation2 + $0x50] sm:$0xf0]  ;;  %168 = vmatpush.bf16.msra.mxu1 %v305_v7  ;;  %v285_v16 = vor.u32 %v334_v13, %v284_v11  ;;  %v292_v18 = vld [vmem:[#allocation2 + $0x48] sm:$0xf]  ;;  %v335_v19 = vld [vmem:[#allocation2 + $0x54] sm:$0xf0] }
   0xa   :  { %187 = vmatpush.bf16.msra.mxu2 %v309_v8  ;;  %v289_v17 = vor.u32 %v332_v14, %v286_v15  ;;  %v333_v20 = vld [vmem:[#allocation2 + $0x4c] sm:$0xf]  ;;  %206 = vmatpush.bf16.msra.mxu3 %v313_v12  ;;  %v293_v21 = vor.u32 %v335_v19, %v292_v18  ;;  %v294_v22 = vld [vmem:[#allocation2 + $0x58] sm:$0xf0]  ;;  %v268_v23 = vld [vmem:[#allocation2 + $0x20] sm:$0xf] }
   0xb   :  { %v330_v24 = vld [vmem:[#allocation2 + $0x2c] sm:$0xf0]  ;;  %v297_v25 = vor.u32 %v333_v20, %v294_v22  ;;  %v328_v26 = vld [vmem:[#allocation2 + $0x24] sm:$0xf]  ;;  %v270_v27 = vld [vmem:[#allocation2 + $0x30] sm:$0xf0] }
   0xc   :  { %v276_v28 = vld [vmem:[#allocation2 + $0x28] sm:$0xf]  ;;  %150 = vmatpush.bf16.msra.mxu0 %v285_v16  ;;  %v269_v29 = vor.u32 %v330_v24, %v268_v23  ;;  %v331_v30 = vld [vmem:[#allocation2 + $0x34] sm:$0xf0]  ;;  %v329_v31 = vld [vmem:[#allocation2 + $0x2c] sm:$0xf]  ;;  %v273_v33 = vor.u32 %v328_v26, %v270_v27 }
   0xd   :  { %v278_v32 = vld [vmem:[#allocation2 + $0x38] sm:$0xf0]  ;;  %169 = vmatpush.bf16.msra.mxu1 %v289_v17  ;;  %v277_v34 = vor.u32 %v331_v30, %v276_v28  ;;  %v252_v35 = vld [vmem:[#allocation2] sm:$0xf]  ;;  %v326_v36 = vld [vmem:[#allocation2 + $0xc] sm:$0xf0] }
   0xe   :  { %188 = vmatpush.bf16.msra.mxu2 %v293_v21  ;;  %v324_v37 = vld [vmem:[#allocation2 + $0x4] sm:$0xf]  ;;  %207 = vmatpush.bf16.msra.mxu3 %v297_v25  ;;  %v281_v38 = vor.u32 %v329_v31, %v278_v32  ;;  %v254_v39 = vld [vmem:[#allocation2 + $0x10] sm:$0xf0]  ;;  %v260_v40 = vld [vmem:[#allocation2 + $0x8] sm:$0xf]  ;;  %v253_v44 = vor.u32 %v326_v36, %v252_v35 }
   0xf   :  { %v327_v41 = vld [vmem:[#allocation2 + $0x14] sm:$0xf0]  ;;  %v325_v42 = vld [vmem:[#allocation2 + $0xc] sm:$0xf]  ;;  %v262_v43 = vld [vmem:[#allocation2 + $0x18] sm:$0xf0]  ;;  %v257_v45 = vor.u32 %v324_v37, %v254_v39 }
  0x10   :  { %151 = vmatpush.bf16.msra.mxu0 %v269_v29  ;;  %v261_v46 = vor.u32 %v327_v41, %v260_v40  ;;  %v265_v47 = vor.u32 %v325_v42, %v262_v43  ;;  %v322_v48 = vld [vmem:[%s444_s0] sm:$0xff]  ;;  %vm138_vm0 = vcmask 523264   ;;  %v323_v49 = vld [vmem:[%s444_s0 + $0x8] sm:$0xff] }
  0x11   :  { %170 = vmatpush.bf16.msra.mxu1 %v273_v33 }
  0x12   :  { %189 = vmatpush.bf16.msra.mxu2 %v277_v34  ;;  %208 = vmatpush.bf16.msra.mxu3 %v281_v38 }
  0x14   :  { %152 = vmatpush.bf16.msra.mxu0 %v253_v44 }
  0x15   :  { %171 = vmatpush.bf16.msra.mxu1 %v257_v45 }
  0x16   :  { %190 = vmatpush.bf16.msra.mxu2 %v261_v46  ;;  %209 = vmatpush.bf16.msra.mxu3 %v265_v47 }
  0x17   :  { %314 = vmatmul.msk.bf16.vlgmr.msra.gmra.mxu0 %vm138_vm0, %v322_v48 }
  0x18   :  { %316 = vmatmul.msk.bf16.vlgmr.msra.gmra.mxu1 %vm138_vm0, %v322_v48 }
  0x19   :  { %318 = vmatmul.msk.bf16.vlgmr.msra.gmra.mxu2 %vm138_vm0, %v322_v48  ;;  %320 = vmatmul.msk.bf16.vlgmr.msra.gmra.mxu3 %vm138_vm0, %v322_v48 }
  0x27   :  { %315 = vmatmul.msk.bf16.gmra.mxu0 %vm138_vm0, %v323_v49 }
  0x28   :  { %317 = vmatmul.msk.bf16.gmra.mxu1 %vm138_vm0, %v323_v49 }
  0x29   :  { %319 = vmatmul.msk.bf16.gmra.mxu2 %vm138_vm0, %v323_v49  ;;  %321 = vmatmul.msk.bf16.gmra.mxu3 %vm138_vm0, %v323_v49 }
  0x94   :  { %v154_v50 = vpop.f32.mrf.mxu0 }
  0x95   :  { %221 = vst [vmem:[%s446_s2] sm:$0xff] %v154_v50  ;;  %v173_v51 = vpop.f32.mrf.mxu1 }
  0x96   :  { %222 = vst [vmem:[%s446_s2 + $0x8] sm:$0xff] %v173_v51 }
  0x9c   :  { %v192_v52 = vpop.f32.mrf.mxu2  ;;  %v211_v53 = vpop.f32.mrf.mxu3 }
  0x9d   :  { %223 = vst [vmem:[%s446_s2 + $0x10] sm:$0xff] %v192_v52  ;;  %v156_v54 = vpop.f32.mrf.mxu0  ;;  %v175_v55 = vpop.f32.mrf.mxu1 }
  0x9e   :  { %224 = vst [vmem:[%s446_s2 + $0x18] sm:$0xff] %v211_v53 }
  0x9f   :  { %225 = vst [vmem:[%s446_s2 + $0x20] sm:$0xff] %v156_v54 }
  0xa0   :  { %226 = vst [vmem:[%s446_s2 + $0x28] sm:$0xff] %v175_v55 }
  0xa4   :  { %v194_v56 = vpop.f32.mrf.mxu2  ;;  %v213_v57 = vpop.f32.mrf.mxu3 }
  0xa5   :  { %227 = vst [vmem:[%s446_s2 + $0x30] sm:$0xff] %v194_v56  ;;  %v159_v58 = vpop.f32.mrf.mxu0  ;;  %v178_v59 = vpop.f32.mrf.mxu1 }
  0xa6   :  { %228 = vst [vmem:[%s446_s2 + $0x38] sm:$0xff] %v213_v57 }
  0xa7   :  { %229 = vst [vmem:[%s446_s2 + $0x40] sm:$0xff] %v159_v58 }
  0xa8   :  { %230 = vst [vmem:[%s446_s2 + $0x48] sm:$0xff] %v178_v59 }
  0xac   :  { %v197_v60 = vpop.f32.mrf.mxu2  ;;  %v216_v61 = vpop.f32.mrf.mxu3 }
  0xad   :  { %231 = vst [vmem:[%s446_s2 + $0x50] sm:$0xff] %v197_v60  ;;  %v161_v62 = vpop.f32.mrf.mxu0  ;;  %v180_v63 = vpop.f32.mrf.mxu1 }
  0xae   :  { %232 = vst [vmem:[%s446_s2 + $0x58] sm:$0xff] %v216_v61 }
  0xaf   :  { %233 = vst [vmem:[%s446_s2 + $0x60] sm:$0xff] %v161_v62 }
  0xb0   :  { %234 = vst [vmem:[%s446_s2 + $0x68] sm:$0xff] %v180_v63 }
  0xb4   :  { %v199_v0 = vpop.f32.mrf.mxu2  ;;  %v218_v1 = vpop.f32.mrf.mxu3 }
  0xb5   :  { %235 = vst [vmem:[%s446_s2 + $0x70] sm:$0xff] %v199_v0 }
  0xb6   :  { %236 = vst [vmem:[%s446_s2 + $0x78] sm:$0xff] %v218_v1 }
  0xb7   :  { %241 = vsyncpa [#allocation3], 1 }

// kernel: _lambda_.16
= control target key start
LH: loop header
LB: loop body
LE: loop exit
PB: predicated region body
PF: predicated region fallthrough
CT: control target
= control target key end

     0   :  { %vm42_vm0 = vcmask 519168   ;;  %s103_s0 = inlined_call_operand.vmem [shape: f32[32,64], index: 0, kind: input, shape index: {}]   ;;  %s104_s1 = inlined_call_operand.vmem [shape: f32[1,64], index: 1, kind: input, shape index: {}]   ;;  %s105_s2 = inlined_call_operand.vmem [shape: f32[1,64], index: 2, kind: input, shape index: {}]   ;;  %s106_s3 = inlined_call_operand.vmem [shape: bf16[32,64], index: 3, kind: output, shape index: {}]  }
   0x1   :  { %v14_v0 = vld [vmem:[%s103_s0] sm:$0xff]  ;;  %v15_v3 = vld [vmem:[%s103_s0 + $0x8] sm:$0xff]  ;;  %v16_v6 = vld [vmem:[%s103_s0 + $0x10] sm:$0xff] }
   0x2   :  { %v51_v1 = vld [vmem:[%s104_s1] ss:$0 sm:$0xff]  ;;  %v17_v7 = vld [vmem:[%s103_s0 + $0x18] sm:$0xff] }
   0x3   :  { %v52_v2 = vld [vmem:[%s105_s2] ss:$0 sm:$0xff]  ;;  %v22_v4 = vmul.f32 %v51_v1, %v14_v0  ;;  %v23_v5 = vmul.f32 %v51_v1, %v15_v3  ;;  %v24_v8 = vmul.f32 %v51_v1, %v16_v6  ;;  %v25_v9 = vmul.f32 %v51_v1, %v17_v7 }
   0x5   :  { %v30_v10 = vadd.f32 %v52_v2, %v22_v4  ;;  %v31_v11 = vadd.f32 %v52_v2, %v23_v5  ;;  %v32_v12 = vadd.f32 %v52_v2, %v24_v8  ;;  %v33_v13 = vadd.f32 %v52_v2, %v25_v9 }
   0x7   :  { %v34_v14 = vmax.f32 %v30_v10, 0.0  ;;  %v35_v15 = vmax.f32 %v31_v11, 0.0  ;;  %v36_v16 = vmax.f32 %v32_v12, 0.0  ;;  %v37_v17 = vmax.f32 %v33_v13, 0.0 }
   0x9   :  { %v38_v18 = vpack.c.bf16 %v34_v14, %v34_v14  ;;  %v39_v19 = vpack.c.bf16 %v35_v15, %v35_v15  ;;  %v40_v20 = vpack.c.bf16 %v36_v16, %v36_v16  ;;  %v41_v21 = vpack.c.bf16 %v37_v17, %v37_v17 }
   0xb   :  { %43 = vst.msk [vmem:[%s106_s3] sm:$0xf] %vm42_vm0, %v38_v18 }
   0xc   :  { %44 = vst.msk [vmem:[%s106_s3 + $0x4] sm:$0xf] %vm42_vm0, %v39_v19 }
   0xd   :  { %45 = vst.msk [vmem:[%s106_s3 + $0x8] sm:$0xf] %vm42_vm0, %v40_v20 }
   0xe   :  { %46 = vst.msk [vmem:[%s106_s3 + $0xc] sm:$0xf] %vm42_vm0, %v41_v21 }

// kernel: _lambda_.19
= control target key start
LH: loop header
LB: loop body
LE: loop exit
PB: predicated region body
PF: predicated region fallthrough
CT: control target
= control target key end

     0   :  { %vm102_vm0 = vcmask 257024   ;;  %s299_s0 = inlined_call_operand.vmem [shape: f32[128,32], index: 0, kind: input, shape index: {}]   ;;  %s300_s1 = inlined_call_operand.vmem [shape: f32[1,32], index: 1, kind: input, shape index: {}]   ;;  %s301_s2 = inlined_call_operand.vmem [shape: f32[1,32], index: 2, kind: input, shape index: {}]   ;;  %s302_s3 = inlined_call_operand.vmem [shape: bf16[128,32], index: 3, kind: output, shape index: {}]  }
   0x1   :  { %v14_v0 = vld [vmem:[%s299_s0] sm:$0xff]  ;;  %v15_v3 = vld [vmem:[%s299_s0 + $0x8] sm:$0xff]  ;;  %v16_v6 = vld [vmem:[%s299_s0 + $0x10] sm:$0xff] }
   0x2   :  { %v151_v1 = vld [vmem:[%s300_s1] ss:$0 sm:$0xff]  ;;  %v17_v7 = vld [vmem:[%s299_s0 + $0x18] sm:$0xff]  ;;  %v19_v12 = vld [vmem:[%s299_s0 + $0x28] sm:$0xff] }
   0x3   :  { %v156_v2 = vld [vmem:[%s301_s2] ss:$0 sm:$0xff]  ;;  %v34_v4 = vmul.f32 %v151_v1, %v14_v0  ;;  %v35_v5 = vmul.f32 %v151_v1, %v15_v3  ;;  %v36_v9 = vmul.f32 %v151_v1, %v16_v6  ;;  %v37_v10 = vmul.f32 %v151_v1, %v17_v7  ;;  %v20_v13 = vld [vmem:[%s299_s0 + $0x30] sm:$0xff]  ;;  %v21_v14 = vld [vmem:[%s299_s0 + $0x38] sm:$0xff] }
   0x4   :  { %v18_v8 = vld [vmem:[%s299_s0 + $0x20] sm:$0xff]  ;;  %v39_v17 = vmul.f32 %v151_v1, %v19_v12  ;;  %v40_v18 = vmul.f32 %v151_v1, %v20_v13  ;;  %v41_v22 = vmul.f32 %v151_v1, %v21_v14  ;;  %v23_v32 = vld [vmem:[%s299_s0 + $0x48] sm:$0xff]  ;;  %v24_v37 = vld [vmem:[%s299_s0 + $0x50] sm:$0xff] }
   0x5   :  { %v38_v11 = vmul.f32 %v151_v1, %v18_v8  ;;  %v54_v15 = vadd.f32 %v156_v2, %v34_v4  ;;  %v55_v16 = vadd.f32 %v156_v2, %v35_v5  ;;  %v56_v19 = vadd.f32 %v156_v2, %v36_v9  ;;  %v22_v31 = vld [vmem:[%s299_s0 + $0x40] sm:$0xff]  ;;  %v25_v38 = vld [vmem:[%s299_s0 + $0x58] sm:$0xff]  ;;  %v27_v44 = vld [vmem:[%s299_s0 + $0x68] sm:$0xff] }
   0x6   :  { %v57_v20 = vadd.f32 %v156_v2, %v37_v10  ;;  %v59_v25 = vadd.f32 %v156_v2, %v39_v17  ;;  %v60_v26 = vadd.f32 %v156_v2, %v40_v18  ;;  %v61_v30 = vadd.f32 %v156_v2, %v41_v22  ;;  %v26_v39 = vld [vmem:[%s299_s0 + $0x60] sm:$0xff]  ;;  %v28_v45 = vld [vmem:[%s299_s0 + $0x70] sm:$0xff]  ;;  %v29_v50 = vld [vmem:[%s299_s0 + $0x78] sm:$0xff] }
   0x7   :  { %v58_v21 = vadd.f32 %v156_v2, %v38_v11  ;;  %v70_v23 = vmax.f32 %v54_v15, 0.0  ;;  %v71_v24 = vmax.f32 %v55_v16, 0.0  ;;  %v72_v27 = vmax.f32 %v56_v19, 0.0 }
   0x8   :  { %v73_v28 = vmax.f32 %v57_v20, 0.0  ;;  %v75_v35 = vmax.f32 %v59_v25, 0.0  ;;  %v76_v36 = vmax.f32 %v60_v26, 0.0  ;;  %v77_v43 = vmax.f32 %v61_v30, 0.0 }
   0x9   :  { %v74_v29 = vmax.f32 %v58_v21, 0.0  ;;  %v86_v33 = vpack.c.bf16 %v70_v23, %v70_v23  ;;  %v87_v34 = vpack.c.bf16 %v71_v24, %v71_v24  ;;  %v88_v40 = vpack.c.bf16 %v72_v27, %v72_v27 }
   0xa   :  { %v89_v41 = vpack.c.bf16 %v73_v28, %v73_v28  ;;  %v91_v46 = vpack.c.bf16 %v75_v35, %v75_v35  ;;  %v92_v47 = vpack.c.bf16 %v76_v36, %v76_v36  ;;  %v42_v48 = vmul.f32 %v151_v1, %v22_v31 }
   0xb   :  { %v90_v42 = vpack.c.bf16 %v74_v29, %v74_v29  ;;  %103 = vst.msk [vmem:[%s302_s3] sm:$0xf] %vm102_vm0, %v86_v33  ;;  %v43_v49 = vmul.f32 %v151_v1, %v23_v32  ;;  %v93_v51 = vpack.c.bf16 %v77_v43, %v77_v43  ;;  %v44_v52 = vmul.f32 %v151_v1, %v24_v37 }
   0xc   :  { %104 = vst.msk [vmem:[%s302_s3 + $0x4] sm:$0xf] %vm102_vm0, %v87_v34  ;;  %v45_v53 = vmul.f32 %v151_v1, %v25_v38  ;;  %v46_v54 = vmul.f32 %v151_v1, %v26_v39  ;;  %v62_v55 = vadd.f32 %v156_v2, %v42_v48  ;;  %v47_v57 = vmul.f32 %v151_v1, %v27_v44 }
   0xd   :  { %105 = vst.msk [vmem:[%s302_s3 + $0x8] sm:$0xf] %vm102_vm0, %v88_v40  ;;  %v63_v56 = vadd.f32 %v156_v2, %v43_v49  ;;  %v48_v58 = vmul.f32 %v151_v1, %v28_v45  ;;  %v64_v59 = vadd.f32 %v156_v2, %v44_v52  ;;  %v49_v62 = vmul.f32 %v151_v1, %v29_v50 }
   0xe   :  { %106 = vst.msk [vmem:[%s302_s3 + $0xc] sm:$0xf] %vm102_vm0, %v89_v41  ;;  %v65_v60 = vadd.f32 %v156_v2, %v45_v53  ;;  %v66_v61 = vadd.f32 %v156_v2, %v46_v54  ;;  %v78_v63 = vmax.f32 %v62_v55, 0.0  ;;  %v67_v3 = vadd.f32 %v156_v2, %v47_v57 }
   0xf   :  { %107 = vst.msk [vmem:[%s302_s3 + $0x10] sm:$0xf] %vm102_vm0, %v90_v42  ;;  %v79_v0 = vmax.f32 %v63_v56, 0.0  ;;  %v68_v4 = vadd.f32 %v156_v2, %v48_v58  ;;  %v80_v5 = vmax.f32 %v64_v59, 0.0  ;;  %v69_v1 = vadd.f32 %v156_v2, %v49_v62 }
  0x10   :  { %108 = vst.msk [vmem:[%s302_s3 + $0x14] sm:$0xf] %vm102_vm0, %v91_v46  ;;  %v81_v6 = vmax.f32 %v65_v60, 0.0  ;;  %v82_v7 = vmax.f32 %v66_v61, 0.0  ;;  %v94_v8 = vpack.c.bf16 %v78_v63, %v78_v63  ;;  %v83_v10 = vmax.f32 %v67_v3, 0.0 }
  0x11   :  { %109 = vst.msk [vmem:[%s302_s3 + $0x18] sm:$0xf] %vm102_vm0, %v92_v47  ;;  %v95_v9 = vpack.c.bf16 %v79_v0, %v79_v0  ;;  %v84_v11 = vmax.f32 %v68_v4, 0.0  ;;  %v96_v12 = vpack.c.bf16 %v80_v5, %v80_v5  ;;  %v85_v14 = vmax.f32 %v69_v1, 0.0 }
  0x12   :  { %110 = vst.msk [vmem:[%s302_s3 + $0x1c] sm:$0xf] %vm102_vm0, %v93_v51  ;;  %v97_v13 = vpack.c.bf16 %v81_v6, %v81_v6  ;;  %v98_v2 = vpack.c.bf16 %v82_v7, %v82_v7  ;;  %v99_v15 = vpack.c.bf16 %v83_v10, %v83_v10 }
  0x13   :  { %111 = vst.msk [vmem:[%s302_s3 + $0x20] sm:$0xf] %vm102_vm0, %v94_v8  ;;  %v100_v16 = vpack.c.bf16 %v84_v11, %v84_v11  ;;  %v101_v17 = vpack.c.bf16 %v85_v14, %v85_v14 }
  0x14   :  { %112 = vst.msk [vmem:[%s302_s3 + $0x24] sm:$0xf] %vm102_vm0, %v95_v9 }
  0x15   :  { %113 = vst.msk [vmem:[%s302_s3 + $0x28] sm:$0xf] %vm102_vm0, %v96_v12 }
  0x16   :  { %114 = vst.msk [vmem:[%s302_s3 + $0x2c] sm:$0xf] %vm102_vm0, %v97_v13 }
  0x17   :  { %115 = vst.msk [vmem:[%s302_s3 + $0x30] sm:$0xf] %vm102_vm0, %v98_v2 }
  0x18   :  { %116 = vst.msk [vmem:[%s302_s3 + $0x34] sm:$0xf] %vm102_vm0, %v99_v15 }
  0x19   :  { %117 = vst.msk [vmem:[%s302_s3 + $0x38] sm:$0xf] %vm102_vm0, %v100_v16 }
  0x1a   :  { %118 = vst.msk [vmem:[%s302_s3 + $0x3c] sm:$0xf] %vm102_vm0, %v101_v17 }

// kernel: _lambda_.18
= control target key start
LH: loop header
LB: loop body
LE: loop exit
PB: predicated region body
PF: predicated region fallthrough
CT: control target
= control target key end

     0   :  { %vm14_vm0 = vcmask 253952   ;;  %vm34_vm1 = vcmask 261120   ;;  %v140_v0 = vmov 0.0   ;;  %s258_s0 = inlined_call_operand.vmem [shape: f32[128,32], index: 0, kind: input, shape index: {}]   ;;  %s259_s1 = inlined_call_operand.vmem [shape: f32[1,32], index: 1, kind: output, shape index: {0}]   ;;  %s260_s2 = inlined_call_operand.vmem [shape: f32[1,32], index: 2, kind: output, shape index: {1}]  }
   0x1   :  { %15 = vst.msk [vmem:[%s259_s1] sm:$0x1] %vm14_vm0, %v140_v0  ;;  %v17_v1 = vld [vmem:[%s258_s0] sm:$0xff]  ;;  %v18_v2 = vld [vmem:[%s258_s0 + $0x8] sm:$0xff]  ;;  %v19_v3 = vld [vmem:[%s258_s0 + $0x10] sm:$0xff] }
   0x2   :  { %v35_v4 = vsel %vm34_vm1, %v17_v1, 0.0  ;;  %v36_v5 = vsel %vm34_vm1, %v18_v2, 0.0  ;;  %v38_v6 = vsel %vm34_vm1, %v19_v3, 0.0  ;;  %v20_v7 = vld [vmem:[%s258_s0 + $0x18] sm:$0xff]  ;;  %v21_v10 = vld [vmem:[%s258_s0 + $0x20] sm:$0xff]  ;;  %v22_v13 = vld [vmem:[%s258_s0 + $0x28] sm:$0xff]  ;;  %v76_v15 = vmul.f32 %v17_v1, %v17_v1 }
   0x3   :  { %v37_v8 = vadd.f32 %v36_v5, %v35_v4  ;;  %v40_v9 = vsel %vm34_vm1, %v20_v7, 0.0  ;;  %v42_v12 = vsel %vm34_vm1, %v21_v10, 0.0  ;;  %16 = vst.msk [vmem:[%s260_s2] sm:$0x1] %vm14_vm0, %v140_v0  ;;  %v77_v16 = vmul.f32 %v18_v2, %v18_v2  ;;  %v23_v19 = vld [vmem:[%s258_s0 + $0x30] sm:$0xff]  ;;  %v24_v24 = vld [vmem:[%s258_s0 + $0x38] sm:$0xff] }
   0x4   :  { %v78_v17 = vmul.f32 %v19_v3, %v19_v3  ;;  %v44_v18 = vsel %vm34_vm1, %v22_v13, 0.0  ;;  %v79_v21 = vmul.f32 %v20_v7, %v20_v7  ;;  %v46_v22 = vsel %vm34_vm1, %v23_v19, 0.0  ;;  %v25_v31 = vld [vmem:[%s258_s0 + $0x40] sm:$0xff]  ;;  %v26_v37 = vld [vmem:[%s258_s0 + $0x48] sm:$0xff]  ;;  %v27_v43 = vld [vmem:[%s258_s0 + $0x50] sm:$0xff] }
   0x5   :  { %v39_v11 = vadd.f32 %v38_v6, %v37_v8  ;;  %v80_v23 = vmul.f32 %v21_v10, %v21_v10  ;;  %v92_v26 = vsel %vm34_vm1, %v76_v15, 0.0  ;;  %v93_v27 = vsel %vm34_vm1, %v77_v16, 0.0  ;;  %v28_v49 = vld [vmem:[%s258_s0 + $0x58] sm:$0xff]  ;;  %v29_v55 = vld [vmem:[%s258_s0 + $0x60] sm:$0xff]  ;;  %v30_v61 = vld [vmem:[%s258_s0 + $0x68] sm:$0xff] }
   0x6   :  { %v95_v28 = vsel %vm34_vm1, %v78_v17, 0.0  ;;  %v48_v29 = vsel %vm34_vm1, %v24_v24, 0.0  ;;  %v94_v30 = vadd.f32 %v93_v27, %v92_v26  ;;  %v81_v33 = vmul.f32 %v22_v13, %v22_v13  ;;  %v31_v3 = vld [vmem:[%s258_s0 + $0x70] sm:$0xff] }
   0x7   :  { %v41_v14 = vadd.f32 %v40_v9, %v39_v11  ;;  %v97_v34 = vsel %vm34_vm1, %v79_v21, 0.0  ;;  %v50_v35 = vsel %vm34_vm1, %v25_v31, 0.0  ;;  %v82_v39 = vmul.f32 %v23_v19, %v23_v19  ;;  %v32_v9 = vld [vmem:[%s258_s0 + $0x78] sm:$0xff] }
   0x8   :  { %v96_v36 = vadd.f32 %v95_v28, %v94_v30  ;;  %v99_v40 = vsel %vm34_vm1, %v80_v23, 0.0  ;;  %v52_v41 = vsel %vm34_vm1, %v26_v37, 0.0  ;;  %v83_v45 = vmul.f32 %v24_v24, %v24_v24 }
   0x9   :  { %v43_v20 = vadd.f32 %v42_v12, %v41_v14  ;;  %v101_v46 = vsel %vm34_vm1, %v81_v33, 0.0  ;;  %v54_v47 = vsel %vm34_vm1, %v27_v43, 0.0  ;;  %v84_v51 = vmul.f32 %v25_v31, %v25_v31 }
   0xa   :  { %v98_v42 = vadd.f32 %v97_v34, %v96_v36  ;;  %v103_v52 = vsel %vm34_vm1, %v82_v39, 0.0  ;;  %v56_v53 = vsel %vm34_vm1, %v28_v49, 0.0  ;;  %v85_v57 = vmul.f32 %v26_v37, %v26_v37  ;;  %v33_v36 = vld [vmem:[%s259_s1] sm:$0x1] }
   0xb   :  { %v45_v25 = vadd.f32 %v44_v18, %v43_v20  ;;  %v105_v58 = vsel %vm34_vm1, %v83_v45, 0.0  ;;  %v58_v59 = vsel %vm34_vm1, %v29_v55, 0.0  ;;  %v86_v63 = vmul.f32 %v27_v43, %v27_v43 }
   0xc   :  { %v100_v48 = vadd.f32 %v99_v40, %v98_v42  ;;  %v107_v0 = vsel %vm34_vm1, %v84_v51, 0.0  ;;  %v60_v1 = vsel %vm34_vm1, %v30_v61, 0.0  ;;  %v87_v5 = vmul.f32 %v28_v49, %v28_v49 }
   0xd   :  { %v47_v32 = vadd.f32 %v46_v22, %v45_v25  ;;  %v109_v6 = vsel %vm34_vm1, %v85_v57, 0.0  ;;  %v62_v7 = vsel %vm34_vm1, %v31_v3, 0.0  ;;  %v88_v11 = vmul.f32 %v29_v55, %v29_v55 }
   0xe   :  { %v102_v54 = vadd.f32 %v101_v46, %v100_v48  ;;  %v111_v12 = vsel %vm34_vm1, %v86_v63, 0.0  ;;  %v64_v13 = vsel %vm34_vm1, %v32_v9, 0.0  ;;  %v89_v16 = vmul.f32 %v30_v61, %v30_v61 }
   0xf   :  { %v49_v38 = vadd.f32 %v48_v29, %v47_v32  ;;  %v113_v17 = vsel %vm34_vm1, %v87_v5, 0.0  ;;  %v90_v20 = vmul.f32 %v31_v3, %v31_v3  ;;  %v115_v21 = vsel %vm34_vm1, %v88_v11, 0.0 }
  0x10   :  { %v104_v60 = vadd.f32 %v103_v52, %v102_v54  ;;  %v91_v24 = vmul.f32 %v32_v9, %v32_v9  ;;  %v117_v25 = vsel %vm34_vm1, %v89_v16, 0.0 }
  0x11   :  { %v51_v44 = vadd.f32 %v50_v35, %v49_v38  ;;  %v119_v28 = vsel %vm34_vm1, %v90_v20, 0.0 }
  0x12   :  { %v106_v2 = vadd.f32 %v105_v58, %v104_v60  ;;  %v121_v31 = vsel %vm34_vm1, %v91_v24, 0.0 }
  0x13   :  { %v53_v50 = vadd.f32 %v52_v41, %v51_v44  ;;  %v75_v44 = vld [vmem:[%s260_s2] sm:$0x1] }
  0x14   :  { %v108_v8 = vadd.f32 %v107_v0, %v106_v2 }
  0x15   :  { %v55_v56 = vadd.f32 %v54_v47, %v53_v50 }
  0x16   :  { %v110_v14 = vadd.f32 %v109_v6, %v108_v8 }
  0x17   :  { %v57_v62 = vadd.f32 %v56_v53, %v55_v56 }
  0x18   :  { %v112_v18 = vadd.f32 %v111_v12, %v110_v14 }
  0x19   :  { %v59_v4 = vadd.f32 %v58_v59, %v57_v62 }
  0x1a   :  { %v114_v22 = vadd.f32 %v113_v17, %v112_v18 }
  0x1b   :  { %v61_v10 = vadd.f32 %v60_v1, %v59_v4 }
  0x1c   :  { %v116_v26 = vadd.f32 %v115_v21, %v114_v22 }
  0x1d   :  { %v63_v15 = vadd.f32 %v62_v7, %v61_v10 }
  0x1e   :  { %v118_v29 = vadd.f32 %v117_v25, %v116_v26 }
  0x1f   :  { %v65_v19 = vadd.f32 %v64_v13, %v63_v15 }
  0x20   :  { %v120_v32 = vadd.f32 %v119_v28, %v118_v29 }
  0x21   :  { %v66_v23 = vrot.slane %v65_v19, 4 }
  0x22   :  { %v122_v34 = vadd.f32 %v121_v31, %v120_v32 }
  0x23   :  { %v67_v27 = vadd.f32 %v66_v23, %v65_v19 }
  0x24   :  { %v123_v37 = vrot.slane %v122_v34, 4 }
  0x25   :  { %v68_v30 = vrot.slane %v67_v27, 2 }
  0x26   :  { %v124_v39 = vadd.f32 %v123_v37, %v122_v34 }
  0x27   :  { %v69_v33 = vadd.f32 %v68_v30, %v67_v27 }
  0x28   :  { %v125_v41 = vrot.slane %v124_v39, 2 }
  0x29   :  { %v70_v35 = vrot.slane %v69_v33, 1 }
  0x2a   :  { %v126_v42 = vadd.f32 %v125_v41, %v124_v39 }
  0x2b   :  { %v71_v38 = vadd.f32 %v70_v35, %v69_v33 }
  0x2c   :  { %v127_v43 = vrot.slane %v126_v42, 1 }
  0x2d   :  { %v72_v40 = vadd.f32 %v71_v38, %v33_v36 }
  0x2e   :  { %v128_v45 = vadd.f32 %v127_v43, %v126_v42 }
  0x2f   :  { %74 = vst.msk [vmem:[%s259_s1] sm:$0x1] %vm14_vm0, %v72_v40 }
  0x30   :  { %v129_v46 = vadd.f32 %v128_v45, %v75_v44 }
  0x32   :  { %130 = vst.msk [vmem:[%s260_s2] sm:$0x1] %vm14_vm0, %v129_v46 }

// kernel: _lambda_.20
= control target key start
LH: loop header
LB: loop body
LE: loop exit
PB: predicated region body
PF: predicated region fallthrough
CT: control target
= control target key end

     0   :  { %vm92_vm0 = vcmask 261120   ;;  %s506_s1 = inlined_call_operand.vmem [shape: bf16[32,256], index: 1, kind: input, shape index: {}]   ;;  %s507_s0 = inlined_call_operand.vmem [shape: bf16[128,32], index: 0, kind: input, shape index: {}]   ;;  %s508_s2 = inlined_call_operand.vmem [shape: f32[128,256], index: 2, kind: output, shape index: {}]  }
   0x1   :  { %v293_v0 = vld [vmem:[%s506_s1 + $0x10] sm:$0xf]  ;;  %v326_v1 = vld [vmem:[%s506_s1 + $0x14] sm:$0xf0]  ;;  %v325_v2 = vld [vmem:[%s506_s1 + $0x14] sm:$0xf] }
   0x2   :  { %v294_v3 = vor.u32 %v326_v1, %v293_v0  ;;  %v295_v4 = vld [vmem:[%s506_s1 + $0x18] sm:$0xf0]  ;;  %v285_v5 = vld [vmem:[%s506_s1] sm:$0xf]  ;;  %v324_v6 = vld [vmem:[%s506_s1 + $0x4] sm:$0xf0] }
   0x3   :  { %v298_v7 = vor.u32 %v325_v2, %v295_v4  ;;  %v323_v8 = vld [vmem:[%s506_s1 + $0x4] sm:$0xf]  ;;  %v287_v9 = vld [vmem:[%s506_s1 + $0x8] sm:$0xf0]  ;;  %v286_v10 = vor.u32 %v324_v6, %v285_v5  ;;  %v317_v16 = vld [vmem:[%s507_s0 + $0x10] sm:$0xff] }
   0x4   :  { %123 = vmatpush.bf16.msra.mxu0 %v294_v3  ;;  %327 = vmatpush.bf16.msra.mxu2 %v294_v3  ;;  %v290_v11 = vor.u32 %v323_v8, %v287_v9  ;;  %v315_v12 = vld [vmem:[%s507_s0] sm:$0xff]  ;;  %v316_v14 = vld [vmem:[%s507_s0 + $0x8] sm:$0xff]  ;;  %v321_v17 = vld [vmem:[%s507_s0 + $0x30] sm:$0xff] }
   0x5   :  { %172 = vmatpush.bf16.msra.mxu1 %v298_v7  ;;  %329 = vmatpush.bf16.msra.mxu3 %v298_v7  ;;  %v319_v13 = vld [vmem:[%s507_s0 + $0x20] sm:$0xff]  ;;  %v320_v15 = vld [vmem:[%s507_s0 + $0x28] sm:$0xff]  ;;  %v318_v18 = vld [vmem:[%s507_s0 + $0x18] sm:$0xff] }
   0x6   :  { %v322_v19 = vld [vmem:[%s507_s0 + $0x38] sm:$0xff] }
   0x8   :  { %124 = vmatpush.bf16.msra.mxu0 %v286_v10  ;;  %328 = vmatpush.bf16.msra.mxu2 %v286_v10 }
   0x9   :  { %173 = vmatpush.bf16.msra.mxu1 %v290_v11  ;;  %330 = vmatpush.bf16.msra.mxu3 %v290_v11 }
   0xb   :  { %299 = vmatmul.msk.bf16.vlgmr.msra.gmra.mxu0 %vm92_vm0, %v315_v12  ;;  %303 = vmatmul.msk.bf16.vlgmr.msra.gmra.mxu2 %vm92_vm0, %v319_v13 }
   0xc   :  { %307 = vmatmul.msk.bf16.vlgmr.msra.gmra.mxu1 %vm92_vm0, %v315_v12  ;;  %311 = vmatmul.msk.bf16.vlgmr.msra.gmra.mxu3 %vm92_vm0, %v319_v13 }
  0x1b   :  { %300 = vmatmul.msk.bf16.gmra.mxu0 %vm92_vm0, %v316_v14  ;;  %304 = vmatmul.msk.bf16.gmra.mxu2 %vm92_vm0, %v320_v15 }
  0x1c   :  { %308 = vmatmul.msk.bf16.gmra.mxu1 %vm92_vm0, %v316_v14  ;;  %312 = vmatmul.msk.bf16.gmra.mxu3 %vm92_vm0, %v320_v15 }
  0x2b   :  { %301 = vmatmul.msk.bf16.gmra.mxu0 %vm92_vm0, %v317_v16  ;;  %305 = vmatmul.msk.bf16.gmra.mxu2 %vm92_vm0, %v321_v17 }
  0x2c   :  { %309 = vmatmul.msk.bf16.gmra.mxu1 %vm92_vm0, %v317_v16  ;;  %313 = vmatmul.msk.bf16.gmra.mxu3 %vm92_vm0, %v321_v17 }
  0x3b   :  { %302 = vmatmul.msk.bf16.gmra.mxu0 %vm92_vm0, %v318_v18  ;;  %306 = vmatmul.msk.bf16.gmra.mxu2 %vm92_vm0, %v322_v19 }
  0x3c   :  { %310 = vmatmul.msk.bf16.gmra.mxu1 %vm92_vm0, %v318_v18  ;;  %314 = vmatmul.msk.bf16.gmra.mxu3 %vm92_vm0, %v322_v19 }
  0x88   :  { %v126_v20 = vpop.f32.mrf.mxu0 }
  0x89   :  { %215 = vst [vmem:[%s508_s2] sm:$0xff] %v126_v20  ;;  %v175_v21 = vpop.f32.mrf.mxu1 }
  0x8a   :  { %216 = vst [vmem:[%s508_s2 + $0x8] sm:$0xff] %v175_v21 }
  0x8e   :  { %v146_v22 = vpop.f32.mrf.mxu2 }
  0x8f   :  { %231 = vst [vmem:[%s508_s2 + $0x80] sm:$0xff] %v146_v22  ;;  %v195_v23 = vpop.f32.mrf.mxu3 }
  0x90   :  { %232 = vst [vmem:[%s508_s2 + $0x88] sm:$0xff] %v195_v23  ;;  %v128_v24 = vpop.f32.mrf.mxu0 }
  0x91   :  { %217 = vst [vmem:[%s508_s2 + $0x10] sm:$0xff] %v128_v24  ;;  %v177_v25 = vpop.f32.mrf.mxu1 }
  0x92   :  { %218 = vst [vmem:[%s508_s2 + $0x18] sm:$0xff] %v177_v25 }
  0x96   :  { %v148_v26 = vpop.f32.mrf.mxu2 }
  0x97   :  { %233 = vst [vmem:[%s508_s2 + $0x90] sm:$0xff] %v148_v26  ;;  %v197_v27 = vpop.f32.mrf.mxu3 }
  0x98   :  { %234 = vst [vmem:[%s508_s2 + $0x98] sm:$0xff] %v197_v27  ;;  %v131_v28 = vpop.f32.mrf.mxu0 }
  0x99   :  { %219 = vst [vmem:[%s508_s2 + $0x20] sm:$0xff] %v131_v28  ;;  %v180_v29 = vpop.f32.mrf.mxu1 }
  0x9a   :  { %220 = vst [vmem:[%s508_s2 + $0x28] sm:$0xff] %v180_v29 }
  0x9e   :  { %v151_v30 = vpop.f32.mrf.mxu2 }
  0x9f   :  { %235 = vst [vmem:[%s508_s2 + $0xa0] sm:$0xff] %v151_v30  ;;  %v200_v31 = vpop.f32.mrf.mxu3 }
  0xa0   :  { %236 = vst [vmem:[%s508_s2 + $0xa8] sm:$0xff] %v200_v31  ;;  %v133_v32 = vpop.f32.mrf.mxu0 }
  0xa1   :  { %221 = vst [vmem:[%s508_s2 + $0x30] sm:$0xff] %v133_v32  ;;  %v182_v33 = vpop.f32.mrf.mxu1 }
  0xa2   :  { %222 = vst [vmem:[%s508_s2 + $0x38] sm:$0xff] %v182_v33 }
  0xa6   :  { %v153_v34 = vpop.f32.mrf.mxu2 }
  0xa7   :  { %237 = vst [vmem:[%s508_s2 + $0xb0] sm:$0xff] %v153_v34  ;;  %v202_v35 = vpop.f32.mrf.mxu3 }
  0xa8   :  { %238 = vst [vmem:[%s508_s2 + $0xb8] sm:$0xff] %v202_v35  ;;  %v136_v36 = vpop.f32.mrf.mxu0 }
  0xa9   :  { %223 = vst [vmem:[%s508_s2 + $0x40] sm:$0xff] %v136_v36  ;;  %v185_v37 = vpop.f32.mrf.mxu1 }
  0xaa   :  { %224 = vst [vmem:[%s508_s2 + $0x48] sm:$0xff] %v185_v37 }
  0xae   :  { %v156_v38 = vpop.f32.mrf.mxu2 }
  0xaf   :  { %239 = vst [vmem:[%s508_s2 + $0xc0] sm:$0xff] %v156_v38  ;;  %v205_v39 = vpop.f32.mrf.mxu3 }
  0xb0   :  { %240 = vst [vmem:[%s508_s2 + $0xc8] sm:$0xff] %v205_v39  ;;  %v138_v40 = vpop.f32.mrf.mxu0 }
  0xb1   :  { %225 = vst [vmem:[%s508_s2 + $0x50] sm:$0xff] %v138_v40  ;;  %v187_v41 = vpop.f32.mrf.mxu1 }
  0xb2   :  { %226 = vst [vmem:[%s508_s2 + $0x58] sm:$0xff] %v187_v41 }
  0xb6   :  { %v158_v42 = vpop.f32.mrf.mxu2 }
  0xb7   :  { %241 = vst [vmem:[%s508_s2 + $0xd0] sm:$0xff] %v158_v42  ;;  %v207_v43 = vpop.f32.mrf.mxu3 }
  0xb8   :  { %242 = vst [vmem:[%s508_s2 + $0xd8] sm:$0xff] %v207_v43  ;;  %v141_v44 = vpop.f32.mrf.mxu0 }
  0xb9   :  { %227 = vst [vmem:[%s508_s2 + $0x60] sm:$0xff] %v141_v44  ;;  %v190_v45 = vpop.f32.mrf.mxu1 }
  0xba   :  { %228 = vst [vmem:[%s508_s2 + $0x68] sm:$0xff] %v190_v45 }
  0xbe   :  { %v161_v46 = vpop.f32.mrf.mxu2 }
  0xbf   :  { %243 = vst [vmem:[%s508_s2 + $0xe0] sm:$0xff] %v161_v46  ;;  %v210_v47 = vpop.f32.mrf.mxu3 }
  0xc0   :  { %244 = vst [vmem:[%s508_s2 + $0xe8] sm:$0xff] %v210_v47  ;;  %v143_v48 = vpop.f32.mrf.mxu0 }
  0xc1   :  { %229 = vst [vmem:[%s508_s2 + $0x70] sm:$0xff] %v143_v48  ;;  %v192_v49 = vpop.f32.mrf.mxu1 }
  0xc2   :  { %230 = vst [vmem:[%s508_s2 + $0x78] sm:$0xff] %v192_v49 }
  0xc6   :  { %v163_v50 = vpop.f32.mrf.mxu2 }
  0xc7   :  { %245 = vst [vmem:[%s508_s2 + $0xf0] sm:$0xff] %v163_v50  ;;  %v212_v51 = vpop.f32.mrf.mxu3 }
  0xc8   :  { %246 = vst [vmem:[%s508_s2 + $0xf8] sm:$0xff] %v212_v51 }

// kernel: _lambda_.21
= control target key start
LH: loop header
LB: loop body
LE: loop exit
PB: predicated region body
PF: predicated region fallthrough
CT: control target
= control target key end

     0   :  { %vm14_vm0 = vcmask 122880   ;;  %vm82_vm1 = vcmask 130048   ;;  %v428_v0 = vmov 0.0   ;;  %s786_s0 = inlined_call_operand.vmem [shape: f32[512,16], index: 0, kind: input, shape index: {}]   ;;  %s787_s1 = inlined_call_operand.vmem [shape: f32[1,16], index: 1, kind: output, shape index: {0}]   ;;  %s788_s2 = inlined_call_operand.vmem [shape: f32[1,16], index: 2, kind: output, shape index: {1}]  }
   0x1   :  { %15 = vst.msk [vmem:[%s787_s1] sm:$0x1] %vm14_vm0, %v428_v0  ;;  %v17_v1 = vld [vmem:[%s786_s0] sm:$0xff]  ;;  %v18_v2 = vld [vmem:[%s786_s0 + $0x8] sm:$0xff]  ;;  %v19_v3 = vld [vmem:[%s786_s0 + $0x10] sm:$0xff] }
   0x2   :  { %16 = vst.msk [vmem:[%s788_s2] sm:$0x1] %vm14_vm0, %v428_v0  ;;  %v83_v4 = vsel %vm82_vm1, %v17_v1, 0.0  ;;  %v84_v5 = vsel %vm82_vm1, %v18_v2, 0.0  ;;  %v86_v6 = vsel %vm82_vm1, %v19_v3, 0.0  ;;  %v20_v7 = vld [vmem:[%s786_s0 + $0x18] sm:$0xff]  ;;  %v220_v19 = vmul.f32 %v17_v1, %v17_v1 }
   0x3   :  { %v85_v8 = vadd.f32 %v84_v5, %v83_v4  ;;  %v88_v9 = vsel %vm82_vm1, %v20_v7, 0.0  ;;  %v21_v10 = vld [vmem:[%s786_s0 + $0x20] sm:$0xff]  ;;  %v22_v13 = vld [vmem:[%s786_s0 + $0x28] sm:$0xff]  ;;  %v23_v16 = vld [vmem:[%s786_s0 + $0x30] sm:$0xff]  ;;  %v221_v20 = vmul.f32 %v18_v2, %v18_v2  ;;  %v222_v24 = vmul.f32 %v19_v3, %v19_v3 }
   0x4   :  { %v90_v12 = vsel %vm82_vm1, %v21_v10, 0.0  ;;  %v92_v15 = vsel %vm82_vm1, %v22_v13, 0.0  ;;  %v94_v18 = vsel %vm82_vm1, %v23_v16, 0.0  ;;  %v24_v21 = vld [vmem:[%s786_s0 + $0x38] sm:$0xff]  ;;  %v223_v25 = vmul.f32 %v20_v7, %v20_v7  ;;  %v25_v26 = vld [vmem:[%s786_s0 + $0x40] sm:$0xff]  ;;  %v26_v32 = vld [vmem:[%s786_s0 + $0x48] sm:$0xff] }
   0x5   :  { %v87_v11 = vadd.f32 %v86_v6, %v85_v8  ;;  %v96_v23 = vsel %vm82_vm1, %v24_v21, 0.0  ;;  %v98_v28 = vsel %vm82_vm1, %v25_v26, 0.0  ;;  %v224_v29 = vmul.f32 %v21_v10, %v21_v10  ;;  %v27_v39 = vld [vmem:[%s786_s0 + $0x50] sm:$0xff]  ;;  %v28_v45 = vld [vmem:[%s786_s0 + $0x58] sm:$0xff]  ;;  %v29_v51 = vld [vmem:[%s786_s0 + $0x60] sm:$0xff] }
   0x6   :  { %v284_v30 = vsel %vm82_vm1, %v220_v19, 0.0  ;;  %v285_v31 = vsel %vm82_vm1, %v221_v20, 0.0  ;;  %v100_v35 = vsel %vm82_vm1, %v26_v32, 0.0  ;;  %v225_v36 = vmul.f32 %v22_v13, %v22_v13  ;;  %v30_v57 = vld [vmem:[%s786_s0 + $0x68] sm:$0xff]  ;;  %v31_v63 = vld [vmem:[%s786_s0 + $0x70] sm:$0xff]  ;;  %v32_v5 = vld [vmem:[%s786_s0 + $0x78] sm:$0xff] }
   0x7   :  { %v89_v14 = vadd.f32 %v88_v9, %v87_v11  ;;  %v286_v34 = vadd.f32 %v285_v31, %v284_v30  ;;  %v287_v37 = vsel %vm82_vm1, %v222_v24, 0.0  ;;  %v289_v38 = vsel %vm82_vm1, %v223_v25, 0.0  ;;  %v33_v11 = vld [vmem:[%s786_s0 + $0x80] sm:$0xff] }
   0x8   :  { %v102_v42 = vsel %vm82_vm1, %v27_v39, 0.0  ;;  %v226_v43 = vmul.f32 %v23_v16, %v23_v16  ;;  %v291_v44 = vsel %vm82_vm1, %v224_v29, 0.0  ;;  %v104_v48 = vsel %vm82_vm1, %v28_v45, 0.0  ;;  %v36_v29 = vld [vmem:[%s786_s0 + $0x98] sm:$0xff] }
   0x9   :  { %v91_v17 = vadd.f32 %v90_v12, %v89_v14  ;;  %v288_v41 = vadd.f32 %v287_v37, %v286_v34  ;;  %v227_v49 = vmul.f32 %v24_v21, %v24_v21  ;;  %v293_v50 = vsel %vm82_vm1, %v225_v36, 0.0 }
   0xa   :  { %v106_v54 = vsel %vm82_vm1, %v29_v51, 0.0  ;;  %v228_v55 = vmul.f32 %v25_v26, %v25_v26  ;;  %v295_v56 = vsel %vm82_vm1, %v226_v43, 0.0  ;;  %v108_v60 = vsel %vm82_vm1, %v30_v57, 0.0 }
   0xb   :  { %v93_v22 = vadd.f32 %v92_v15, %v91_v17  ;;  %v290_v47 = vadd.f32 %v289_v38, %v288_v41  ;;  %v229_v61 = vmul.f32 %v26_v32, %v26_v32  ;;  %v297_v62 = vsel %vm82_vm1, %v227_v49, 0.0  ;;  %v34_v17 = vld [vmem:[%s786_s0 + $0x88] sm:$0xff] }
   0xc   :  { %v110_v2 = vsel %vm82_vm1, %v31_v63, 0.0  ;;  %v230_v3 = vmul.f32 %v27_v39, %v27_v39  ;;  %v299_v4 = vsel %vm82_vm1, %v228_v55, 0.0  ;;  %v112_v8 = vsel %vm82_vm1, %v32_v5, 0.0  ;;  %v38_v41 = vld [vmem:[%s786_s0 + $0xa8] sm:$0xff] }
   0xd   :  { %v95_v27 = vadd.f32 %v94_v18, %v93_v22  ;;  %v292_v53 = vadd.f32 %v291_v44, %v290_v47  ;;  %v231_v9 = vmul.f32 %v28_v45, %v28_v45  ;;  %v301_v10 = vsel %vm82_vm1, %v229_v61, 0.0  ;;  %v39_v47 = vld [vmem:[%s786_s0 + $0xb0] sm:$0xff] }
   0xe   :  { %v114_v14 = vsel %vm82_vm1, %v33_v11, 0.0  ;;  %v232_v15 = vmul.f32 %v29_v51, %v29_v51  ;;  %v303_v16 = vsel %vm82_vm1, %v230_v3, 0.0  ;;  %v116_v20 = vsel %vm82_vm1, %v34_v17, 0.0 }
   0xf   :  { %v97_v33 = vadd.f32 %v96_v23, %v95_v27  ;;  %v294_v59 = vadd.f32 %v293_v50, %v292_v53  ;;  %v233_v21 = vmul.f32 %v30_v57, %v30_v57  ;;  %v305_v22 = vsel %vm82_vm1, %v231_v9, 0.0  ;;  %v35_v23 = vld [vmem:[%s786_s0 + $0x90] sm:$0xff]  ;;  %v40_v53 = vld [vmem:[%s786_s0 + $0xb8] sm:$0xff] }
  0x10   :  { %v118_v26 = vsel %vm82_vm1, %v35_v23, 0.0  ;;  %v234_v27 = vmul.f32 %v31_v63, %v31_v63  ;;  %v120_v32 = vsel %vm82_vm1, %v36_v29, 0.0  ;;  %v236_v39 = vmul.f32 %v33_v11, %v33_v11 }
  0x11   :  { %v99_v40 = vadd.f32 %v98_v28, %v97_v33  ;;  %v296_v1 = vadd.f32 %v295_v56, %v294_v59  ;;  %v307_v28 = vsel %vm82_vm1, %v232_v15, 0.0  ;;  %v235_v33 = vmul.f32 %v32_v5, %v32_v5  ;;  %v41_v59 = vld [vmem:[%s786_s0 + $0xc0] sm:$0xff] }
  0x12   :  { %v309_v34 = vsel %vm82_vm1, %v233_v21, 0.0  ;;  %v124_v44 = vsel %vm82_vm1, %v38_v41, 0.0  ;;  %v237_v45 = vmul.f32 %v34_v17, %v34_v17  ;;  %v126_v50 = vsel %vm82_vm1, %v39_v47, 0.0 }
  0x13   :  { %v101_v46 = vadd.f32 %v100_v35, %v99_v40  ;;  %v298_v7 = vadd.f32 %v297_v62, %v296_v1  ;;  %v37_v35 = vld [vmem:[%s786_s0 + $0xa0] sm:$0xff]  ;;  %v311_v40 = vsel %vm82_vm1, %v234_v27, 0.0  ;;  %v238_v51 = vmul.f32 %v35_v23, %v35_v23  ;;  %v42_v1 = vld [vmem:[%s786_s0 + $0xc8] sm:$0xff] }
  0x14   :  { %v122_v38 = vsel %vm82_vm1, %v37_v35, 0.0  ;;  %v128_v56 = vsel %vm82_vm1, %v40_v53, 0.0  ;;  %v239_v57 = vmul.f32 %v36_v29, %v36_v29  ;;  %v130_v62 = vsel %vm82_vm1, %v41_v59, 0.0 }
  0x15   :  { %v103_v52 = vadd.f32 %v102_v42, %v101_v46  ;;  %v300_v13 = vadd.f32 %v299_v4, %v298_v7  ;;  %v313_v46 = vsel %vm82_vm1, %v235_v33, 0.0  ;;  %v240_v63 = vmul.f32 %v37_v35, %v37_v35  ;;  %v43_v7 = vld [vmem:[%s786_s0 + $0xd0] sm:$0xff] }
  0x16   :  { %v132_v4 = vsel %vm82_vm1, %v42_v1, 0.0  ;;  %v241_v5 = vmul.f32 %v38_v41, %v38_v41  ;;  %v242_v11 = vmul.f32 %v39_v47, %v39_v47  ;;  %v243_v17 = vmul.f32 %v40_v53, %v40_v53 }
  0x17   :  { %v105_v58 = vadd.f32 %v104_v48, %v103_v52  ;;  %v302_v19 = vadd.f32 %v301_v10, %v300_v13  ;;  %v315_v52 = vsel %vm82_vm1, %v236_v39, 0.0  ;;  %v134_v10 = vsel %vm82_vm1, %v43_v7, 0.0  ;;  %v44_v13 = vld [vmem:[%s786_s0 + $0xd8] sm:$0xff] }
  0x18   :  { %v244_v23 = vmul.f32 %v41_v59, %v41_v59  ;;  %v245_v29 = vmul.f32 %v42_v1, %v42_v1  ;;  %v246_v35 = vmul.f32 %v43_v7, %v43_v7  ;;  %v247_v41 = vmul.f32 %v44_v13, %v44_v13 }
  0x19   :  { %v107_v0 = vadd.f32 %v106_v54, %v105_v58  ;;  %v304_v25 = vadd.f32 %v303_v16, %v302_v19  ;;  %v317_v58 = vsel %vm82_vm1, %v237_v45, 0.0  ;;  %v136_v16 = vsel %vm82_vm1, %v44_v13, 0.0  ;;  %v45_v19 = vld [vmem:[%s786_s0 + $0xe0] sm:$0xff] }
  0x1a   :  { %v248_v47 = vmul.f32 %v45_v19, %v45_v19 }
  0x1b   :  { %v109_v6 = vadd.f32 %v108_v60, %v107_v0  ;;  %v306_v31 = vadd.f32 %v305_v22, %v304_v25  ;;  %v319_v0 = vsel %vm82_vm1, %v238_v51, 0.0  ;;  %v138_v22 = vsel %vm82_vm1, %v45_v19, 0.0  ;;  %v46_v25 = vld [vmem:[%s786_s0 + $0xe8] sm:$0xff] }
  0x1c   :  { %v249_v53 = vmul.f32 %v46_v25, %v46_v25 }
  0x1d   :  { %v111_v12 = vadd.f32 %v110_v2, %v109_v6  ;;  %v308_v37 = vadd.f32 %v307_v28, %v306_v31  ;;  %v321_v6 = vsel %vm82_vm1, %v239_v57, 0.0  ;;  %v140_v28 = vsel %vm82_vm1, %v46_v25, 0.0  ;;  %v47_v31 = vld [vmem:[%s786_s0 + $0xf0] sm:$0xff] }
  0x1e   :  { %v250_v59 = vmul.f32 %v47_v31, %v47_v31 }
  0x1f   :  { %v113_v18 = vadd.f32 %v112_v8, %v111_v12  ;;  %v310_v43 = vadd.f32 %v309_v34, %v308_v37  ;;  %v323_v12 = vsel %vm82_vm1, %v240_v63, 0.0  ;;  %v142_v34 = vsel %vm82_vm1, %v47_v31, 0.0  ;;  %v48_v37 = vld [vmem:[%s786_s0 + $0xf8] sm:$0xff] }
  0x20   :  { %v251_v1 = vmul.f32 %v48_v37, %v48_v37 }
  0x21   :  { %v115_v24 = vadd.f32 %v114_v14, %v113_v18  ;;  %v312_v49 = vadd.f32 %v311_v40, %v310_v43  ;;  %v325_v18 = vsel %vm82_vm1, %v241_v5, 0.0  ;;  %v144_v40 = vsel %vm82_vm1, %v48_v37, 0.0  ;;  %v49_v43 = vld [vmem:[%s786_s0 + $0x100] sm:$0xff] }
  0x22   :  { %v252_v7 = vmul.f32 %v49_v43, %v49_v43 }
  0x23   :  { %v117_v30 = vadd.f32 %v116_v20, %v115_v24  ;;  %v314_v55 = vadd.f32 %v313_v46, %v312_v49  ;;  %v327_v24 = vsel %vm82_vm1, %v242_v11, 0.0  ;;  %v146_v46 = vsel %vm82_vm1, %v49_v43, 0.0  ;;  %v50_v49 = vld [vmem:[%s786_s0 + $0x108] sm:$0xff] }
  0x24   :  { %v253_v13 = vmul.f32 %v50_v49, %v50_v49 }
  0x25   :  { %v119_v36 = vadd.f32 %v118_v26, %v117_v30  ;;  %v316_v61 = vadd.f32 %v315_v52, %v314_v55  ;;  %v329_v30 = vsel %vm82_vm1, %v243_v17, 0.0  ;;  %v148_v52 = vsel %vm82_vm1, %v50_v49, 0.0  ;;  %v51_v55 = vld [vmem:[%s786_s0 + $0x110] sm:$0xff] }
  0x26   :  { %v254_v19 = vmul.f32 %v51_v55, %v51_v55 }
  0x27   :  { %v121_v42 = vadd.f32 %v120_v32, %v119_v36  ;;  %v318_v3 = vadd.f32 %v317_v58, %v316_v61  ;;  %v331_v36 = vsel %vm82_vm1, %v244_v23, 0.0  ;;  %v150_v58 = vsel %vm82_vm1, %v51_v55, 0.0  ;;  %v52_v61 = vld [vmem:[%s786_s0 + $0x118] sm:$0xff] }
  0x28   :  { %v255_v25 = vmul.f32 %v52_v61, %v52_v61 }
  0x29   :  { %v123_v48 = vadd.f32 %v122_v38, %v121_v42  ;;  %v320_v9 = vadd.f32 %v319_v0, %v318_v3  ;;  %v333_v42 = vsel %vm82_vm1, %v245_v29, 0.0  ;;  %v152_v0 = vsel %vm82_vm1, %v52_v61, 0.0  ;;  %v53_v3 = vld [vmem:[%s786_s0 + $0x120] sm:$0xff] }
  0x2a   :  { %v256_v31 = vmul.f32 %v53_v3, %v53_v3 }
  0x2b   :  { %v125_v54 = vadd.f32 %v124_v44, %v123_v48  ;;  %v322_v15 = vadd.f32 %v321_v6, %v320_v9  ;;  %v335_v48 = vsel %vm82_vm1, %v246_v35, 0.0  ;;  %v154_v6 = vsel %vm82_vm1, %v53_v3, 0.0  ;;  %v54_v9 = vld [vmem:[%s786_s0 + $0x128] sm:$0xff] }
  0x2c   :  { %v257_v37 = vmul.f32 %v54_v9, %v54_v9 }
  0x2d   :  { %v127_v60 = vadd.f32 %v126_v50, %v125_v54  ;;  %v324_v21 = vadd.f32 %v323_v12, %v322_v15  ;;  %v337_v54 = vsel %vm82_vm1, %v247_v41, 0.0  ;;  %v156_v12 = vsel %vm82_vm1, %v54_v9, 0.0  ;;  %v55_v15 = vld [vmem:[%s786_s0 + $0x130] sm:$0xff] }
  0x2e   :  { %v258_v43 = vmul.f32 %v55_v15, %v55_v15 }
  0x2f   :  { %v129_v2 = vadd.f32 %v128_v56, %v127_v60  ;;  %v326_v27 = vadd.f32 %v325_v18, %v324_v21  ;;  %v339_v60 = vsel %vm82_vm1, %v248_v47, 0.0  ;;  %v158_v18 = vsel %vm82_vm1, %v55_v15, 0.0  ;;  %v56_v21 = vld [vmem:[%s786_s0 + $0x138] sm:$0xff] }
  0x30   :  { %v259_v49 = vmul.f32 %v56_v21, %v56_v21 }
  0x31   :  { %v131_v8 = vadd.f32 %v130_v62, %v129_v2  ;;  %v328_v33 = vadd.f32 %v327_v24, %v326_v27  ;;  %v341_v2 = vsel %vm82_vm1, %v249_v53, 0.0  ;;  %v160_v24 = vsel %vm82_vm1, %v56_v21, 0.0  ;;  %v57_v27 = vld [vmem:[%s786_s0 + $0x140] sm:$0xff] }
  0x32   :  { %v260_v55 = vmul.f32 %v57_v27, %v57_v27 }
  0x33   :  { %v133_v14 = vadd.f32 %v132_v4, %v131_v8  ;;  %v330_v39 = vadd.f32 %v329_v30, %v328_v33  ;;  %v343_v8 = vsel %vm82_vm1, %v250_v59, 0.0  ;;  %v162_v30 = vsel %vm82_vm1, %v57_v27, 0.0  ;;  %v58_v33 = vld [vmem:[%s786_s0 + $0x148] sm:$0xff] }
  0x34   :  { %v261_v61 = vmul.f32 %v58_v33, %v58_v33 }
  0x35   :  { %v135_v20 = vadd.f32 %v134_v10, %v133_v14  ;;  %v332_v45 = vadd.f32 %v331_v36, %v330_v39  ;;  %v345_v14 = vsel %vm82_vm1, %v251_v1, 0.0  ;;  %v164_v36 = vsel %vm82_vm1, %v58_v33, 0.0  ;;  %v59_v39 = vld [vmem:[%s786_s0 + $0x150] sm:$0xff] }
  0x36   :  { %v262_v3 = vmul.f32 %v59_v39, %v59_v39 }
  0x37   :  { %v137_v26 = vadd.f32 %v136_v16, %v135_v20  ;;  %v334_v51 = vadd.f32 %v333_v42, %v332_v45  ;;  %v347_v20 = vsel %vm82_vm1, %v252_v7, 0.0  ;;  %v166_v42 = vsel %vm82_vm1, %v59_v39, 0.0  ;;  %v60_v45 = vld [vmem:[%s786_s0 + $0x158] sm:$0xff] }
  0x38   :  { %v263_v9 = vmul.f32 %v60_v45, %v60_v45 }
  0x39   :  { %v139_v32 = vadd.f32 %v138_v22, %v137_v26  ;;  %v336_v57 = vadd.f32 %v335_v48, %v334_v51  ;;  %v349_v26 = vsel %vm82_vm1, %v253_v13, 0.0  ;;  %v168_v48 = vsel %vm82_vm1, %v60_v45, 0.0  ;;  %v61_v51 = vld [vmem:[%s786_s0 + $0x160] sm:$0xff] }
  0x3a   :  { %v264_v15 = vmul.f32 %v61_v51, %v61_v51 }
  0x3b   :  { %v141_v38 = vadd.f32 %v140_v28, %v139_v32  ;;  %v338_v63 = vadd.f32 %v337_v54, %v336_v57  ;;  %v351_v32 = vsel %vm82_vm1, %v254_v19, 0.0  ;;  %v170_v54 = vsel %vm82_vm1, %v61_v51, 0.0  ;;  %v62_v57 = vld [vmem:[%s786_s0 + $0x168] sm:$0xff] }
  0x3c   :  { %v265_v21 = vmul.f32 %v62_v57, %v62_v57 }
  0x3d   :  { %v143_v44 = vadd.f32 %v142_v34, %v141_v38  ;;  %v340_v5 = vadd.f32 %v339_v60, %v338_v63  ;;  %v353_v38 = vsel %vm82_vm1, %v255_v25, 0.0  ;;  %v172_v60 = vsel %vm82_vm1, %v62_v57, 0.0  ;;  %v63_v63 = vld [vmem:[%s786_s0 + $0x170] sm:$0xff] }
  0x3e   :  { %v266_v27 = vmul.f32 %v63_v63, %v63_v63 }
  0x3f   :  { %v145_v50 = vadd.f32 %v144_v40, %v143_v44  ;;  %v342_v11 = vadd.f32 %v341_v2, %v340_v5  ;;  %v355_v44 = vsel %vm82_vm1, %v256_v31, 0.0  ;;  %v174_v2 = vsel %vm82_vm1, %v63_v63, 0.0  ;;  %v64_v5 = vld [vmem:[%s786_s0 + $0x178] sm:$0xff] }
  0x40   :  { %v267_v33 = vmul.f32 %v64_v5, %v64_v5 }
  0x41   :  { %v147_v56 = vadd.f32 %v146_v46, %v145_v50  ;;  %v344_v17 = vadd.f32 %v343_v8, %v342_v11  ;;  %v357_v50 = vsel %vm82_vm1, %v257_v37, 0.0  ;;  %v176_v8 = vsel %vm82_vm1, %v64_v5, 0.0  ;;  %v65_v11 = vld [vmem:[%s786_s0 + $0x180] sm:$0xff] }
  0x42   :  { %v268_v39 = vmul.f32 %v65_v11, %v65_v11 }
  0x43   :  { %v149_v62 = vadd.f32 %v148_v52, %v147_v56  ;;  %v346_v23 = vadd.f32 %v345_v14, %v344_v17  ;;  %v359_v56 = vsel %vm82_vm1, %v258_v43, 0.0  ;;  %v178_v14 = vsel %vm82_vm1, %v65_v11, 0.0  ;;  %v66_v17 = vld [vmem:[%s786_s0 + $0x188] sm:$0xff] }
  0x44   :  { %v269_v45 = vmul.f32 %v66_v17, %v66_v17 }
  0x45   :  { %v151_v4 = vadd.f32 %v150_v58, %v149_v62  ;;  %v348_v29 = vadd.f32 %v347_v20, %v346_v23  ;;  %v361_v62 = vsel %vm82_vm1, %v259_v49, 0.0  ;;  %v180_v20 = vsel %vm82_vm1, %v66_v17, 0.0  ;;  %v67_v23 = vld [vmem:[%s786_s0 + $0x190] sm:$0xff] }
  0x46   :  { %v270_v51 = vmul.f32 %v67_v23, %v67_v23 }
  0x47   :  { %v153_v10 = vadd.f32 %v152_v0, %v151_v4  ;;  %v350_v35 = vadd.f32 %v349_v26, %v348_v29  ;;  %v363_v4 = vsel %vm82_vm1, %v260_v55, 0.0  ;;  %v182_v26 = vsel %vm82_vm1, %v67_v23, 0.0  ;;  %v68_v29 = vld [vmem:[%s786_s0 + $0x198] sm:$0xff] }
  0x48   :  { %v271_v57 = vmul.f32 %v68_v29, %v68_v29 }
  0x49   :  { %v155_v16 = vadd.f32 %v154_v6, %v153_v10  ;;  %v352_v41 = vadd.f32 %v351_v32, %v350_v35  ;;  %v365_v10 = vsel %vm82_vm1, %v261_v61, 0.0  ;;  %v184_v32 = vsel %vm82_vm1, %v68_v29, 0.0  ;;  %v69_v35 = vld [vmem:[%s786_s0 + $0x1a0] sm:$0xff] }
  0x4a   :  { %v272_v63 = vmul.f32 %v69_v35, %v69_v35 }
  0x4b   :  { %v157_v22 = vadd.f32 %v156_v12, %v155_v16  ;;  %v354_v47 = vadd.f32 %v353_v38, %v352_v41  ;;  %v367_v16 = vsel %vm82_vm1, %v262_v3, 0.0  ;;  %v186_v38 = vsel %vm82_vm1, %v69_v35, 0.0  ;;  %v70_v41 = vld [vmem:[%s786_s0 + $0x1a8] sm:$0xff] }
  0x4c   :  { %v273_v5 = vmul.f32 %v70_v41, %v70_v41 }
  0x4d   :  { %v159_v28 = vadd.f32 %v158_v18, %v157_v22  ;;  %v356_v53 = vadd.f32 %v355_v44, %v354_v47  ;;  %v369_v22 = vsel %vm82_vm1, %v263_v9, 0.0  ;;  %v188_v44 = vsel %vm82_vm1, %v70_v41, 0.0  ;;  %v71_v47 = vld [vmem:[%s786_s0 + $0x1b0] sm:$0xff] }
  0x4e   :  { %v274_v11 = vmul.f32 %v71_v47, %v71_v47 }
  0x4f   :  { %v161_v34 = vadd.f32 %v160_v24, %v159_v28  ;;  %v358_v59 = vadd.f32 %v357_v50, %v356_v53  ;;  %v371_v28 = vsel %vm82_vm1, %v264_v15, 0.0  ;;  %v190_v50 = vsel %vm82_vm1, %v71_v47, 0.0  ;;  %v72_v53 = vld [vmem:[%s786_s0 + $0x1b8] sm:$0xff] }
  0x50   :  { %v275_v17 = vmul.f32 %v72_v53, %v72_v53 }
  0x51   :  { %v163_v40 = vadd.f32 %v162_v30, %v161_v34  ;;  %v360_v1 = vadd.f32 %v359_v56, %v358_v59  ;;  %v373_v34 = vsel %vm82_vm1, %v265_v21, 0.0  ;;  %v192_v56 = vsel %vm82_vm1, %v72_v53, 0.0  ;;  %v73_v59 = vld [vmem:[%s786_s0 + $0x1c0] sm:$0xff] }
  0x52   :  { %v276_v23 = vmul.f32 %v73_v59, %v73_v59 }
  0x53   :  { %v165_v46 = vadd.f32 %v164_v36, %v163_v40  ;;  %v362_v7 = vadd.f32 %v361_v62, %v360_v1  ;;  %v375_v40 = vsel %vm82_vm1, %v266_v27, 0.0  ;;  %v194_v62 = vsel %vm82_vm1, %v73_v59, 0.0  ;;  %v74_v1 = vld [vmem:[%s786_s0 + $0x1c8] sm:$0xff] }
  0x54   :  { %v277_v29 = vmul.f32 %v74_v1, %v74_v1 }
  0x55   :  { %v167_v52 = vadd.f32 %v166_v42, %v165_v46  ;;  %v364_v13 = vadd.f32 %v363_v4, %v362_v7  ;;  %v377_v46 = vsel %vm82_vm1, %v267_v33, 0.0  ;;  %v196_v4 = vsel %vm82_vm1, %v74_v1, 0.0  ;;  %v75_v7 = vld [vmem:[%s786_s0 + $0x1d0] sm:$0xff] }
  0x56   :  { %v278_v35 = vmul.f32 %v75_v7, %v75_v7 }
  0x57   :  { %v169_v58 = vadd.f32 %v168_v48, %v167_v52  ;;  %v366_v19 = vadd.f32 %v365_v10, %v364_v13  ;;  %v379_v52 = vsel %vm82_vm1, %v268_v39, 0.0  ;;  %v198_v10 = vsel %vm82_vm1, %v75_v7, 0.0  ;;  %v76_v13 = vld [vmem:[%s786_s0 + $0x1d8] sm:$0xff] }
  0x58   :  { %v279_v41 = vmul.f32 %v76_v13, %v76_v13 }
  0x59   :  { %v171_v0 = vadd.f32 %v170_v54, %v169_v58  ;;  %v368_v25 = vadd.f32 %v367_v16, %v366_v19  ;;  %v381_v58 = vsel %vm82_vm1, %v269_v45, 0.0  ;;  %v200_v16 = vsel %vm82_vm1, %v76_v13, 0.0  ;;  %v77_v19 = vld [vmem:[%s786_s0 + $0x1e0] sm:$0xff] }
  0x5a   :  { %v280_v45 = vmul.f32 %v77_v19, %v77_v19 }
  0x5b   :  { %v173_v6 = vadd.f32 %v172_v60, %v171_v0  ;;  %v370_v31 = vadd.f32 %v369_v22, %v368_v25  ;;  %v383_v0 = vsel %vm82_vm1, %v270_v51, 0.0  ;;  %v202_v22 = vsel %vm82_vm1, %v77_v19, 0.0  ;;  %v78_v25 = vld [vmem:[%s786_s0 + $0x1e8] sm:$0xff] }
  0x5d   :  { %v175_v12 = vadd.f32 %v174_v2, %v173_v6  ;;  %v372_v37 = vadd.f32 %v371_v28, %v370_v31  ;;  %v385_v6 = vsel %vm82_vm1, %v271_v57, 0.0  ;;  %v204_v28 = vsel %vm82_vm1, %v78_v25, 0.0  ;;  %v79_v31 = vld [vmem:[%s786_s0 + $0x1f0] sm:$0xff] }
  0x5e   :  { %v282_v53 = vmul.f32 %v79_v31, %v79_v31 }
  0x5f   :  { %v177_v18 = vadd.f32 %v176_v8, %v175_v12  ;;  %v374_v43 = vadd.f32 %v373_v34, %v372_v37  ;;  %v387_v12 = vsel %vm82_vm1, %v272_v63, 0.0  ;;  %v206_v34 = vsel %vm82_vm1, %v79_v31, 0.0  ;;  %v80_v37 = vld [vmem:[%s786_s0 + $0x1f8] sm:$0xff] }
  0x60   :  { %v283_v57 = vmul.f32 %v80_v37, %v80_v37 }
  0x61   :  { %v179_v24 = vadd.f32 %v178_v14, %v177_v18  ;;  %v376_v49 = vadd.f32 %v375_v40, %v374_v43  ;;  %v389_v18 = vsel %vm82_vm1, %v273_v5, 0.0  ;;  %v208_v40 = vsel %vm82_vm1, %v80_v37, 0.0 }
  0x63   :  { %v181_v30 = vadd.f32 %v180_v20, %v179_v24  ;;  %v378_v55 = vadd.f32 %v377_v46, %v376_v49  ;;  %v391_v24 = vsel %vm82_vm1, %v274_v11, 0.0  ;;  %v399_v46 = vsel %vm82_vm1, %v278_v35, 0.0 }
  0x64   :  { %v281_v49 = vmul.f32 %v78_v25, %v78_v25 }
  0x65   :  { %v183_v36 = vadd.f32 %v182_v26, %v181_v30  ;;  %v380_v61 = vadd.f32 %v379_v52, %v378_v55  ;;  %v393_v30 = vsel %vm82_vm1, %v275_v17, 0.0 }
  0x67   :  { %v185_v42 = vadd.f32 %v184_v32, %v183_v36  ;;  %v382_v3 = vadd.f32 %v381_v58, %v380_v61  ;;  %v395_v36 = vsel %vm82_vm1, %v276_v23, 0.0  ;;  %v405_v58 = vsel %vm82_vm1, %v281_v49, 0.0 }
  0x68   :  { %v407_v61 = vsel %vm82_vm1, %v282_v53, 0.0 }
  0x69   :  { %v187_v48 = vadd.f32 %v186_v38, %v185_v42  ;;  %v384_v9 = vadd.f32 %v383_v0, %v382_v3  ;;  %v397_v42 = vsel %vm82_vm1, %v277_v29, 0.0  ;;  %v409_v0 = vsel %vm82_vm1, %v283_v57, 0.0  ;;  %v81_v3 = vld [vmem:[%s787_s1] sm:$0x1] }
  0x6b   :  { %v189_v54 = vadd.f32 %v188_v44, %v187_v48  ;;  %v386_v15 = vadd.f32 %v385_v6, %v384_v9 }
  0x6d   :  { %v191_v60 = vadd.f32 %v190_v50, %v189_v54  ;;  %v388_v21 = vadd.f32 %v387_v12, %v386_v15  ;;  %v401_v50 = vsel %vm82_vm1, %v279_v41, 0.0  ;;  %v403_v54 = vsel %vm82_vm1, %v280_v45, 0.0  ;;  %v219_v12 = vld [vmem:[%s788_s2] sm:$0x1] }
  0x6f   :  { %v193_v2 = vadd.f32 %v192_v56, %v191_v60  ;;  %v390_v27 = vadd.f32 %v389_v18, %v388_v21 }
  0x71   :  { %v195_v8 = vadd.f32 %v194_v62, %v193_v2  ;;  %v392_v33 = vadd.f32 %v391_v24, %v390_v27 }
  0x73   :  { %v197_v14 = vadd.f32 %v196_v4, %v195_v8  ;;  %v394_v39 = vadd.f32 %v393_v30, %v392_v33 }
  0x75   :  { %v199_v20 = vadd.f32 %v198_v10, %v197_v14  ;;  %v396_v44 = vadd.f32 %v395_v36, %v394_v39 }
  0x77   :  { %v201_v26 = vadd.f32 %v200_v16, %v199_v20  ;;  %v398_v48 = vadd.f32 %v397_v42, %v396_v44 }
  0x79   :  { %v203_v32 = vadd.f32 %v202_v22, %v201_v26  ;;  %v400_v52 = vadd.f32 %v399_v46, %v398_v48 }
  0x7b   :  { %v205_v38 = vadd.f32 %v204_v28, %v203_v32  ;;  %v402_v56 = vadd.f32 %v401_v50, %v400_v52 }
  0x7d   :  { %v207_v43 = vadd.f32 %v206_v34, %v205_v38  ;;  %v404_v60 = vadd.f32 %v403_v54, %v402_v56 }
  0x7f   :  { %v209_v47 = vadd.f32 %v208_v40, %v207_v43  ;;  %v406_v63 = vadd.f32 %v405_v58, %v404_v60 }
  0x81   :  { %v210_v51 = vrot.slane %v209_v47, 4  ;;  %v408_v2 = vadd.f32 %v407_v61, %v406_v63 }
  0x83   :  { %v211_v55 = vadd.f32 %v210_v51, %v209_v47  ;;  %v410_v5 = vadd.f32 %v409_v0, %v408_v2 }
  0x85   :  { %v212_v59 = vrot.slane %v211_v55, 2  ;;  %v411_v7 = vrot.slane %v410_v5, 4 }
  0x87   :  { %v213_v62 = vadd.f32 %v212_v59, %v211_v55  ;;  %v412_v8 = vadd.f32 %v411_v7, %v410_v5 }
  0x89   :  { %v214_v1 = vrot.slane %v213_v62, 1  ;;  %v413_v9 = vrot.slane %v412_v8, 2 }
  0x8b   :  { %v215_v4 = vadd.f32 %v214_v1, %v213_v62  ;;  %v414_v10 = vadd.f32 %v413_v9, %v412_v8 }
  0x8d   :  { %v216_v6 = vadd.f32 %v215_v4, %v81_v3  ;;  %v415_v11 = vrot.slane %v414_v10, 1 }
  0x8f   :  { %218 = vst.msk [vmem:[%s787_s1] sm:$0x1] %vm14_vm0, %v216_v6  ;;  %v416_v13 = vadd.f32 %v415_v11, %v414_v10 }
  0x91   :  { %v417_v14 = vadd.f32 %v416_v13, %v219_v12 }
  0x93   :  { %418 = vst.msk [vmem:[%s788_s2] sm:$0x1] %vm14_vm0, %v417_v14 }

// kernel: _lambda_.23
= control target key start
LH: loop header
LB: loop body
LE: loop exit
PB: predicated region body
PF: predicated region fallthrough
CT: control target
= control target key end

     0   :  { %s744_s9 = smov 0   ;;  %s746_s10 = smov 0   ;;  %s834_s0 = inlined_call_operand.vmem [shape: bf16[512,16], index: 0, kind: input, shape index: {}]   ;;  %s835_s1 = inlined_call_operand.vmem [shape: bf16[16,128], index: 1, kind: input, shape index: {}]   ;;  %s836_s2 = inlined_call_operand.vmem [shape: f32[512,128], index: 2, kind: output, shape index: {}]  }
   0x1   :  { %s748_s11 = smov 0  }
   0x2 LB: > { %s24_s12 = sadd.s32 1, %s723_s10  ;;  %p570_p0 = scmp.ge.s32.totalorder %s727_s11, 1  ;;  %s727_s11 = sphi %s748_s11, %s12_s11   ;;  %s723_s10 = sphi %s746_s10, %s838_s10   ;;  %s719_s9 = sphi %s744_s9, %s837_s9  }
   0x3   : > { %p26_p1 = scmp.ge.s32.totalorder %s24_s12, 2  ;;  %p136_p2 = scmp.lt.s32.totalorder %s727_s11, 3 }
   0x5   : > { %s840_s12 = smov (%p26_p1, %s24_s12), 0  ;;  %p137_p3 = pnand %p570_p0, %p136_p2 }
   0x6   : > { %s571_s15 = sshll.u32 (!%p137_p3), %s719_s9, 5 }
   0x7   : > { %140 = sbr.rel (%p137_p3) target bundleno = 208 (0xd0), region = 28  ;;  %p166_p4 = scmp.lt.s32.totalorder (!%p137_p3), %s571_s15, 63 }
   0xc   : > { %v677_v0 = vld [vmem:[%s835_s1] sm:$0xff]  ;;  %s842_s15 = smov (!%p166_p4, %s571_s15), 63  ;;  %vm305_vm0 = vcmask 130048  }
   0xd   : > { %361 = vmatpush.bf16.msra.mxu0 %v677_v0  ;;  %678 = vmatpush.bf16.msra.mxu1 %v677_v0  ;;  %s572_s16 = sshll.u32 %s842_s15, 2  ;;  %s574_s20 = sshll.u32 %s842_s15, 3 }
   0xe   : > { %679 = vmatpush.bf16.msra.mxu2 %v677_v0  ;;  %680 = vmatpush.bf16.msra.mxu3 %v677_v0  ;;  %s169_s19 = scalar_lea.vmem %s834_s0, %s572_s16  ;;  %s791_s23 = scalar_lea.vmem %s836_s2, %s574_s20 }
   0xf   : > { %v661_v1 = vld [vmem:[%s169_s19] sm:$0xff]  ;;  %v662_v5 = vld [vmem:[%s169_s19 + $0x8] sm:$0xff]  ;;  %v663_v9 = vld [vmem:[%s169_s19 + $0x10] sm:$0xff] }
  0x10   : > { %v665_v2 = vld [vmem:[%s169_s19 + $0x20] sm:$0xff]  ;;  %643 = vmatmul.msk.bf16.vlgmr.msra.gmra.mxu0 %vm305_vm0, %v661_v1  ;;  %v666_v6 = vld [vmem:[%s169_s19 + $0x28] sm:$0xff]  ;;  %v667_v10 = vld [vmem:[%s169_s19 + $0x30] sm:$0xff] }
  0x11   : > { %v669_v3 = vld [vmem:[%s169_s19 + $0x40] sm:$0xff]  ;;  %647 = vmatmul.msk.bf16.vlgmr.msra.gmra.mxu1 %vm305_vm0, %v665_v2  ;;  %v670_v7 = vld [vmem:[%s169_s19 + $0x48] sm:$0xff]  ;;  %v671_v11 = vld [vmem:[%s169_s19 + $0x50] sm:$0xff] }
  0x12   : > { %v673_v4 = vld [vmem:[%s169_s19 + $0x60] sm:$0xff]  ;;  %651 = vmatmul.msk.bf16.vlgmr.msra.gmra.mxu2 %vm305_vm0, %v669_v3  ;;  %v674_v8 = vld [vmem:[%s169_s19 + $0x68] sm:$0xff]  ;;  %v675_v12 = vld [vmem:[%s169_s19 + $0x70] sm:$0xff] }
  0x13   : > { %655 = vmatmul.msk.bf16.vlgmr.msra.gmra.mxu3 %vm305_vm0, %v673_v4  ;;  %v664_v13 = vld [vmem:[%s169_s19 + $0x18] sm:$0xff] }
  0x14   : > { %v668_v14 = vld [vmem:[%s169_s19 + $0x38] sm:$0xff] }
  0x15   : > { %v672_v15 = vld [vmem:[%s169_s19 + $0x58] sm:$0xff] }
  0x16   : > { %v676_v16 = vld [vmem:[%s169_s19 + $0x78] sm:$0xff] }
  0x20   : > { %644 = vmatmul.msk.bf16.gmra.mxu0 %vm305_vm0, %v662_v5 }
  0x21   : > { %648 = vmatmul.msk.bf16.gmra.mxu1 %vm305_vm0, %v666_v6 }
  0x22   : > { %652 = vmatmul.msk.bf16.gmra.mxu2 %vm305_vm0, %v670_v7 }
  0x23   : > { %656 = vmatmul.msk.bf16.gmra.mxu3 %vm305_vm0, %v674_v8 }
  0x30   : > { %645 = vmatmul.msk.bf16.gmra.mxu0 %vm305_vm0, %v663_v9 }
  0x31   : > { %649 = vmatmul.msk.bf16.gmra.mxu1 %vm305_vm0, %v667_v10 }
  0x32   : > { %653 = vmatmul.msk.bf16.gmra.mxu2 %vm305_vm0, %v671_v11 }
  0x33   : > { %657 = vmatmul.msk.bf16.gmra.mxu3 %vm305_vm0, %v675_v12 }
  0x40   : > { %646 = vmatmul.msk.bf16.gmra.mxu0 %vm305_vm0, %v664_v13 }
  0x41   : > { %650 = vmatmul.msk.bf16.gmra.mxu1 %vm305_vm0, %v668_v14 }
  0x42   : > { %654 = vmatmul.msk.bf16.gmra.mxu2 %vm305_vm0, %v672_v15 }
  0x43   : > { %658 = vmatmul.msk.bf16.gmra.mxu3 %vm305_vm0, %v676_v16 }
  0x8d   : > { %v363_v17 = vpop.f32.mrf.mxu0 }
  0x8e   : > { %v383_v18 = vpop.f32.mrf.mxu1  ;;  %443 = vst [vmem:[%s791_s23] sm:$0xff] %v363_v17 }
  0x8f   : > { %451 = vst [vmem:[%s791_s23 + $0x40] sm:$0xff] %v383_v18 }
  0x95   : > { %v403_v19 = vpop.f32.mrf.mxu2  ;;  %v365_v21 = vpop.f32.mrf.mxu0 }
  0x96   : > { %v423_v20 = vpop.f32.mrf.mxu3  ;;  %459 = vst [vmem:[%s791_s23 + $0x80] sm:$0xff] %v403_v19  ;;  %v385_v22 = vpop.f32.mrf.mxu1 }
  0x97   : > { %467 = vst [vmem:[%s791_s23 + $0xc0] sm:$0xff] %v423_v20 }
  0x98   : > { %444 = vst [vmem:[%s791_s23 + $0x8] sm:$0xff] %v365_v21 }
  0x99   : > { %452 = vst [vmem:[%s791_s23 + $0x48] sm:$0xff] %v385_v22 }
  0x9d   : > { %v405_v23 = vpop.f32.mrf.mxu2  ;;  %v368_v25 = vpop.f32.mrf.mxu0 }
  0x9e   : > { %v425_v24 = vpop.f32.mrf.mxu3  ;;  %460 = vst [vmem:[%s791_s23 + $0x88] sm:$0xff] %v405_v23  ;;  %v388_v26 = vpop.f32.mrf.mxu1 }
  0x9f   : > { %468 = vst [vmem:[%s791_s23 + $0xc8] sm:$0xff] %v425_v24 }
  0xa0   : > { %445 = vst [vmem:[%s791_s23 + $0x10] sm:$0xff] %v368_v25 }
  0xa1   : > { %453 = vst [vmem:[%s791_s23 + $0x50] sm:$0xff] %v388_v26 }
  0xa5   : > { %v408_v27 = vpop.f32.mrf.mxu2  ;;  %v370_v29 = vpop.f32.mrf.mxu0 }
  0xa6   : > { %v428_v28 = vpop.f32.mrf.mxu3  ;;  %461 = vst [vmem:[%s791_s23 + $0x90] sm:$0xff] %v408_v27  ;;  %v390_v30 = vpop.f32.mrf.mxu1 }
  0xa7   : > { %469 = vst [vmem:[%s791_s23 + $0xd0] sm:$0xff] %v428_v28 }
  0xa8   : > { %446 = vst [vmem:[%s791_s23 + $0x18] sm:$0xff] %v370_v29 }
  0xa9   : > { %454 = vst [vmem:[%s791_s23 + $0x58] sm:$0xff] %v390_v30 }
  0xad   : > { %v410_v31 = vpop.f32.mrf.mxu2  ;;  %v373_v33 = vpop.f32.mrf.mxu0 }
  0xae   : > { %v430_v32 = vpop.f32.mrf.mxu3  ;;  %462 = vst [vmem:[%s791_s23 + $0x98] sm:$0xff] %v410_v31  ;;  %v393_v34 = vpop.f32.mrf.mxu1 }
  0xaf   : > { %470 = vst [vmem:[%s791_s23 + $0xd8] sm:$0xff] %v430_v32 }
  0xb0   : > { %447 = vst [vmem:[%s791_s23 + $0x20] sm:$0xff] %v373_v33 }
  0xb1   : > { %455 = vst [vmem:[%s791_s23 + $0x60] sm:$0xff] %v393_v34 }
  0xb5   : > { %v413_v35 = vpop.f32.mrf.mxu2  ;;  %v375_v37 = vpop.f32.mrf.mxu0 }
  0xb6   : > { %v433_v36 = vpop.f32.mrf.mxu3  ;;  %463 = vst [vmem:[%s791_s23 + $0xa0] sm:$0xff] %v413_v35  ;;  %v395_v38 = vpop.f32.mrf.mxu1 }
  0xb7   : > { %471 = vst [vmem:[%s791_s23 + $0xe0] sm:$0xff] %v433_v36 }
  0xb8   : > { %448 = vst [vmem:[%s791_s23 + $0x28] sm:$0xff] %v375_v37 }
  0xb9   : > { %456 = vst [vmem:[%s791_s23 + $0x68] sm:$0xff] %v395_v38 }
  0xbd   : > { %v415_v39 = vpop.f32.mrf.mxu2  ;;  %v378_v41 = vpop.f32.mrf.mxu0 }
  0xbe   : > { %v435_v40 = vpop.f32.mrf.mxu3  ;;  %464 = vst [vmem:[%s791_s23 + $0xa8] sm:$0xff] %v415_v39  ;;  %v398_v42 = vpop.f32.mrf.mxu1 }
  0xbf   : > { %472 = vst [vmem:[%s791_s23 + $0xe8] sm:$0xff] %v435_v40 }
  0xc0   : > { %449 = vst [vmem:[%s791_s23 + $0x30] sm:$0xff] %v378_v41 }
  0xc1   : > { %457 = vst [vmem:[%s791_s23 + $0x70] sm:$0xff] %v398_v42 }
  0xc5   : > { %v418_v43 = vpop.f32.mrf.mxu2  ;;  %v380_v45 = vpop.f32.mrf.mxu0 }
  0xc6   : > { %v438_v44 = vpop.f32.mrf.mxu3  ;;  %465 = vst [vmem:[%s791_s23 + $0xb0] sm:$0xff] %v418_v43  ;;  %v400_v46 = vpop.f32.mrf.mxu1 }
  0xc7   : > { %473 = vst [vmem:[%s791_s23 + $0xf0] sm:$0xff] %v438_v44 }
  0xc8   : > { %450 = vst [vmem:[%s791_s23 + $0x38] sm:$0xff] %v380_v45 }
  0xc9   : > { %458 = vst [vmem:[%s791_s23 + $0x78] sm:$0xff] %v400_v46 }
  0xcd   : > { %v420_v47 = vpop.f32.mrf.mxu2 }
  0xce   : > { %v440_v48 = vpop.f32.mrf.mxu3  ;;  %466 = vst [vmem:[%s791_s23 + $0xb8] sm:$0xff] %v420_v47 }
  0xcf   : > { %474 = vst [vmem:[%s791_s23 + $0xf8] sm:$0xff] %v440_v48 }
  0xd0 PF: > { %s12_s11 = sadd.s32 1, %s727_s11   ;;  %s837_s9 = smov %s723_s10 }
  0xd1   : > { %p9_p5 = scmp.ge.s32.totalorder %s12_s11, 4   ;;  %s838_s10 = smov %s840_s12 }
  0xd3   :  { %11 = sbr.rel (!%p9_p5) target bundleno = 2 (0x2), region = 61 }

// kernel: _lambda_.22
= control target key start
LH: loop header
LB: loop body
LE: loop exit
PB: predicated region body
PF: predicated region fallthrough
CT: control target
= control target key end

     0   :  { %vm342_vm0 = vcmask 125952   ;;  %s1019_s0 = inlined_call_operand.vmem [shape: f32[512,16], index: 0, kind: input, shape index: {}]   ;;  %s1020_s1 = inlined_call_operand.vmem [shape: f32[1,16], index: 1, kind: input, shape index: {}]   ;;  %s1021_s2 = inlined_call_operand.vmem [shape: f32[1,16], index: 2, kind: input, shape index: {}]   ;;  %s1022_s3 = inlined_call_operand.vmem [shape: bf16[512,16], index: 3, kind: output, shape index: {}]  }
   0x1   :  { %v14_v0 = vld [vmem:[%s1019_s0] sm:$0xff]  ;;  %v15_v3 = vld [vmem:[%s1019_s0 + $0x8] sm:$0xff]  ;;  %v16_v6 = vld [vmem:[%s1019_s0 + $0x10] sm:$0xff] }
   0x2   :  { %v439_v1 = vld [vmem:[%s1020_s1] ss:$0 sm:$0xff]  ;;  %v17_v7 = vld [vmem:[%s1019_s0 + $0x18] sm:$0xff]  ;;  %v19_v12 = vld [vmem:[%s1019_s0 + $0x28] sm:$0xff] }
   0x3   :  { %v444_v2 = vld [vmem:[%s1021_s2] ss:$0 sm:$0xff]  ;;  %v82_v4 = vmul.f32 %v439_v1, %v14_v0  ;;  %v83_v5 = vmul.f32 %v439_v1, %v15_v3  ;;  %v84_v9 = vmul.f32 %v439_v1, %v16_v6  ;;  %v85_v10 = vmul.f32 %v439_v1, %v17_v7  ;;  %v20_v13 = vld [vmem:[%s1019_s0 + $0x30] sm:$0xff]  ;;  %v21_v14 = vld [vmem:[%s1019_s0 + $0x38] sm:$0xff] }
   0x4   :  { %v18_v8 = vld [vmem:[%s1019_s0 + $0x20] sm:$0xff]  ;;  %v87_v17 = vmul.f32 %v439_v1, %v19_v12  ;;  %v88_v18 = vmul.f32 %v439_v1, %v20_v13  ;;  %v89_v22 = vmul.f32 %v439_v1, %v21_v14  ;;  %v23_v32 = vld [vmem:[%s1019_s0 + $0x48] sm:$0xff]  ;;  %v24_v37 = vld [vmem:[%s1019_s0 + $0x50] sm:$0xff] }
   0x5   :  { %v86_v11 = vmul.f32 %v439_v1, %v18_v8  ;;  %v150_v15 = vadd.f32 %v444_v2, %v82_v4  ;;  %v151_v16 = vadd.f32 %v444_v2, %v83_v5  ;;  %v152_v19 = vadd.f32 %v444_v2, %v84_v9  ;;  %v22_v31 = vld [vmem:[%s1019_s0 + $0x40] sm:$0xff]  ;;  %v25_v38 = vld [vmem:[%s1019_s0 + $0x58] sm:$0xff]  ;;  %v27_v44 = vld [vmem:[%s1019_s0 + $0x68] sm:$0xff] }
   0x6   :  { %v153_v20 = vadd.f32 %v444_v2, %v85_v10  ;;  %v155_v25 = vadd.f32 %v444_v2, %v87_v17  ;;  %v156_v26 = vadd.f32 %v444_v2, %v88_v18  ;;  %v157_v30 = vadd.f32 %v444_v2, %v89_v22  ;;  %v26_v39 = vld [vmem:[%s1019_s0 + $0x60] sm:$0xff]  ;;  %v28_v45 = vld [vmem:[%s1019_s0 + $0x70] sm:$0xff]  ;;  %v29_v50 = vld [vmem:[%s1019_s0 + $0x78] sm:$0xff] }
   0x7   :  { %v154_v21 = vadd.f32 %v444_v2, %v86_v11  ;;  %v214_v23 = vmax.f32 %v150_v15, 0.0  ;;  %v215_v24 = vmax.f32 %v151_v16, 0.0  ;;  %v216_v27 = vmax.f32 %v152_v19, 0.0  ;;  %v30_v5 = vld [vmem:[%s1019_s0 + $0x80] sm:$0xff]  ;;  %v31_v6 = vld [vmem:[%s1019_s0 + $0x88] sm:$0xff]  ;;  %v32_v11 = vld [vmem:[%s1019_s0 + $0x90] sm:$0xff] }
   0x8   :  { %v217_v28 = vmax.f32 %v153_v20, 0.0  ;;  %v219_v35 = vmax.f32 %v155_v25, 0.0  ;;  %v220_v36 = vmax.f32 %v156_v26, 0.0  ;;  %v221_v43 = vmax.f32 %v157_v30, 0.0  ;;  %v33_v16 = vld [vmem:[%s1019_s0 + $0x98] sm:$0xff]  ;;  %v34_v17 = vld [vmem:[%s1019_s0 + $0xa0] sm:$0xff] }
   0x9   :  { %v218_v29 = vmax.f32 %v154_v21, 0.0  ;;  %v278_v33 = vpack.c.bf16 %v214_v23, %v214_v23  ;;  %v279_v34 = vpack.c.bf16 %v215_v24, %v215_v24  ;;  %v280_v40 = vpack.c.bf16 %v216_v27, %v216_v27  ;;  %v35_v22 = vld [vmem:[%s1019_s0 + $0xa8] sm:$0xff]  ;;  %v36_v23 = vld [vmem:[%s1019_s0 + $0xb0] sm:$0xff] }
   0xa   :  { %v281_v41 = vpack.c.bf16 %v217_v28, %v217_v28  ;;  %v283_v46 = vpack.c.bf16 %v219_v35, %v219_v35  ;;  %v284_v47 = vpack.c.bf16 %v220_v36, %v220_v36  ;;  %v90_v48 = vmul.f32 %v439_v1, %v22_v31  ;;  %v37_v28 = vld [vmem:[%s1019_s0 + $0xb8] sm:$0xff] }
   0xb   :  { %v282_v42 = vpack.c.bf16 %v218_v29, %v218_v29  ;;  %343 = vst.msk [vmem:[%s1022_s3] sm:$0xf] %vm342_vm0, %v278_v33  ;;  %v91_v49 = vmul.f32 %v439_v1, %v23_v32  ;;  %v285_v51 = vpack.c.bf16 %v221_v43, %v221_v43  ;;  %v92_v52 = vmul.f32 %v439_v1, %v24_v37 }
   0xc   :  { %344 = vst.msk [vmem:[%s1022_s3 + $0x4] sm:$0xf] %vm342_vm0, %v279_v34  ;;  %v93_v53 = vmul.f32 %v439_v1, %v25_v38  ;;  %v94_v54 = vmul.f32 %v439_v1, %v26_v39  ;;  %v158_v55 = vadd.f32 %v444_v2, %v90_v48  ;;  %v95_v57 = vmul.f32 %v439_v1, %v27_v44 }
   0xd   :  { %345 = vst.msk [vmem:[%s1022_s3 + $0x8] sm:$0xf] %vm342_vm0, %v280_v40  ;;  %v159_v56 = vadd.f32 %v444_v2, %v91_v49  ;;  %v96_v58 = vmul.f32 %v439_v1, %v28_v45  ;;  %v160_v59 = vadd.f32 %v444_v2, %v92_v52  ;;  %v97_v62 = vmul.f32 %v439_v1, %v29_v50  ;;  %v38_v45 = vld [vmem:[%s1019_s0 + $0xc0] sm:$0xff] }
   0xe   :  { %346 = vst.msk [vmem:[%s1022_s3 + $0xc] sm:$0xf] %vm342_vm0, %v281_v41  ;;  %v161_v60 = vadd.f32 %v444_v2, %v93_v53  ;;  %v162_v61 = vadd.f32 %v444_v2, %v94_v54  ;;  %v222_v63 = vmax.f32 %v158_v55, 0.0  ;;  %v163_v3 = vadd.f32 %v444_v2, %v95_v57  ;;  %v42_v57 = vld [vmem:[%s1019_s0 + $0xe0] sm:$0xff] }
   0xf   :  { %347 = vst.msk [vmem:[%s1022_s3 + $0x10] sm:$0xf] %vm342_vm0, %v282_v42  ;;  %v223_v0 = vmax.f32 %v159_v56, 0.0  ;;  %v164_v4 = vadd.f32 %v444_v2, %v96_v58  ;;  %v224_v7 = vmax.f32 %v160_v59, 0.0  ;;  %v165_v10 = vadd.f32 %v444_v2, %v97_v62  ;;  %v41_v56 = vld [vmem:[%s1019_s0 + $0xd8] sm:$0xff]  ;;  %v43_v62 = vld [vmem:[%s1019_s0 + $0xe8] sm:$0xff] }
  0x10   :  { %348 = vst.msk [vmem:[%s1022_s3 + $0x14] sm:$0xf] %vm342_vm0, %v283_v46  ;;  %v225_v8 = vmax.f32 %v161_v60, 0.0  ;;  %v226_v9 = vmax.f32 %v162_v61, 0.0  ;;  %v286_v12 = vpack.c.bf16 %v222_v63, %v222_v63  ;;  %v227_v14 = vmax.f32 %v163_v3, 0.0  ;;  %v39_v46 = vld [vmem:[%s1019_s0 + $0xc8] sm:$0xff] }
  0x11   :  { %349 = vst.msk [vmem:[%s1022_s3 + $0x18] sm:$0xf] %vm342_vm0, %v284_v47  ;;  %v287_v13 = vpack.c.bf16 %v223_v0, %v223_v0  ;;  %v228_v15 = vmax.f32 %v164_v4, 0.0  ;;  %v288_v18 = vpack.c.bf16 %v224_v7, %v224_v7  ;;  %v229_v21 = vmax.f32 %v165_v10, 0.0  ;;  %v44_v63 = vld [vmem:[%s1019_s0 + $0xf0] sm:$0xff] }
  0x12   :  { %350 = vst.msk [vmem:[%s1022_s3 + $0x1c] sm:$0xf] %vm342_vm0, %v285_v51  ;;  %v289_v19 = vpack.c.bf16 %v225_v8, %v225_v8  ;;  %v290_v20 = vpack.c.bf16 %v226_v9, %v226_v9  ;;  %v291_v24 = vpack.c.bf16 %v227_v14, %v227_v14  ;;  %v98_v26 = vmul.f32 %v439_v1, %v30_v5  ;;  %v40_v51 = vld [vmem:[%s1019_s0 + $0xd0] sm:$0xff] }
  0x13   :  { %351 = vst.msk [vmem:[%s1022_s3 + $0x20] sm:$0xf] %vm342_vm0, %v286_v12  ;;  %v292_v25 = vpack.c.bf16 %v228_v15, %v228_v15  ;;  %v99_v27 = vmul.f32 %v439_v1, %v31_v6  ;;  %v293_v29 = vpack.c.bf16 %v229_v21, %v229_v21  ;;  %v100_v30 = vmul.f32 %v439_v1, %v32_v11  ;;  %v45_v6 = vld [vmem:[%s1019_s0 + $0xf8] sm:$0xff] }
  0x14   :  { %352 = vst.msk [vmem:[%s1022_s3 + $0x24] sm:$0xf] %vm342_vm0, %v287_v13  ;;  %v101_v31 = vmul.f32 %v439_v1, %v33_v16  ;;  %v102_v32 = vmul.f32 %v439_v1, %v34_v17  ;;  %v166_v33 = vadd.f32 %v444_v2, %v98_v26  ;;  %v103_v35 = vmul.f32 %v439_v1, %v35_v22 }
  0x15   :  { %353 = vst.msk [vmem:[%s1022_s3 + $0x28] sm:$0xf] %vm342_vm0, %v288_v18  ;;  %v167_v34 = vadd.f32 %v444_v2, %v99_v27  ;;  %v104_v36 = vmul.f32 %v439_v1, %v36_v23  ;;  %v168_v37 = vadd.f32 %v444_v2, %v100_v30  ;;  %v105_v40 = vmul.f32 %v439_v1, %v37_v28  ;;  %v46_v23 = vld [vmem:[%s1019_s0 + $0x100] sm:$0xff] }
  0x16   :  { %354 = vst.msk [vmem:[%s1022_s3 + $0x2c] sm:$0xf] %vm342_vm0, %v289_v19  ;;  %v169_v38 = vadd.f32 %v444_v2, %v101_v31  ;;  %v170_v39 = vadd.f32 %v444_v2, %v102_v32  ;;  %v230_v41 = vmax.f32 %v166_v33, 0.0  ;;  %v171_v43 = vadd.f32 %v444_v2, %v103_v35  ;;  %v50_v35 = vld [vmem:[%s1019_s0 + $0x120] sm:$0xff] }
  0x17   :  { %355 = vst.msk [vmem:[%s1022_s3 + $0x30] sm:$0xf] %vm342_vm0, %v290_v20  ;;  %v231_v42 = vmax.f32 %v167_v34, 0.0  ;;  %v172_v44 = vadd.f32 %v444_v2, %v104_v36  ;;  %v232_v47 = vmax.f32 %v168_v37, 0.0  ;;  %v173_v50 = vadd.f32 %v444_v2, %v105_v40  ;;  %v49_v34 = vld [vmem:[%s1019_s0 + $0x118] sm:$0xff]  ;;  %v51_v40 = vld [vmem:[%s1019_s0 + $0x128] sm:$0xff] }
  0x18   :  { %356 = vst.msk [vmem:[%s1022_s3 + $0x34] sm:$0xf] %vm342_vm0, %v291_v24  ;;  %v233_v48 = vmax.f32 %v169_v38, 0.0  ;;  %v234_v49 = vmax.f32 %v170_v39, 0.0  ;;  %v294_v52 = vpack.c.bf16 %v230_v41, %v230_v41  ;;  %v235_v54 = vmax.f32 %v171_v43, 0.0  ;;  %v47_v24 = vld [vmem:[%s1019_s0 + $0x108] sm:$0xff] }
  0x19   :  { %357 = vst.msk [vmem:[%s1022_s3 + $0x38] sm:$0xf] %vm342_vm0, %v292_v25  ;;  %v295_v53 = vpack.c.bf16 %v231_v42, %v231_v42  ;;  %v236_v55 = vmax.f32 %v172_v44, 0.0  ;;  %v296_v58 = vpack.c.bf16 %v232_v47, %v232_v47  ;;  %v237_v61 = vmax.f32 %v173_v50, 0.0  ;;  %v52_v41 = vld [vmem:[%s1019_s0 + $0x130] sm:$0xff] }
  0x1a   :  { %358 = vst.msk [vmem:[%s1022_s3 + $0x3c] sm:$0xf] %vm342_vm0, %v293_v29  ;;  %v297_v59 = vpack.c.bf16 %v233_v48, %v233_v48  ;;  %v298_v60 = vpack.c.bf16 %v234_v49, %v234_v49  ;;  %v299_v0 = vpack.c.bf16 %v235_v54, %v235_v54  ;;  %v106_v4 = vmul.f32 %v439_v1, %v38_v45  ;;  %v48_v29 = vld [vmem:[%s1019_s0 + $0x110] sm:$0xff] }
  0x1b   :  { %359 = vst.msk [vmem:[%s1022_s3 + $0x40] sm:$0xf] %vm342_vm0, %v294_v52  ;;  %v300_v3 = vpack.c.bf16 %v236_v55, %v236_v55  ;;  %v107_v5 = vmul.f32 %v439_v1, %v39_v46  ;;  %v301_v7 = vpack.c.bf16 %v237_v61, %v237_v61  ;;  %v108_v8 = vmul.f32 %v439_v1, %v40_v51  ;;  %v53_v46 = vld [vmem:[%s1019_s0 + $0x138] sm:$0xff] }
  0x1c   :  { %360 = vst.msk [vmem:[%s1022_s3 + $0x44] sm:$0xf] %vm342_vm0, %v295_v53  ;;  %v109_v9 = vmul.f32 %v439_v1, %v41_v56  ;;  %v110_v10 = vmul.f32 %v439_v1, %v42_v57  ;;  %v174_v11 = vadd.f32 %v444_v2, %v106_v4  ;;  %v111_v13 = vmul.f32 %v439_v1, %v43_v62 }
  0x1d   :  { %361 = vst.msk [vmem:[%s1022_s3 + $0x48] sm:$0xf] %vm342_vm0, %v296_v58  ;;  %v175_v12 = vadd.f32 %v444_v2, %v107_v5  ;;  %v112_v14 = vmul.f32 %v439_v1, %v44_v63  ;;  %v176_v15 = vadd.f32 %v444_v2, %v108_v8  ;;  %v113_v18 = vmul.f32 %v439_v1, %v45_v6  ;;  %v54_v63 = vld [vmem:[%s1019_s0 + $0x140] sm:$0xff] }
  0x1e   :  { %362 = vst.msk [vmem:[%s1022_s3 + $0x4c] sm:$0xf] %vm342_vm0, %v297_v59  ;;  %v177_v16 = vadd.f32 %v444_v2, %v109_v9  ;;  %v178_v17 = vadd.f32 %v444_v2, %v110_v10  ;;  %v238_v19 = vmax.f32 %v174_v11, 0.0  ;;  %v179_v21 = vadd.f32 %v444_v2, %v111_v13  ;;  %v58_v13 = vld [vmem:[%s1019_s0 + $0x160] sm:$0xff] }
  0x1f   :  { %363 = vst.msk [vmem:[%s1022_s3 + $0x50] sm:$0xf] %vm342_vm0, %v298_v60  ;;  %v239_v20 = vmax.f32 %v175_v12, 0.0  ;;  %v180_v22 = vadd.f32 %v444_v2, %v112_v14  ;;  %v240_v25 = vmax.f32 %v176_v15, 0.0  ;;  %v181_v28 = vadd.f32 %v444_v2, %v113_v18  ;;  %v57_v12 = vld [vmem:[%s1019_s0 + $0x158] sm:$0xff]  ;;  %v59_v18 = vld [vmem:[%s1019_s0 + $0x168] sm:$0xff] }
  0x20   :  { %364 = vst.msk [vmem:[%s1022_s3 + $0x54] sm:$0xf] %vm342_vm0, %v299_v0  ;;  %v241_v26 = vmax.f32 %v177_v16, 0.0  ;;  %v242_v27 = vmax.f32 %v178_v17, 0.0  ;;  %v302_v30 = vpack.c.bf16 %v238_v19, %v238_v19  ;;  %v243_v32 = vmax.f32 %v179_v21, 0.0  ;;  %v55_v0 = vld [vmem:[%s1019_s0 + $0x148] sm:$0xff] }
  0x21   :  { %365 = vst.msk [vmem:[%s1022_s3 + $0x58] sm:$0xf] %vm342_vm0, %v300_v3  ;;  %v303_v31 = vpack.c.bf16 %v239_v20, %v239_v20  ;;  %v244_v33 = vmax.f32 %v180_v22, 0.0  ;;  %v304_v36 = vpack.c.bf16 %v240_v25, %v240_v25  ;;  %v245_v39 = vmax.f32 %v181_v28, 0.0  ;;  %v60_v19 = vld [vmem:[%s1019_s0 + $0x170] sm:$0xff] }
  0x22   :  { %366 = vst.msk [vmem:[%s1022_s3 + $0x5c] sm:$0xf] %vm342_vm0, %v301_v7  ;;  %v305_v37 = vpack.c.bf16 %v241_v26, %v241_v26  ;;  %v306_v38 = vpack.c.bf16 %v242_v27, %v242_v27  ;;  %v307_v42 = vpack.c.bf16 %v243_v32, %v243_v32  ;;  %v114_v44 = vmul.f32 %v439_v1, %v46_v23  ;;  %v56_v7 = vld [vmem:[%s1019_s0 + $0x150] sm:$0xff] }
  0x23   :  { %367 = vst.msk [vmem:[%s1022_s3 + $0x60] sm:$0xf] %vm342_vm0, %v302_v30  ;;  %v308_v43 = vpack.c.bf16 %v244_v33, %v244_v33  ;;  %v115_v45 = vmul.f32 %v439_v1, %v47_v24  ;;  %v309_v47 = vpack.c.bf16 %v245_v39, %v245_v39  ;;  %v116_v48 = vmul.f32 %v439_v1, %v48_v29  ;;  %v61_v24 = vld [vmem:[%s1019_s0 + $0x178] sm:$0xff] }
  0x24   :  { %368 = vst.msk [vmem:[%s1022_s3 + $0x64] sm:$0xf] %vm342_vm0, %v303_v31  ;;  %v117_v49 = vmul.f32 %v439_v1, %v49_v34  ;;  %v118_v50 = vmul.f32 %v439_v1, %v50_v35  ;;  %v182_v51 = vadd.f32 %v444_v2, %v114_v44  ;;  %v119_v53 = vmul.f32 %v439_v1, %v51_v40 }
  0x25   :  { %369 = vst.msk [vmem:[%s1022_s3 + $0x68] sm:$0xf] %vm342_vm0, %v304_v36  ;;  %v183_v52 = vadd.f32 %v444_v2, %v115_v45  ;;  %v120_v54 = vmul.f32 %v439_v1, %v52_v41  ;;  %v184_v55 = vadd.f32 %v444_v2, %v116_v48  ;;  %v121_v58 = vmul.f32 %v439_v1, %v53_v46  ;;  %v62_v41 = vld [vmem:[%s1019_s0 + $0x180] sm:$0xff] }
  0x26   :  { %370 = vst.msk [vmem:[%s1022_s3 + $0x6c] sm:$0xf] %vm342_vm0, %v305_v37  ;;  %v185_v56 = vadd.f32 %v444_v2, %v117_v49  ;;  %v186_v57 = vadd.f32 %v444_v2, %v118_v50  ;;  %v246_v59 = vmax.f32 %v182_v51, 0.0  ;;  %v187_v61 = vadd.f32 %v444_v2, %v119_v53  ;;  %v66_v53 = vld [vmem:[%s1019_s0 + $0x1a0] sm:$0xff] }
  0x27   :  { %371 = vst.msk [vmem:[%s1022_s3 + $0x70] sm:$0xf] %vm342_vm0, %v306_v38  ;;  %v247_v60 = vmax.f32 %v183_v52, 0.0  ;;  %v188_v62 = vadd.f32 %v444_v2, %v120_v54  ;;  %v248_v3 = vmax.f32 %v184_v55, 0.0  ;;  %v189_v6 = vadd.f32 %v444_v2, %v121_v58  ;;  %v65_v52 = vld [vmem:[%s1019_s0 + $0x198] sm:$0xff]  ;;  %v67_v58 = vld [vmem:[%s1019_s0 + $0x1a8] sm:$0xff] }
  0x28   :  { %372 = vst.msk [vmem:[%s1022_s3 + $0x74] sm:$0xf] %vm342_vm0, %v307_v42  ;;  %v249_v4 = vmax.f32 %v185_v56, 0.0  ;;  %v250_v5 = vmax.f32 %v186_v57, 0.0  ;;  %v310_v8 = vpack.c.bf16 %v246_v59, %v246_v59  ;;  %v251_v10 = vmax.f32 %v187_v61, 0.0  ;;  %v63_v42 = vld [vmem:[%s1019_s0 + $0x188] sm:$0xff] }
  0x29   :  { %373 = vst.msk [vmem:[%s1022_s3 + $0x78] sm:$0xf] %vm342_vm0, %v308_v43  ;;  %v311_v9 = vpack.c.bf16 %v247_v60, %v247_v60  ;;  %v252_v11 = vmax.f32 %v188_v62, 0.0  ;;  %v312_v14 = vpack.c.bf16 %v248_v3, %v248_v3  ;;  %v253_v17 = vmax.f32 %v189_v6, 0.0  ;;  %v68_v59 = vld [vmem:[%s1019_s0 + $0x1b0] sm:$0xff] }
  0x2a   :  { %374 = vst.msk [vmem:[%s1022_s3 + $0x7c] sm:$0xf] %vm342_vm0, %v309_v47  ;;  %v313_v15 = vpack.c.bf16 %v249_v4, %v249_v4  ;;  %v314_v16 = vpack.c.bf16 %v250_v5, %v250_v5  ;;  %v315_v20 = vpack.c.bf16 %v251_v10, %v251_v10  ;;  %v122_v22 = vmul.f32 %v439_v1, %v54_v63  ;;  %v64_v47 = vld [vmem:[%s1019_s0 + $0x190] sm:$0xff] }
  0x2b   :  { %375 = vst.msk [vmem:[%s1022_s3 + $0x80] sm:$0xf] %vm342_vm0, %v310_v8  ;;  %v316_v21 = vpack.c.bf16 %v252_v11, %v252_v11  ;;  %v123_v23 = vmul.f32 %v439_v1, %v55_v0  ;;  %v317_v25 = vpack.c.bf16 %v253_v17, %v253_v17  ;;  %v124_v26 = vmul.f32 %v439_v1, %v56_v7  ;;  %v69_v0 = vld [vmem:[%s1019_s0 + $0x1b8] sm:$0xff] }
  0x2c   :  { %376 = vst.msk [vmem:[%s1022_s3 + $0x84] sm:$0xf] %vm342_vm0, %v311_v9  ;;  %v125_v27 = vmul.f32 %v439_v1, %v57_v12  ;;  %v126_v28 = vmul.f32 %v439_v1, %v58_v13  ;;  %v190_v29 = vadd.f32 %v444_v2, %v122_v22  ;;  %v127_v31 = vmul.f32 %v439_v1, %v59_v18 }
  0x2d   :  { %377 = vst.msk [vmem:[%s1022_s3 + $0x88] sm:$0xf] %vm342_vm0, %v312_v14  ;;  %v191_v30 = vadd.f32 %v444_v2, %v123_v23  ;;  %v128_v32 = vmul.f32 %v439_v1, %v60_v19  ;;  %v192_v33 = vadd.f32 %v444_v2, %v124_v26  ;;  %v129_v36 = vmul.f32 %v439_v1, %v61_v24  ;;  %v70_v19 = vld [vmem:[%s1019_s0 + $0x1c0] sm:$0xff] }
  0x2e   :  { %378 = vst.msk [vmem:[%s1022_s3 + $0x8c] sm:$0xf] %vm342_vm0, %v313_v15  ;;  %v193_v34 = vadd.f32 %v444_v2, %v125_v27  ;;  %v194_v35 = vadd.f32 %v444_v2, %v126_v28  ;;  %v254_v37 = vmax.f32 %v190_v29, 0.0  ;;  %v195_v39 = vadd.f32 %v444_v2, %v127_v31  ;;  %v74_v31 = vld [vmem:[%s1019_s0 + $0x1e0] sm:$0xff] }
  0x2f   :  { %379 = vst.msk [vmem:[%s1022_s3 + $0x90] sm:$0xf] %vm342_vm0, %v314_v16  ;;  %v255_v38 = vmax.f32 %v191_v30, 0.0  ;;  %v196_v40 = vadd.f32 %v444_v2, %v128_v32  ;;  %v256_v43 = vmax.f32 %v192_v33, 0.0  ;;  %v197_v46 = vadd.f32 %v444_v2, %v129_v36  ;;  %v73_v30 = vld [vmem:[%s1019_s0 + $0x1d8] sm:$0xff]  ;;  %v75_v36 = vld [vmem:[%s1019_s0 + $0x1e8] sm:$0xff] }
  0x30   :  { %380 = vst.msk [vmem:[%s1022_s3 + $0x94] sm:$0xf] %vm342_vm0, %v315_v20  ;;  %v257_v44 = vmax.f32 %v193_v34, 0.0  ;;  %v258_v45 = vmax.f32 %v194_v35, 0.0  ;;  %v318_v48 = vpack.c.bf16 %v254_v37, %v254_v37  ;;  %v259_v50 = vmax.f32 %v195_v39, 0.0  ;;  %v71_v20 = vld [vmem:[%s1019_s0 + $0x1c8] sm:$0xff] }
  0x31   :  { %381 = vst.msk [vmem:[%s1022_s3 + $0x98] sm:$0xf] %vm342_vm0, %v316_v21  ;;  %v319_v49 = vpack.c.bf16 %v255_v38, %v255_v38  ;;  %v260_v51 = vmax.f32 %v196_v40, 0.0  ;;  %v320_v54 = vpack.c.bf16 %v256_v43, %v256_v43  ;;  %v261_v57 = vmax.f32 %v197_v46, 0.0  ;;  %v76_v37 = vld [vmem:[%s1019_s0 + $0x1f0] sm:$0xff] }
  0x32   :  { %382 = vst.msk [vmem:[%s1022_s3 + $0x9c] sm:$0xf] %vm342_vm0, %v317_v25  ;;  %v321_v55 = vpack.c.bf16 %v257_v44, %v257_v44  ;;  %v322_v56 = vpack.c.bf16 %v258_v45, %v258_v45  ;;  %v323_v60 = vpack.c.bf16 %v259_v50, %v259_v50  ;;  %v130_v62 = vmul.f32 %v439_v1, %v62_v41  ;;  %v72_v25 = vld [vmem:[%s1019_s0 + $0x1d0] sm:$0xff] }
  0x33   :  { %383 = vst.msk [vmem:[%s1022_s3 + $0xa0] sm:$0xf] %vm342_vm0, %v318_v48  ;;  %v324_v61 = vpack.c.bf16 %v260_v51, %v260_v51  ;;  %v131_v63 = vmul.f32 %v439_v1, %v63_v42  ;;  %v325_v3 = vpack.c.bf16 %v261_v57, %v261_v57  ;;  %v132_v4 = vmul.f32 %v439_v1, %v64_v47  ;;  %v77_v42 = vld [vmem:[%s1019_s0 + $0x1f8] sm:$0xff] }
  0x34   :  { %384 = vst.msk [vmem:[%s1022_s3 + $0xa4] sm:$0xf] %vm342_vm0, %v319_v49  ;;  %v133_v5 = vmul.f32 %v439_v1, %v65_v52  ;;  %v134_v6 = vmul.f32 %v439_v1, %v66_v53  ;;  %v198_v7 = vadd.f32 %v444_v2, %v130_v62  ;;  %v135_v9 = vmul.f32 %v439_v1, %v67_v58 }
  0x35   :  { %385 = vst.msk [vmem:[%s1022_s3 + $0xa8] sm:$0xf] %vm342_vm0, %v320_v54  ;;  %v199_v8 = vadd.f32 %v444_v2, %v131_v63  ;;  %v136_v10 = vmul.f32 %v439_v1, %v68_v59  ;;  %v200_v11 = vadd.f32 %v444_v2, %v132_v4  ;;  %v137_v14 = vmul.f32 %v439_v1, %v69_v0 }
  0x36   :  { %386 = vst.msk [vmem:[%s1022_s3 + $0xac] sm:$0xf] %vm342_vm0, %v321_v55  ;;  %v201_v12 = vadd.f32 %v444_v2, %v133_v5  ;;  %v202_v13 = vadd.f32 %v444_v2, %v134_v6  ;;  %v262_v15 = vmax.f32 %v198_v7, 0.0  ;;  %v203_v17 = vadd.f32 %v444_v2, %v135_v9 }
  0x37   :  { %387 = vst.msk [vmem:[%s1022_s3 + $0xb0] sm:$0xf] %vm342_vm0, %v322_v56  ;;  %v263_v16 = vmax.f32 %v199_v8, 0.0  ;;  %v204_v18 = vadd.f32 %v444_v2, %v136_v10  ;;  %v264_v21 = vmax.f32 %v200_v11, 0.0  ;;  %v205_v24 = vadd.f32 %v444_v2, %v137_v14 }
  0x38   :  { %388 = vst.msk [vmem:[%s1022_s3 + $0xb4] sm:$0xf] %vm342_vm0, %v323_v60  ;;  %v265_v22 = vmax.f32 %v201_v12, 0.0  ;;  %v266_v23 = vmax.f32 %v202_v13, 0.0  ;;  %v326_v26 = vpack.c.bf16 %v262_v15, %v262_v15  ;;  %v267_v28 = vmax.f32 %v203_v17, 0.0 }
  0x39   :  { %389 = vst.msk [vmem:[%s1022_s3 + $0xb8] sm:$0xf] %vm342_vm0, %v324_v61  ;;  %v327_v27 = vpack.c.bf16 %v263_v16, %v263_v16  ;;  %v268_v29 = vmax.f32 %v204_v18, 0.0  ;;  %v328_v32 = vpack.c.bf16 %v264_v21, %v264_v21  ;;  %v269_v35 = vmax.f32 %v205_v24, 0.0 }
  0x3a   :  { %390 = vst.msk [vmem:[%s1022_s3 + $0xbc] sm:$0xf] %vm342_vm0, %v325_v3  ;;  %v329_v33 = vpack.c.bf16 %v265_v22, %v265_v22  ;;  %v330_v34 = vpack.c.bf16 %v266_v23, %v266_v23  ;;  %v331_v38 = vpack.c.bf16 %v267_v28, %v267_v28  ;;  %v138_v40 = vmul.f32 %v439_v1, %v70_v19 }
  0x3b   :  { %391 = vst.msk [vmem:[%s1022_s3 + $0xc0] sm:$0xf] %vm342_vm0, %v326_v26  ;;  %v332_v39 = vpack.c.bf16 %v268_v29, %v268_v29  ;;  %v139_v41 = vmul.f32 %v439_v1, %v71_v20  ;;  %v333_v43 = vpack.c.bf16 %v269_v35, %v269_v35  ;;  %v140_v44 = vmul.f32 %v439_v1, %v72_v25 }
  0x3c   :  { %392 = vst.msk [vmem:[%s1022_s3 + $0xc4] sm:$0xf] %vm342_vm0, %v327_v27  ;;  %v141_v45 = vmul.f32 %v439_v1, %v73_v30  ;;  %v142_v46 = vmul.f32 %v439_v1, %v74_v31  ;;  %v206_v47 = vadd.f32 %v444_v2, %v138_v40  ;;  %v143_v49 = vmul.f32 %v439_v1, %v75_v36 }
  0x3d   :  { %393 = vst.msk [vmem:[%s1022_s3 + $0xc8] sm:$0xf] %vm342_vm0, %v328_v32  ;;  %v207_v48 = vadd.f32 %v444_v2, %v139_v41  ;;  %v144_v50 = vmul.f32 %v439_v1, %v76_v37  ;;  %v208_v51 = vadd.f32 %v444_v2, %v140_v44  ;;  %v145_v54 = vmul.f32 %v439_v1, %v77_v42 }
  0x3e   :  { %394 = vst.msk [vmem:[%s1022_s3 + $0xcc] sm:$0xf] %vm342_vm0, %v329_v33  ;;  %v209_v52 = vadd.f32 %v444_v2, %v141_v45  ;;  %v210_v53 = vadd.f32 %v444_v2, %v142_v46  ;;  %v270_v55 = vmax.f32 %v206_v47, 0.0  ;;  %v211_v57 = vadd.f32 %v444_v2, %v143_v49 }
  0x3f   :  { %395 = vst.msk [vmem:[%s1022_s3 + $0xd0] sm:$0xf] %vm342_vm0, %v330_v34  ;;  %v271_v56 = vmax.f32 %v207_v48, 0.0  ;;  %v212_v58 = vadd.f32 %v444_v2, %v144_v50  ;;  %v272_v59 = vmax.f32 %v208_v51, 0.0  ;;  %v213_v1 = vadd.f32 %v444_v2, %v145_v54 }
  0x40   :  { %396 = vst.msk [vmem:[%s1022_s3 + $0xd4] sm:$0xf] %vm342_vm0, %v331_v38  ;;  %v273_v60 = vmax.f32 %v209_v52, 0.0  ;;  %v274_v61 = vmax.f32 %v210_v53, 0.0  ;;  %v334_v62 = vpack.c.bf16 %v270_v55, %v270_v55  ;;  %v275_v0 = vmax.f32 %v211_v57, 0.0 }
  0x41   :  { %397 = vst.msk [vmem:[%s1022_s3 + $0xd8] sm:$0xf] %vm342_vm0, %v332_v39  ;;  %v335_v63 = vpack.c.bf16 %v271_v56, %v271_v56  ;;  %v276_v3 = vmax.f32 %v212_v58, 0.0  ;;  %v336_v4 = vpack.c.bf16 %v272_v59, %v272_v59  ;;  %v277_v6 = vmax.f32 %v213_v1, 0.0 }
  0x42   :  { %398 = vst.msk [vmem:[%s1022_s3 + $0xdc] sm:$0xf] %vm342_vm0, %v333_v43  ;;  %v337_v5 = vpack.c.bf16 %v273_v60, %v273_v60  ;;  %v338_v2 = vpack.c.bf16 %v274_v61, %v274_v61  ;;  %v339_v7 = vpack.c.bf16 %v275_v0, %v275_v0 }
  0x43   :  { %399 = vst.msk [vmem:[%s1022_s3 + $0xe0] sm:$0xf] %vm342_vm0, %v334_v62  ;;  %v340_v8 = vpack.c.bf16 %v276_v3, %v276_v3  ;;  %v341_v9 = vpack.c.bf16 %v277_v6, %v277_v6 }
  0x44   :  { %400 = vst.msk [vmem:[%s1022_s3 + $0xe4] sm:$0xf] %vm342_vm0, %v335_v63 }
  0x45   :  { %401 = vst.msk [vmem:[%s1022_s3 + $0xe8] sm:$0xf] %vm342_vm0, %v336_v4 }
  0x46   :  { %402 = vst.msk [vmem:[%s1022_s3 + $0xec] sm:$0xf] %vm342_vm0, %v337_v5 }
  0x47   :  { %403 = vst.msk [vmem:[%s1022_s3 + $0xf0] sm:$0xf] %vm342_vm0, %v338_v2 }
  0x48   :  { %404 = vst.msk [vmem:[%s1022_s3 + $0xf4] sm:$0xf] %vm342_vm0, %v339_v7 }
  0x49   :  { %405 = vst.msk [vmem:[%s1022_s3 + $0xf8] sm:$0xf] %vm342_vm0, %v340_v8 }
  0x4a   :  { %406 = vst.msk [vmem:[%s1022_s3 + $0xfc] sm:$0xf] %vm342_vm0, %v341_v9 }

// kernel: _lambda_.24
= control target key start
LH: loop header
LB: loop body
LE: loop exit
PB: predicated region body
PF: predicated region fallthrough
CT: control target
= control target key end

     0   :  { %s614_s9 = smov 0   ;;  %s840_s0 = inlined_call_operand.vmem [shape: f32[2048,8], index: 0, kind: input, shape index: {}]   ;;  %s841_s1 = inlined_call_operand.vmem [shape: f32[1,8], index: 1, kind: output, shape index: {0}]   ;;  %s842_s2 = inlined_call_operand.vmem [shape: f32[1,8], index: 2, kind: output, shape index: {1}]  }
   0x1 LB: > { %s572_s10 = sadd.s32 4294967295, %s596_s9   ;;  %p575_p0 = scmp.ge.s32.totalorder %s596_s9, 1  ;;  %s596_s9 = sphi %s614_s9, %s13_s9  }
   0x2   : > { %p106_p1 = scmp.lt.s32.totalorder %s596_s9, 5 }
   0x4   : > { %p107_p2 = pnand %p575_p0, %p106_p1 }
   0x5   : > { %s576_s11 = sshll.u32 (!%p107_p2), %s572_s10, 6  ;;  %p578_p4 = scmp.ne.s32.totalorder (!%p107_p2), %s572_s10, 0 }
   0x6   : > { %110 = sbr.rel (%p107_p2) target bundleno = 166 (0xa6), region = 24  ;;  %p124_p3 = scmp.lt.s32.totalorder (!%p107_p2), %s576_s11, 255 }
   0xb   : > { %s844_s11 = smov (!%p124_p3, %s576_s11), 255  ;;  %132 = sbr.rel (%p578_p4) target bundleno = 19 (0x13), region = 28 }
   0xc   : > { %s577_s12 = sshll.u32 %s844_s11, 3 }
   0xd   : > { %s625_s15 = scalar_lea.vmem %s840_s0, %s577_s12 }
  0x10   : > { %vm133_vm0 = vcmask 57344   ;;  %v598_v0 = vmov 0.0  }
  0x11   : > { %134 = vst.msk [vmem:[%s841_s1] sm:$0x1] %vm133_vm0, %v598_v0 }
  0x12   : > { %135 = vst.msk [vmem:[%s842_s2] sm:$0x1] %vm133_vm0, %v598_v0 }
  0x13 PF: > { %v136_v1 = vld [vmem:[%s625_s15] sm:$0xff]  ;;  %v137_v2 = vld [vmem:[%s625_s15 + $0x8] sm:$0xff]  ;;  %v138_v3 = vld [vmem:[%s625_s15 + $0x10] sm:$0xff]  ;;  %vm201_vm1 = vcmask 64512   ;;  %vm336_vm2 = vcmask 57344  }
  0x14   : > { %v202_v4 = vsel %vm201_vm1, %v136_v1, 0.0  ;;  %v203_v5 = vsel %vm201_vm1, %v137_v2, 0.0  ;;  %v205_v6 = vsel %vm201_vm1, %v138_v3, 0.0  ;;  %v139_v7 = vld [vmem:[%s625_s15 + $0x18] sm:$0xff]  ;;  %v140_v10 = vld [vmem:[%s625_s15 + $0x20] sm:$0xff]  ;;  %v141_v13 = vld [vmem:[%s625_s15 + $0x28] sm:$0xff]  ;;  %v339_v21 = vmul.f32 %v136_v1, %v136_v1 }
  0x15   : > { %v204_v8 = vadd.f32 %v203_v5, %v202_v4  ;;  %v207_v9 = vsel %vm201_vm1, %v139_v7, 0.0  ;;  %v209_v12 = vsel %vm201_vm1, %v140_v10, 0.0  ;;  %v211_v15 = vsel %vm201_vm1, %v141_v13, 0.0  ;;  %v142_v16 = vld [vmem:[%s625_s15 + $0x30] sm:$0xff]  ;;  %v143_v19 = vld [vmem:[%s625_s15 + $0x38] sm:$0xff]  ;;  %v144_v25 = vld [vmem:[%s625_s15 + $0x40] sm:$0xff] }
  0x16   : > { %v213_v18 = vsel %vm201_vm1, %v142_v16, 0.0  ;;  %v215_v22 = vsel %vm201_vm1, %v143_v19, 0.0  ;;  %v340_v23 = vmul.f32 %v137_v2, %v137_v2  ;;  %v341_v24 = vmul.f32 %v138_v3, %v138_v3  ;;  %v145_v29 = vld [vmem:[%s625_s15 + $0x48] sm:$0xff]  ;;  %v146_v36 = vld [vmem:[%s625_s15 + $0x50] sm:$0xff]  ;;  %v147_v42 = vld [vmem:[%s625_s15 + $0x58] sm:$0xff] }
  0x17   : > { %v206_v11 = vadd.f32 %v205_v6, %v204_v8  ;;  %v217_v27 = vsel %vm201_vm1, %v144_v25, 0.0  ;;  %v342_v28 = vmul.f32 %v139_v7, %v139_v7  ;;  %v403_v31 = vsel %vm201_vm1, %v339_v21, 0.0  ;;  %v148_v48 = vld [vmem:[%s625_s15 + $0x60] sm:$0xff]  ;;  %v149_v54 = vld [vmem:[%s625_s15 + $0x68] sm:$0xff]  ;;  %v150_v60 = vld [vmem:[%s625_s15 + $0x70] sm:$0xff] }
  0x18   : > { %v219_v32 = vsel %vm201_vm1, %v145_v29, 0.0  ;;  %v343_v33 = vmul.f32 %v140_v10, %v140_v10  ;;  %v404_v34 = vsel %vm201_vm1, %v340_v23, 0.0  ;;  %v406_v35 = vsel %vm201_vm1, %v341_v24, 0.0  ;;  %v151_v2 = vld [vmem:[%s625_s15 + $0x78] sm:$0xff]  ;;  %v152_v8 = vld [vmem:[%s625_s15 + $0x80] sm:$0xff] }
  0x19   : > { %v208_v14 = vadd.f32 %v207_v9, %v206_v11  ;;  %v405_v38 = vadd.f32 %v404_v34, %v403_v31  ;;  %v221_v39 = vsel %vm201_vm1, %v146_v36, 0.0  ;;  %v344_v40 = vmul.f32 %v141_v13, %v141_v13 }
  0x1a   : > { %v408_v41 = vsel %vm201_vm1, %v342_v28, 0.0  ;;  %v223_v45 = vsel %vm201_vm1, %v147_v42, 0.0  ;;  %v345_v46 = vmul.f32 %v142_v16, %v142_v16  ;;  %v410_v47 = vsel %vm201_vm1, %v343_v33, 0.0 }
  0x1b   : > { %v210_v17 = vadd.f32 %v209_v12, %v208_v14  ;;  %v407_v44 = vadd.f32 %v406_v35, %v405_v38  ;;  %v225_v51 = vsel %vm201_vm1, %v148_v48, 0.0  ;;  %v346_v52 = vmul.f32 %v143_v19, %v143_v19  ;;  %v153_v14 = vld [vmem:[%s625_s15 + $0x88] sm:$0xff] }
  0x1c   : > { %v412_v53 = vsel %vm201_vm1, %v344_v40, 0.0  ;;  %v227_v57 = vsel %vm201_vm1, %v149_v54, 0.0  ;;  %v347_v58 = vmul.f32 %v144_v25, %v144_v25  ;;  %v414_v59 = vsel %vm201_vm1, %v345_v46, 0.0  ;;  %v157_v38 = vld [vmem:[%s625_s15 + $0xa8] sm:$0xff] }
  0x1d   : > { %v212_v20 = vadd.f32 %v211_v15, %v210_v17  ;;  %v409_v50 = vadd.f32 %v408_v41, %v407_v44  ;;  %v229_v63 = vsel %vm201_vm1, %v150_v60, 0.0  ;;  %v348_v0 = vmul.f32 %v145_v29, %v145_v29  ;;  %v158_v44 = vld [vmem:[%s625_s15 + $0xb0] sm:$0xff] }
  0x1e   : > { %v416_v1 = vsel %vm201_vm1, %v346_v52, 0.0  ;;  %v231_v5 = vsel %vm201_vm1, %v151_v2, 0.0  ;;  %v349_v6 = vmul.f32 %v146_v36, %v146_v36  ;;  %v418_v7 = vsel %vm201_vm1, %v347_v58, 0.0 }
  0x1f   : > { %v214_v26 = vadd.f32 %v213_v18, %v212_v20  ;;  %v411_v56 = vadd.f32 %v410_v47, %v409_v50  ;;  %v233_v11 = vsel %vm201_vm1, %v152_v8, 0.0  ;;  %v350_v12 = vmul.f32 %v147_v42, %v147_v42  ;;  %v154_v20 = vld [vmem:[%s625_s15 + $0x90] sm:$0xff]  ;;  %v159_v50 = vld [vmem:[%s625_s15 + $0xb8] sm:$0xff] }
  0x20   : > { %v420_v13 = vsel %vm201_vm1, %v348_v0, 0.0  ;;  %v235_v17 = vsel %vm201_vm1, %v153_v14, 0.0  ;;  %v351_v18 = vmul.f32 %v148_v48, %v148_v48  ;;  %v422_v19 = vsel %vm201_vm1, %v349_v6, 0.0 }
  0x21   : > { %v216_v30 = vadd.f32 %v215_v22, %v214_v26  ;;  %v413_v62 = vadd.f32 %v412_v53, %v411_v56  ;;  %v237_v23 = vsel %vm201_vm1, %v154_v20, 0.0  ;;  %v352_v24 = vmul.f32 %v149_v54, %v149_v54  ;;  %v155_v26 = vld [vmem:[%s625_s15 + $0x98] sm:$0xff]  ;;  %v160_v56 = vld [vmem:[%s625_s15 + $0xc0] sm:$0xff] }
  0x22   : > { %v424_v25 = vsel %vm201_vm1, %v350_v12, 0.0  ;;  %v239_v29 = vsel %vm201_vm1, %v155_v26, 0.0  ;;  %v426_v31 = vsel %vm201_vm1, %v351_v18, 0.0  ;;  %v354_v36 = vmul.f32 %v151_v2, %v151_v2 }
  0x23   : > { %v218_v37 = vadd.f32 %v217_v27, %v216_v30  ;;  %v415_v4 = vadd.f32 %v414_v59, %v413_v62  ;;  %v353_v30 = vmul.f32 %v150_v60, %v150_v60  ;;  %v243_v41 = vsel %vm201_vm1, %v157_v38, 0.0  ;;  %v161_v62 = vld [vmem:[%s625_s15 + $0xc8] sm:$0xff] }
  0x24   : > { %v355_v42 = vmul.f32 %v152_v8, %v152_v8  ;;  %v245_v47 = vsel %vm201_vm1, %v158_v44, 0.0  ;;  %v356_v48 = vmul.f32 %v153_v14, %v153_v14  ;;  %v247_v53 = vsel %vm201_vm1, %v159_v50, 0.0 }
  0x25   : > { %v220_v43 = vadd.f32 %v219_v32, %v218_v37  ;;  %v417_v10 = vadd.f32 %v416_v1, %v415_v4  ;;  %v156_v32 = vld [vmem:[%s625_s15 + $0xa0] sm:$0xff]  ;;  %v428_v37 = vsel %vm201_vm1, %v352_v24, 0.0  ;;  %v357_v54 = vmul.f32 %v154_v20, %v154_v20  ;;  %v162_v4 = vld [vmem:[%s625_s15 + $0xd0] sm:$0xff] }
  0x26   : > { %v241_v35 = vsel %vm201_vm1, %v156_v32, 0.0  ;;  %v249_v59 = vsel %vm201_vm1, %v160_v56, 0.0  ;;  %v358_v60 = vmul.f32 %v155_v26, %v155_v26  ;;  %v251_v1 = vsel %vm201_vm1, %v161_v62, 0.0 }
  0x27   : > { %v222_v49 = vadd.f32 %v221_v39, %v220_v43  ;;  %v419_v16 = vadd.f32 %v418_v7, %v417_v10  ;;  %v430_v43 = vsel %vm201_vm1, %v353_v30, 0.0  ;;  %v359_v2 = vmul.f32 %v156_v32, %v156_v32  ;;  %v163_v10 = vld [vmem:[%s625_s15 + $0xd8] sm:$0xff] }
  0x28   : > { %v253_v7 = vsel %vm201_vm1, %v162_v4, 0.0  ;;  %v360_v8 = vmul.f32 %v157_v38, %v157_v38  ;;  %v361_v14 = vmul.f32 %v158_v44, %v158_v44  ;;  %v362_v20 = vmul.f32 %v159_v50, %v159_v50 }
  0x29   : > { %v224_v55 = vadd.f32 %v223_v45, %v222_v49  ;;  %v421_v22 = vadd.f32 %v420_v13, %v419_v16  ;;  %v432_v49 = vsel %vm201_vm1, %v354_v36, 0.0  ;;  %v255_v13 = vsel %vm201_vm1, %v163_v10, 0.0  ;;  %v164_v16 = vld [vmem:[%s625_s15 + $0xe0] sm:$0xff] }
  0x2a   : > { %v363_v26 = vmul.f32 %v160_v56, %v160_v56  ;;  %v364_v32 = vmul.f32 %v161_v62, %v161_v62  ;;  %v365_v38 = vmul.f32 %v162_v4, %v162_v4  ;;  %v366_v44 = vmul.f32 %v163_v10, %v163_v10 }
  0x2b   : > { %v226_v61 = vadd.f32 %v225_v51, %v224_v55  ;;  %v423_v28 = vadd.f32 %v422_v19, %v421_v22  ;;  %v434_v55 = vsel %vm201_vm1, %v355_v42, 0.0  ;;  %v257_v19 = vsel %vm201_vm1, %v164_v16, 0.0  ;;  %v165_v22 = vld [vmem:[%s625_s15 + $0xe8] sm:$0xff] }
  0x2c   : > { %v367_v50 = vmul.f32 %v164_v16, %v164_v16  ;;  %v368_v56 = vmul.f32 %v165_v22, %v165_v22 }
  0x2d   : > { %v228_v3 = vadd.f32 %v227_v57, %v226_v61  ;;  %v425_v34 = vadd.f32 %v424_v25, %v423_v28  ;;  %v436_v61 = vsel %vm201_vm1, %v356_v48, 0.0  ;;  %v259_v25 = vsel %vm201_vm1, %v165_v22, 0.0  ;;  %v166_v28 = vld [vmem:[%s625_s15 + $0xf0] sm:$0xff] }
  0x2e   : > { %v369_v62 = vmul.f32 %v166_v28, %v166_v28 }
  0x2f   : > { %v230_v9 = vadd.f32 %v229_v63, %v228_v3  ;;  %v427_v40 = vadd.f32 %v426_v31, %v425_v34  ;;  %v438_v3 = vsel %vm201_vm1, %v357_v54, 0.0  ;;  %v261_v31 = vsel %vm201_vm1, %v166_v28, 0.0  ;;  %v167_v34 = vld [vmem:[%s625_s15 + $0xf8] sm:$0xff] }
  0x30   : > { %v370_v4 = vmul.f32 %v167_v34, %v167_v34 }
  0x31   : > { %v232_v15 = vadd.f32 %v231_v5, %v230_v9  ;;  %v429_v46 = vadd.f32 %v428_v37, %v427_v40  ;;  %v440_v9 = vsel %vm201_vm1, %v358_v60, 0.0  ;;  %v263_v37 = vsel %vm201_vm1, %v167_v34, 0.0  ;;  %v168_v40 = vld [vmem:[%s625_s15 + $0x100] sm:$0xff] }
  0x32   : > { %v371_v10 = vmul.f32 %v168_v40, %v168_v40 }
  0x33   : > { %v234_v21 = vadd.f32 %v233_v11, %v232_v15  ;;  %v431_v52 = vadd.f32 %v430_v43, %v429_v46  ;;  %v442_v15 = vsel %vm201_vm1, %v359_v2, 0.0  ;;  %v265_v43 = vsel %vm201_vm1, %v168_v40, 0.0  ;;  %v169_v46 = vld [vmem:[%s625_s15 + $0x108] sm:$0xff] }
  0x34   : > { %v372_v16 = vmul.f32 %v169_v46, %v169_v46 }
  0x35   : > { %v236_v27 = vadd.f32 %v235_v17, %v234_v21  ;;  %v433_v58 = vadd.f32 %v432_v49, %v431_v52  ;;  %v444_v21 = vsel %vm201_vm1, %v360_v8, 0.0  ;;  %v267_v49 = vsel %vm201_vm1, %v169_v46, 0.0  ;;  %v170_v52 = vld [vmem:[%s625_s15 + $0x110] sm:$0xff] }
  0x36   : > { %v373_v22 = vmul.f32 %v170_v52, %v170_v52 }
  0x37   : > { %v238_v33 = vadd.f32 %v237_v23, %v236_v27  ;;  %v435_v0 = vadd.f32 %v434_v55, %v433_v58  ;;  %v446_v27 = vsel %vm201_vm1, %v361_v14, 0.0  ;;  %v269_v55 = vsel %vm201_vm1, %v170_v52, 0.0  ;;  %v171_v58 = vld [vmem:[%s625_s15 + $0x118] sm:$0xff] }
  0x38   : > { %v374_v28 = vmul.f32 %v171_v58, %v171_v58 }
  0x39   : > { %v240_v39 = vadd.f32 %v239_v29, %v238_v33  ;;  %v437_v6 = vadd.f32 %v436_v61, %v435_v0  ;;  %v448_v33 = vsel %vm201_vm1, %v362_v20, 0.0  ;;  %v271_v61 = vsel %vm201_vm1, %v171_v58, 0.0  ;;  %v172_v0 = vld [vmem:[%s625_s15 + $0x120] sm:$0xff] }
  0x3a   : > { %v375_v34 = vmul.f32 %v172_v0, %v172_v0 }
  0x3b   : > { %v242_v45 = vadd.f32 %v241_v35, %v240_v39  ;;  %v439_v12 = vadd.f32 %v438_v3, %v437_v6  ;;  %v450_v39 = vsel %vm201_vm1, %v363_v26, 0.0  ;;  %v273_v3 = vsel %vm201_vm1, %v172_v0, 0.0  ;;  %v173_v6 = vld [vmem:[%s625_s15 + $0x128] sm:$0xff] }
  0x3c   : > { %v376_v40 = vmul.f32 %v173_v6, %v173_v6 }
  0x3d   : > { %v244_v51 = vadd.f32 %v243_v41, %v242_v45  ;;  %v441_v18 = vadd.f32 %v440_v9, %v439_v12  ;;  %v452_v45 = vsel %vm201_vm1, %v364_v32, 0.0  ;;  %v275_v9 = vsel %vm201_vm1, %v173_v6, 0.0  ;;  %v174_v12 = vld [vmem:[%s625_s15 + $0x130] sm:$0xff] }
  0x3e   : > { %v377_v46 = vmul.f32 %v174_v12, %v174_v12 }
  0x3f   : > { %v246_v57 = vadd.f32 %v245_v47, %v244_v51  ;;  %v443_v24 = vadd.f32 %v442_v15, %v441_v18  ;;  %v454_v51 = vsel %vm201_vm1, %v365_v38, 0.0  ;;  %v277_v15 = vsel %vm201_vm1, %v174_v12, 0.0  ;;  %v175_v18 = vld [vmem:[%s625_s15 + $0x138] sm:$0xff] }
  0x40   : > { %v378_v52 = vmul.f32 %v175_v18, %v175_v18 }
  0x41   : > { %v248_v63 = vadd.f32 %v247_v53, %v246_v57  ;;  %v445_v30 = vadd.f32 %v444_v21, %v443_v24  ;;  %v456_v57 = vsel %vm201_vm1, %v366_v44, 0.0  ;;  %v279_v21 = vsel %vm201_vm1, %v175_v18, 0.0  ;;  %v176_v24 = vld [vmem:[%s625_s15 + $0x140] sm:$0xff] }
  0x42   : > { %v379_v58 = vmul.f32 %v176_v24, %v176_v24 }
  0x43   : > { %v250_v5 = vadd.f32 %v249_v59, %v248_v63  ;;  %v447_v36 = vadd.f32 %v446_v27, %v445_v30  ;;  %v458_v63 = vsel %vm201_vm1, %v367_v50, 0.0  ;;  %v281_v27 = vsel %vm201_vm1, %v176_v24, 0.0  ;;  %v177_v30 = vld [vmem:[%s625_s15 + $0x148] sm:$0xff] }
  0x44   : > { %v380_v0 = vmul.f32 %v177_v30, %v177_v30 }
  0x45   : > { %v252_v11 = vadd.f32 %v251_v1, %v250_v5  ;;  %v449_v42 = vadd.f32 %v448_v33, %v447_v36  ;;  %v460_v5 = vsel %vm201_vm1, %v368_v56, 0.0  ;;  %v283_v33 = vsel %vm201_vm1, %v177_v30, 0.0  ;;  %v178_v36 = vld [vmem:[%s625_s15 + $0x150] sm:$0xff] }
  0x46   : > { %v381_v6 = vmul.f32 %v178_v36, %v178_v36 }
  0x47   : > { %v254_v17 = vadd.f32 %v253_v7, %v252_v11  ;;  %v451_v48 = vadd.f32 %v450_v39, %v449_v42  ;;  %v462_v11 = vsel %vm201_vm1, %v369_v62, 0.0  ;;  %v285_v39 = vsel %vm201_vm1, %v178_v36, 0.0  ;;  %v179_v42 = vld [vmem:[%s625_s15 + $0x158] sm:$0xff] }
  0x48   : > { %v382_v12 = vmul.f32 %v179_v42, %v179_v42 }
  0x49   : > { %v256_v23 = vadd.f32 %v255_v13, %v254_v17  ;;  %v453_v54 = vadd.f32 %v452_v45, %v451_v48  ;;  %v464_v17 = vsel %vm201_vm1, %v370_v4, 0.0  ;;  %v287_v45 = vsel %vm201_vm1, %v179_v42, 0.0  ;;  %v180_v48 = vld [vmem:[%s625_s15 + $0x160] sm:$0xff] }
  0x4a   : > { %v383_v18 = vmul.f32 %v180_v48, %v180_v48 }
  0x4b   : > { %v258_v29 = vadd.f32 %v257_v19, %v256_v23  ;;  %v455_v60 = vadd.f32 %v454_v51, %v453_v54  ;;  %v466_v23 = vsel %vm201_vm1, %v371_v10, 0.0  ;;  %v289_v51 = vsel %vm201_vm1, %v180_v48, 0.0  ;;  %v181_v54 = vld [vmem:[%s625_s15 + $0x168] sm:$0xff] }
  0x4c   : > { %v384_v24 = vmul.f32 %v181_v54, %v181_v54 }
  0x4d   : > { %v260_v35 = vadd.f32 %v259_v25, %v258_v29  ;;  %v457_v2 = vadd.f32 %v456_v57, %v455_v60  ;;  %v468_v29 = vsel %vm201_vm1, %v372_v16, 0.0  ;;  %v291_v57 = vsel %vm201_vm1, %v181_v54, 0.0  ;;  %v182_v60 = vld [vmem:[%s625_s15 + $0x170] sm:$0xff] }
  0x4e   : > { %v385_v30 = vmul.f32 %v182_v60, %v182_v60 }
  0x4f   : > { %v262_v41 = vadd.f32 %v261_v31, %v260_v35  ;;  %v459_v8 = vadd.f32 %v458_v63, %v457_v2  ;;  %v470_v35 = vsel %vm201_vm1, %v373_v22, 0.0  ;;  %v293_v63 = vsel %vm201_vm1, %v182_v60, 0.0  ;;  %v183_v2 = vld [vmem:[%s625_s15 + $0x178] sm:$0xff] }
  0x50   : > { %v386_v36 = vmul.f32 %v183_v2, %v183_v2 }
  0x51   : > { %v264_v47 = vadd.f32 %v263_v37, %v262_v41  ;;  %v461_v14 = vadd.f32 %v460_v5, %v459_v8  ;;  %v472_v41 = vsel %vm201_vm1, %v374_v28, 0.0  ;;  %v295_v5 = vsel %vm201_vm1, %v183_v2, 0.0  ;;  %v184_v8 = vld [vmem:[%s625_s15 + $0x180] sm:$0xff] }
  0x52   : > { %v387_v42 = vmul.f32 %v184_v8, %v184_v8 }
  0x53   : > { %v266_v53 = vadd.f32 %v265_v43, %v264_v47  ;;  %v463_v20 = vadd.f32 %v462_v11, %v461_v14  ;;  %v474_v47 = vsel %vm201_vm1, %v375_v34, 0.0  ;;  %v297_v11 = vsel %vm201_vm1, %v184_v8, 0.0  ;;  %v185_v14 = vld [vmem:[%s625_s15 + $0x188] sm:$0xff] }
  0x54   : > { %v388_v48 = vmul.f32 %v185_v14, %v185_v14 }
  0x55   : > { %v268_v59 = vadd.f32 %v267_v49, %v266_v53  ;;  %v465_v26 = vadd.f32 %v464_v17, %v463_v20  ;;  %v476_v53 = vsel %vm201_vm1, %v376_v40, 0.0  ;;  %v299_v17 = vsel %vm201_vm1, %v185_v14, 0.0  ;;  %v186_v20 = vld [vmem:[%s625_s15 + $0x190] sm:$0xff] }
  0x56   : > { %v389_v54 = vmul.f32 %v186_v20, %v186_v20 }
  0x57   : > { %v270_v1 = vadd.f32 %v269_v55, %v268_v59  ;;  %v467_v32 = vadd.f32 %v466_v23, %v465_v26  ;;  %v478_v59 = vsel %vm201_vm1, %v377_v46, 0.0  ;;  %v301_v23 = vsel %vm201_vm1, %v186_v20, 0.0  ;;  %v187_v26 = vld [vmem:[%s625_s15 + $0x198] sm:$0xff] }
  0x58   : > { %v390_v60 = vmul.f32 %v187_v26, %v187_v26 }
  0x59   : > { %v272_v7 = vadd.f32 %v271_v61, %v270_v1  ;;  %v469_v38 = vadd.f32 %v468_v29, %v467_v32  ;;  %v480_v1 = vsel %vm201_vm1, %v378_v52, 0.0  ;;  %v303_v29 = vsel %vm201_vm1, %v187_v26, 0.0  ;;  %v188_v32 = vld [vmem:[%s625_s15 + $0x1a0] sm:$0xff] }
  0x5a   : > { %v391_v2 = vmul.f32 %v188_v32, %v188_v32 }
  0x5b   : > { %v274_v13 = vadd.f32 %v273_v3, %v272_v7  ;;  %v471_v44 = vadd.f32 %v470_v35, %v469_v38  ;;  %v482_v7 = vsel %vm201_vm1, %v379_v58, 0.0  ;;  %v305_v35 = vsel %vm201_vm1, %v188_v32, 0.0  ;;  %v189_v38 = vld [vmem:[%s625_s15 + $0x1a8] sm:$0xff] }
  0x5c   : > { %v392_v8 = vmul.f32 %v189_v38, %v189_v38 }
  0x5d   : > { %v276_v19 = vadd.f32 %v275_v9, %v274_v13  ;;  %v473_v50 = vadd.f32 %v472_v41, %v471_v44  ;;  %v484_v13 = vsel %vm201_vm1, %v380_v0, 0.0  ;;  %v307_v41 = vsel %vm201_vm1, %v189_v38, 0.0  ;;  %v190_v44 = vld [vmem:[%s625_s15 + $0x1b0] sm:$0xff] }
  0x5e   : > { %v393_v14 = vmul.f32 %v190_v44, %v190_v44 }
  0x5f   : > { %v278_v25 = vadd.f32 %v277_v15, %v276_v19  ;;  %v475_v56 = vadd.f32 %v474_v47, %v473_v50  ;;  %v486_v19 = vsel %vm201_vm1, %v381_v6, 0.0  ;;  %v309_v47 = vsel %vm201_vm1, %v190_v44, 0.0  ;;  %v191_v50 = vld [vmem:[%s625_s15 + $0x1b8] sm:$0xff] }
  0x60   : > { %v394_v20 = vmul.f32 %v191_v50, %v191_v50 }
  0x61   : > { %v280_v31 = vadd.f32 %v279_v21, %v278_v25  ;;  %v477_v62 = vadd.f32 %v476_v53, %v475_v56  ;;  %v488_v25 = vsel %vm201_vm1, %v382_v12, 0.0  ;;  %v311_v53 = vsel %vm201_vm1, %v191_v50, 0.0  ;;  %v192_v56 = vld [vmem:[%s625_s15 + $0x1c0] sm:$0xff] }
  0x62   : > { %v395_v26 = vmul.f32 %v192_v56, %v192_v56 }
  0x63   : > { %v282_v37 = vadd.f32 %v281_v27, %v280_v31  ;;  %v479_v4 = vadd.f32 %v478_v59, %v477_v62  ;;  %v490_v31 = vsel %vm201_vm1, %v383_v18, 0.0  ;;  %v313_v59 = vsel %vm201_vm1, %v192_v56, 0.0  ;;  %v193_v62 = vld [vmem:[%s625_s15 + $0x1c8] sm:$0xff] }
  0x64   : > { %v396_v32 = vmul.f32 %v193_v62, %v193_v62 }
  0x65   : > { %v284_v43 = vadd.f32 %v283_v33, %v282_v37  ;;  %v481_v10 = vadd.f32 %v480_v1, %v479_v4  ;;  %v492_v37 = vsel %vm201_vm1, %v384_v24, 0.0  ;;  %v315_v1 = vsel %vm201_vm1, %v193_v62, 0.0  ;;  %v194_v4 = vld [vmem:[%s625_s15 + $0x1d0] sm:$0xff] }
  0x66   : > { %v397_v38 = vmul.f32 %v194_v4, %v194_v4 }
  0x67   : > { %v286_v49 = vadd.f32 %v285_v39, %v284_v43  ;;  %v483_v16 = vadd.f32 %v482_v7, %v481_v10  ;;  %v494_v43 = vsel %vm201_vm1, %v385_v30, 0.0  ;;  %v317_v7 = vsel %vm201_vm1, %v194_v4, 0.0  ;;  %v195_v10 = vld [vmem:[%s625_s15 + $0x1d8] sm:$0xff] }
  0x69   : > { %v288_v55 = vadd.f32 %v287_v45, %v286_v49  ;;  %v485_v22 = vadd.f32 %v484_v13, %v483_v16  ;;  %v496_v49 = vsel %vm201_vm1, %v386_v36, 0.0  ;;  %v319_v13 = vsel %vm201_vm1, %v195_v10, 0.0  ;;  %v196_v16 = vld [vmem:[%s625_s15 + $0x1e0] sm:$0xff] }
  0x6b   : > { %v290_v61 = vadd.f32 %v289_v51, %v288_v55  ;;  %v487_v28 = vadd.f32 %v486_v19, %v485_v22  ;;  %v498_v55 = vsel %vm201_vm1, %v387_v42, 0.0  ;;  %v321_v19 = vsel %vm201_vm1, %v196_v16, 0.0  ;;  %v197_v22 = vld [vmem:[%s625_s15 + $0x1e8] sm:$0xff] }
  0x6c   : > { %v398_v42 = vmul.f32 %v195_v10, %v195_v10  ;;  %v400_v50 = vmul.f32 %v197_v22, %v197_v22 }
  0x6d   : > { %v292_v3 = vadd.f32 %v291_v57, %v290_v61  ;;  %v489_v34 = vadd.f32 %v488_v25, %v487_v28  ;;  %v500_v61 = vsel %vm201_vm1, %v388_v48, 0.0  ;;  %v323_v25 = vsel %vm201_vm1, %v197_v22, 0.0  ;;  %v198_v28 = vld [vmem:[%s625_s15 + $0x1f0] sm:$0xff] }
  0x6f   : > { %v294_v9 = vadd.f32 %v293_v63, %v292_v3  ;;  %v491_v40 = vadd.f32 %v490_v31, %v489_v34  ;;  %v502_v3 = vsel %vm201_vm1, %v389_v54, 0.0  ;;  %v325_v31 = vsel %vm201_vm1, %v198_v28, 0.0  ;;  %v199_v34 = vld [vmem:[%s625_s15 + $0x1f8] sm:$0xff] }
  0x70   : > { %v401_v54 = vmul.f32 %v198_v28, %v198_v28 }
  0x71   : > { %v296_v15 = vadd.f32 %v295_v5, %v294_v9  ;;  %v493_v46 = vadd.f32 %v492_v37, %v491_v40  ;;  %v504_v9 = vsel %vm201_vm1, %v390_v60, 0.0  ;;  %v327_v37 = vsel %vm201_vm1, %v199_v34, 0.0 }
  0x72   : > { %v526_v62 = vsel %vm201_vm1, %v401_v54, 0.0 }
  0x73   : > { %v298_v21 = vadd.f32 %v297_v11, %v296_v15  ;;  %v495_v52 = vadd.f32 %v494_v43, %v493_v46  ;;  %v506_v15 = vsel %vm201_vm1, %v391_v2, 0.0  ;;  %v516_v43 = vsel %vm201_vm1, %v396_v32, 0.0 }
  0x74   : > { %v399_v46 = vmul.f32 %v196_v16, %v196_v16 }
  0x75   : > { %v300_v27 = vadd.f32 %v299_v17, %v298_v21  ;;  %v497_v58 = vadd.f32 %v496_v49, %v495_v52  ;;  %v508_v21 = vsel %vm201_vm1, %v392_v8, 0.0 }
  0x77   : > { %v302_v33 = vadd.f32 %v301_v23, %v300_v27  ;;  %v499_v0 = vadd.f32 %v498_v55, %v497_v58  ;;  %v510_v27 = vsel %vm201_vm1, %v393_v14, 0.0  ;;  %v522_v55 = vsel %vm201_vm1, %v399_v46, 0.0 }
  0x78   : > { %v402_v58 = vmul.f32 %v199_v34, %v199_v34 }
  0x79   : > { %v304_v39 = vadd.f32 %v303_v29, %v302_v33  ;;  %v501_v6 = vadd.f32 %v500_v61, %v499_v0  ;;  %v512_v33 = vsel %vm201_vm1, %v394_v20, 0.0 }
  0x7a   : > { %v528_v2 = vsel %vm201_vm1, %v402_v58, 0.0 }
  0x7b   : > { %v306_v45 = vadd.f32 %v305_v35, %v304_v39  ;;  %v503_v12 = vadd.f32 %v502_v3, %v501_v6  ;;  %v514_v39 = vsel %vm201_vm1, %v395_v26, 0.0 }
  0x7d   : > { %v308_v51 = vadd.f32 %v307_v41, %v306_v45  ;;  %v505_v18 = vadd.f32 %v504_v9, %v503_v12  ;;  %v338_v12 = vld [vmem:[%s842_s2] sm:$0x1] }
  0x7f   : > { %v310_v57 = vadd.f32 %v309_v47, %v308_v51  ;;  %v507_v24 = vadd.f32 %v506_v15, %v505_v18  ;;  %v518_v47 = vsel %vm201_vm1, %v397_v38, 0.0  ;;  %v520_v51 = vsel %vm201_vm1, %v398_v42, 0.0 }
  0x81   : > { %v312_v63 = vadd.f32 %v311_v53, %v310_v57  ;;  %v509_v30 = vadd.f32 %v508_v21, %v507_v24 }
  0x83   : > { %v314_v5 = vadd.f32 %v313_v59, %v312_v63  ;;  %v511_v36 = vadd.f32 %v510_v27, %v509_v30  ;;  %v524_v59 = vsel %vm201_vm1, %v400_v50, 0.0 }
  0x85   : > { %v316_v11 = vadd.f32 %v315_v1, %v314_v5  ;;  %v513_v41 = vadd.f32 %v512_v33, %v511_v36  ;;  %v200_v1 = vld [vmem:[%s841_s1] sm:$0x1] }
  0x87   : > { %v318_v17 = vadd.f32 %v317_v7, %v316_v11  ;;  %v515_v45 = vadd.f32 %v514_v39, %v513_v41 }
  0x89   : > { %v320_v23 = vadd.f32 %v319_v13, %v318_v17  ;;  %v517_v49 = vadd.f32 %v516_v43, %v515_v45 }
  0x8b   : > { %v322_v29 = vadd.f32 %v321_v19, %v320_v23  ;;  %v519_v53 = vadd.f32 %v518_v47, %v517_v49 }
  0x8d   : > { %v324_v35 = vadd.f32 %v323_v25, %v322_v29  ;;  %v521_v57 = vadd.f32 %v520_v51, %v519_v53 }
  0x8f   : > { %v326_v40 = vadd.f32 %v325_v31, %v324_v35  ;;  %v523_v61 = vadd.f32 %v522_v55, %v521_v57 }
  0x91   : > { %v328_v44 = vadd.f32 %v327_v37, %v326_v40  ;;  %v525_v0 = vadd.f32 %v524_v59, %v523_v61 }
  0x93   : > { %v329_v48 = vrot.slane %v328_v44, 4  ;;  %v527_v4 = vadd.f32 %v526_v62, %v525_v0 }
  0x95   : > { %v330_v52 = vadd.f32 %v329_v48, %v328_v44  ;;  %v529_v6 = vadd.f32 %v528_v2, %v527_v4 }
  0x97   : > { %v331_v56 = vrot.slane %v330_v52, 2  ;;  %v530_v7 = vrot.slane %v529_v6, 4 }
  0x99   : > { %v332_v60 = vadd.f32 %v331_v56, %v330_v52  ;;  %v531_v8 = vadd.f32 %v530_v7, %v529_v6 }
  0x9b   : > { %v333_v63 = vrot.slane %v332_v60, 1  ;;  %v532_v9 = vrot.slane %v531_v8, 2 }
  0x9d   : > { %v334_v3 = vadd.f32 %v333_v63, %v332_v60  ;;  %v533_v10 = vadd.f32 %v532_v9, %v531_v8 }
  0x9f   : > { %v335_v5 = vadd.f32 %v334_v3, %v200_v1  ;;  %v534_v11 = vrot.slane %v533_v10, 1 }
  0xa1   : > { %337 = vst.msk [vmem:[%s841_s1] sm:$0x1] %vm336_vm2, %v335_v5  ;;  %v535_v13 = vadd.f32 %v534_v11, %v533_v10 }
  0xa3   : > { %v536_v14 = vadd.f32 %v535_v13, %v338_v12 }
  0xa5   : > { %537 = vst.msk [vmem:[%s842_s2] sm:$0x1] %vm336_vm2, %v536_v14 }
  0xa6 PF: > { %s13_s9 = sadd.s32 1, %s596_s9  }
  0xa7   : > { %p10_p5 = scmp.ge.s32.totalorder %s13_s9, 6  }
  0xa9   :  { %12 = sbr.rel (!%p10_p5) target bundleno = 1 (0x1), region = 62 }

// kernel: _lambda_.25
= control target key start
LH: loop header
LB: loop body
LE: loop exit
PB: predicated region body
PF: predicated region fallthrough
CT: control target
= control target key end

     0   :  { %s672_s12 = smov 0   ;;  %s1027_s0 = inlined_call_operand.vmem [shape: f32[2048,8], index: 0, kind: input, shape index: {}]   ;;  %s1028_s1 = inlined_call_operand.vmem [shape: f32[1,8], index: 1, kind: input, shape index: {}]   ;;  %s1029_s2 = inlined_call_operand.vmem [shape: f32[1,8], index: 2, kind: input, shape index: {}]   ;;  %s1030_s3 = inlined_call_operand.vmem [shape: bf16[2048,8], index: 3, kind: output, shape index: {}]  }
   0x1 LB: > { %s623_s13 = sadd.s32 4294967295, %s650_s12   ;;  %p627_p0 = scmp.ge.s32.totalorder %s650_s12, 1  ;;  %s650_s12 = sphi %s672_s12, %s13_s12  }
   0x2   : > { %p138_p1 = scmp.lt.s32.totalorder %s650_s12, 5 }
   0x4   : > { %p139_p2 = pnand %p627_p0, %p138_p1 }
   0x5   : > { %s628_s14 = sshll.u32 (!%p139_p2), %s623_s13, 6 }
   0x6   : > { %142 = sbr.rel (%p139_p2) target bundleno = 87 (0x57), region = 32  ;;  %p163_p3 = scmp.lt.s32.totalorder (!%p139_p2), %s628_s14, 255 }
   0xb   : > { %s1032_s14 = smov (!%p163_p3, %s628_s14), 255  ;;  %v685_v0 = vld [vmem:[%s1028_s1] ss:$0 sm:$0xff]  ;;  %vm502_vm0 = vcmask 60416  }
   0xc   : > { %s629_s17 = sshll.u32 %s1032_s14, 3  ;;  %v696_v1 = vld [vmem:[%s1029_s2] ss:$0 sm:$0xff]  ;;  %s631_s23 = sshll.u32 %s1032_s14, 2 }
   0xd   : > { %s691_s20 = scalar_lea.vmem %s1027_s0, %s629_s17  ;;  %s725_s26 = scalar_lea.vmem %s1030_s3, %s631_s23 }
   0xe   : > { %v174_v2 = vld [vmem:[%s691_s20] sm:$0xff]  ;;  %v175_v3 = vld [vmem:[%s691_s20 + $0x8] sm:$0xff]  ;;  %v176_v4 = vld [vmem:[%s691_s20 + $0x10] sm:$0xff] }
   0xf   : > { %v242_v5 = vmul.f32 %v685_v0, %v174_v2  ;;  %v243_v6 = vmul.f32 %v685_v0, %v175_v3  ;;  %v244_v7 = vmul.f32 %v685_v0, %v176_v4  ;;  %v177_v8 = vld [vmem:[%s691_s20 + $0x18] sm:$0xff]  ;;  %v178_v9 = vld [vmem:[%s691_s20 + $0x20] sm:$0xff]  ;;  %v179_v10 = vld [vmem:[%s691_s20 + $0x28] sm:$0xff] }
  0x10   : > { %v245_v11 = vmul.f32 %v685_v0, %v177_v8  ;;  %v246_v12 = vmul.f32 %v685_v0, %v178_v9  ;;  %v247_v13 = vmul.f32 %v685_v0, %v179_v10  ;;  %v180_v14 = vld [vmem:[%s691_s20 + $0x30] sm:$0xff]  ;;  %v181_v15 = vld [vmem:[%s691_s20 + $0x38] sm:$0xff]  ;;  %v182_v32 = vld [vmem:[%s691_s20 + $0x40] sm:$0xff] }
  0x11   : > { %v310_v16 = vadd.f32 %v696_v1, %v242_v5  ;;  %v311_v17 = vadd.f32 %v696_v1, %v243_v6  ;;  %v312_v18 = vadd.f32 %v696_v1, %v244_v7  ;;  %v248_v19 = vmul.f32 %v685_v0, %v180_v14  ;;  %v183_v33 = vld [vmem:[%s691_s20 + $0x48] sm:$0xff]  ;;  %v184_v34 = vld [vmem:[%s691_s20 + $0x50] sm:$0xff]  ;;  %v185_v39 = vld [vmem:[%s691_s20 + $0x58] sm:$0xff] }
  0x12   : > { %v313_v20 = vadd.f32 %v696_v1, %v245_v11  ;;  %v314_v21 = vadd.f32 %v696_v1, %v246_v12  ;;  %v315_v22 = vadd.f32 %v696_v1, %v247_v13  ;;  %v249_v23 = vmul.f32 %v685_v0, %v181_v15  ;;  %v186_v40 = vld [vmem:[%s691_s20 + $0x60] sm:$0xff]  ;;  %v187_v41 = vld [vmem:[%s691_s20 + $0x68] sm:$0xff]  ;;  %v188_v46 = vld [vmem:[%s691_s20 + $0x70] sm:$0xff] }
  0x13   : > { %v374_v24 = vmax.f32 %v310_v16, 0.0  ;;  %v375_v25 = vmax.f32 %v311_v17, 0.0  ;;  %v376_v26 = vmax.f32 %v312_v18, 0.0  ;;  %v316_v27 = vadd.f32 %v696_v1, %v248_v19  ;;  %v189_v51 = vld [vmem:[%s691_s20 + $0x78] sm:$0xff]  ;;  %v190_v2 = vld [vmem:[%s691_s20 + $0x80] sm:$0xff]  ;;  %v191_v7 = vld [vmem:[%s691_s20 + $0x88] sm:$0xff] }
  0x14   : > { %v377_v28 = vmax.f32 %v313_v20, 0.0  ;;  %v378_v29 = vmax.f32 %v314_v21, 0.0  ;;  %v379_v30 = vmax.f32 %v315_v22, 0.0  ;;  %v317_v31 = vadd.f32 %v696_v1, %v249_v23  ;;  %v192_v12 = vld [vmem:[%s691_s20 + $0x90] sm:$0xff]  ;;  %v193_v17 = vld [vmem:[%s691_s20 + $0x98] sm:$0xff]  ;;  %v194_v18 = vld [vmem:[%s691_s20 + $0xa0] sm:$0xff] }
  0x15   : > { %v438_v35 = vpack.c.bf16 %v374_v24, %v374_v24  ;;  %v439_v36 = vpack.c.bf16 %v375_v25, %v375_v25  ;;  %v440_v37 = vpack.c.bf16 %v376_v26, %v376_v26  ;;  %v380_v38 = vmax.f32 %v316_v27, 0.0  ;;  %v195_v19 = vld [vmem:[%s691_s20 + $0xa8] sm:$0xff]  ;;  %v196_v24 = vld [vmem:[%s691_s20 + $0xb0] sm:$0xff] }
  0x16   : > { %v441_v42 = vpack.c.bf16 %v377_v28, %v377_v28  ;;  %v442_v43 = vpack.c.bf16 %v378_v29, %v378_v29  ;;  %v443_v44 = vpack.c.bf16 %v379_v30, %v379_v30  ;;  %v381_v45 = vmax.f32 %v317_v31, 0.0  ;;  %v197_v29 = vld [vmem:[%s691_s20 + $0xb8] sm:$0xff] }
  0x17   : > { %503 = vst.msk [vmem:[%s725_s26] sm:$0xf] %vm502_vm0, %v438_v35  ;;  %v444_v47 = vpack.c.bf16 %v380_v38, %v380_v38  ;;  %v250_v48 = vmul.f32 %v685_v0, %v182_v32  ;;  %v251_v49 = vmul.f32 %v685_v0, %v183_v33  ;;  %v252_v50 = vmul.f32 %v685_v0, %v184_v34 }
  0x18   : > { %504 = vst.msk [vmem:[%s725_s26 + $0x4] sm:$0xf] %vm502_vm0, %v439_v36  ;;  %v445_v52 = vpack.c.bf16 %v381_v45, %v381_v45  ;;  %v253_v53 = vmul.f32 %v685_v0, %v185_v39  ;;  %v254_v54 = vmul.f32 %v685_v0, %v186_v40  ;;  %v255_v55 = vmul.f32 %v685_v0, %v187_v41 }
  0x19   : > { %505 = vst.msk [vmem:[%s725_s26 + $0x8] sm:$0xf] %vm502_vm0, %v440_v37  ;;  %v318_v56 = vadd.f32 %v696_v1, %v250_v48  ;;  %v319_v57 = vadd.f32 %v696_v1, %v251_v49  ;;  %v320_v58 = vadd.f32 %v696_v1, %v252_v50  ;;  %v256_v59 = vmul.f32 %v685_v0, %v188_v46 }
  0x1a   : > { %506 = vst.msk [vmem:[%s725_s26 + $0xc] sm:$0xf] %vm502_vm0, %v441_v42  ;;  %v321_v60 = vadd.f32 %v696_v1, %v253_v53  ;;  %v322_v61 = vadd.f32 %v696_v1, %v254_v54  ;;  %v323_v62 = vadd.f32 %v696_v1, %v255_v55  ;;  %v257_v63 = vmul.f32 %v685_v0, %v189_v51  ;;  %v198_v42 = vld [vmem:[%s691_s20 + $0xc0] sm:$0xff] }
  0x1b   : > { %507 = vst.msk [vmem:[%s725_s26 + $0x10] sm:$0xf] %vm502_vm0, %v442_v43  ;;  %v382_v3 = vmax.f32 %v318_v56, 0.0  ;;  %v383_v4 = vmax.f32 %v319_v57, 0.0  ;;  %v384_v5 = vmax.f32 %v320_v58, 0.0  ;;  %v324_v6 = vadd.f32 %v696_v1, %v256_v59  ;;  %v201_v57 = vld [vmem:[%s691_s20 + $0xd8] sm:$0xff] }
  0x1c   : > { %508 = vst.msk [vmem:[%s725_s26 + $0x14] sm:$0xf] %vm502_vm0, %v443_v44  ;;  %v385_v8 = vmax.f32 %v321_v60, 0.0  ;;  %v386_v9 = vmax.f32 %v322_v61, 0.0  ;;  %v387_v10 = vmax.f32 %v323_v62, 0.0  ;;  %v325_v11 = vadd.f32 %v696_v1, %v257_v63  ;;  %v202_v58 = vld [vmem:[%s691_s20 + $0xe0] sm:$0xff] }
  0x1d   : > { %509 = vst.msk [vmem:[%s725_s26 + $0x18] sm:$0xf] %vm502_vm0, %v444_v47  ;;  %v446_v13 = vpack.c.bf16 %v382_v3, %v382_v3  ;;  %v447_v14 = vpack.c.bf16 %v383_v4, %v383_v4  ;;  %v448_v15 = vpack.c.bf16 %v384_v5, %v384_v5  ;;  %v388_v16 = vmax.f32 %v324_v6, 0.0  ;;  %v199_v47 = vld [vmem:[%s691_s20 + $0xc8] sm:$0xff] }
  0x1e   : > { %510 = vst.msk [vmem:[%s725_s26 + $0x1c] sm:$0xf] %vm502_vm0, %v445_v52  ;;  %v449_v20 = vpack.c.bf16 %v385_v8, %v385_v8  ;;  %v450_v21 = vpack.c.bf16 %v386_v9, %v386_v9  ;;  %v451_v22 = vpack.c.bf16 %v387_v10, %v387_v10  ;;  %v389_v23 = vmax.f32 %v325_v11, 0.0  ;;  %v200_v52 = vld [vmem:[%s691_s20 + $0xd0] sm:$0xff]  ;;  %v203_v59 = vld [vmem:[%s691_s20 + $0xe8] sm:$0xff] }
  0x1f   : > { %511 = vst.msk [vmem:[%s725_s26 + $0x20] sm:$0xf] %vm502_vm0, %v446_v13  ;;  %v452_v25 = vpack.c.bf16 %v388_v16, %v388_v16  ;;  %v258_v26 = vmul.f32 %v685_v0, %v190_v2  ;;  %v259_v27 = vmul.f32 %v685_v0, %v191_v7  ;;  %v260_v28 = vmul.f32 %v685_v0, %v192_v12  ;;  %v204_v2 = vld [vmem:[%s691_s20 + $0xf0] sm:$0xff]  ;;  %v205_v7 = vld [vmem:[%s691_s20 + $0xf8] sm:$0xff] }
  0x20   : > { %512 = vst.msk [vmem:[%s725_s26 + $0x24] sm:$0xf] %vm502_vm0, %v447_v14  ;;  %v453_v30 = vpack.c.bf16 %v389_v23, %v389_v23  ;;  %v261_v31 = vmul.f32 %v685_v0, %v193_v17  ;;  %v262_v32 = vmul.f32 %v685_v0, %v194_v18  ;;  %v263_v33 = vmul.f32 %v685_v0, %v195_v19 }
  0x21   : > { %513 = vst.msk [vmem:[%s725_s26 + $0x28] sm:$0xf] %vm502_vm0, %v448_v15  ;;  %v326_v34 = vadd.f32 %v696_v1, %v258_v26  ;;  %v327_v35 = vadd.f32 %v696_v1, %v259_v27  ;;  %v328_v36 = vadd.f32 %v696_v1, %v260_v28  ;;  %v264_v37 = vmul.f32 %v685_v0, %v196_v24 }
  0x22   : > { %514 = vst.msk [vmem:[%s725_s26 + $0x2c] sm:$0xf] %vm502_vm0, %v449_v20  ;;  %v329_v38 = vadd.f32 %v696_v1, %v261_v31  ;;  %v330_v39 = vadd.f32 %v696_v1, %v262_v32  ;;  %v331_v40 = vadd.f32 %v696_v1, %v263_v33  ;;  %v265_v41 = vmul.f32 %v685_v0, %v197_v29  ;;  %v206_v20 = vld [vmem:[%s691_s20 + $0x100] sm:$0xff] }
  0x23   : > { %515 = vst.msk [vmem:[%s725_s26 + $0x30] sm:$0xf] %vm502_vm0, %v450_v21  ;;  %v390_v43 = vmax.f32 %v326_v34, 0.0  ;;  %v391_v44 = vmax.f32 %v327_v35, 0.0  ;;  %v392_v45 = vmax.f32 %v328_v36, 0.0  ;;  %v332_v46 = vadd.f32 %v696_v1, %v264_v37  ;;  %v209_v35 = vld [vmem:[%s691_s20 + $0x118] sm:$0xff] }
  0x24   : > { %516 = vst.msk [vmem:[%s725_s26 + $0x34] sm:$0xf] %vm502_vm0, %v451_v22  ;;  %v393_v48 = vmax.f32 %v329_v38, 0.0  ;;  %v394_v49 = vmax.f32 %v330_v39, 0.0  ;;  %v395_v50 = vmax.f32 %v331_v40, 0.0  ;;  %v333_v51 = vadd.f32 %v696_v1, %v265_v41  ;;  %v210_v36 = vld [vmem:[%s691_s20 + $0x120] sm:$0xff] }
  0x25   : > { %517 = vst.msk [vmem:[%s725_s26 + $0x38] sm:$0xf] %vm502_vm0, %v452_v25  ;;  %v454_v53 = vpack.c.bf16 %v390_v43, %v390_v43  ;;  %v455_v54 = vpack.c.bf16 %v391_v44, %v391_v44  ;;  %v456_v55 = vpack.c.bf16 %v392_v45, %v392_v45  ;;  %v396_v56 = vmax.f32 %v332_v46, 0.0  ;;  %v207_v25 = vld [vmem:[%s691_s20 + $0x108] sm:$0xff] }
  0x26   : > { %518 = vst.msk [vmem:[%s725_s26 + $0x3c] sm:$0xf] %vm502_vm0, %v453_v30  ;;  %v457_v60 = vpack.c.bf16 %v393_v48, %v393_v48  ;;  %v458_v61 = vpack.c.bf16 %v394_v49, %v394_v49  ;;  %v459_v62 = vpack.c.bf16 %v395_v50, %v395_v50  ;;  %v397_v63 = vmax.f32 %v333_v51, 0.0  ;;  %v208_v30 = vld [vmem:[%s691_s20 + $0x110] sm:$0xff]  ;;  %v211_v37 = vld [vmem:[%s691_s20 + $0x128] sm:$0xff] }
  0x27   : > { %519 = vst.msk [vmem:[%s725_s26 + $0x40] sm:$0xf] %vm502_vm0, %v454_v53  ;;  %v460_v3 = vpack.c.bf16 %v396_v56, %v396_v56  ;;  %v266_v4 = vmul.f32 %v685_v0, %v198_v42  ;;  %v267_v5 = vmul.f32 %v685_v0, %v199_v47  ;;  %v268_v6 = vmul.f32 %v685_v0, %v200_v52  ;;  %v212_v42 = vld [vmem:[%s691_s20 + $0x130] sm:$0xff]  ;;  %v213_v47 = vld [vmem:[%s691_s20 + $0x138] sm:$0xff] }
  0x28   : > { %520 = vst.msk [vmem:[%s725_s26 + $0x44] sm:$0xf] %vm502_vm0, %v455_v54  ;;  %v461_v8 = vpack.c.bf16 %v397_v63, %v397_v63  ;;  %v269_v9 = vmul.f32 %v685_v0, %v201_v57  ;;  %v270_v10 = vmul.f32 %v685_v0, %v202_v58  ;;  %v271_v11 = vmul.f32 %v685_v0, %v203_v59 }
  0x29   : > { %521 = vst.msk [vmem:[%s725_s26 + $0x48] sm:$0xf] %vm502_vm0, %v456_v55  ;;  %v334_v12 = vadd.f32 %v696_v1, %v266_v4  ;;  %v335_v13 = vadd.f32 %v696_v1, %v267_v5  ;;  %v336_v14 = vadd.f32 %v696_v1, %v268_v6  ;;  %v272_v15 = vmul.f32 %v685_v0, %v204_v2 }
  0x2a   : > { %522 = vst.msk [vmem:[%s725_s26 + $0x4c] sm:$0xf] %vm502_vm0, %v457_v60  ;;  %v337_v16 = vadd.f32 %v696_v1, %v269_v9  ;;  %v338_v17 = vadd.f32 %v696_v1, %v270_v10  ;;  %v339_v18 = vadd.f32 %v696_v1, %v271_v11  ;;  %v273_v19 = vmul.f32 %v685_v0, %v205_v7  ;;  %v214_v60 = vld [vmem:[%s691_s20 + $0x140] sm:$0xff] }
  0x2b   : > { %523 = vst.msk [vmem:[%s725_s26 + $0x50] sm:$0xf] %vm502_vm0, %v458_v61  ;;  %v398_v21 = vmax.f32 %v334_v12, 0.0  ;;  %v399_v22 = vmax.f32 %v335_v13, 0.0  ;;  %v400_v23 = vmax.f32 %v336_v14, 0.0  ;;  %v340_v24 = vadd.f32 %v696_v1, %v272_v15  ;;  %v217_v13 = vld [vmem:[%s691_s20 + $0x158] sm:$0xff] }
  0x2c   : > { %524 = vst.msk [vmem:[%s725_s26 + $0x54] sm:$0xf] %vm502_vm0, %v459_v62  ;;  %v401_v26 = vmax.f32 %v337_v16, 0.0  ;;  %v402_v27 = vmax.f32 %v338_v17, 0.0  ;;  %v403_v28 = vmax.f32 %v339_v18, 0.0  ;;  %v341_v29 = vadd.f32 %v696_v1, %v273_v19  ;;  %v218_v14 = vld [vmem:[%s691_s20 + $0x160] sm:$0xff] }
  0x2d   : > { %525 = vst.msk [vmem:[%s725_s26 + $0x58] sm:$0xf] %vm502_vm0, %v460_v3  ;;  %v462_v31 = vpack.c.bf16 %v398_v21, %v398_v21  ;;  %v463_v32 = vpack.c.bf16 %v399_v22, %v399_v22  ;;  %v464_v33 = vpack.c.bf16 %v400_v23, %v400_v23  ;;  %v404_v34 = vmax.f32 %v340_v24, 0.0  ;;  %v215_v3 = vld [vmem:[%s691_s20 + $0x148] sm:$0xff] }
  0x2e   : > { %526 = vst.msk [vmem:[%s725_s26 + $0x5c] sm:$0xf] %vm502_vm0, %v461_v8  ;;  %v465_v38 = vpack.c.bf16 %v401_v26, %v401_v26  ;;  %v466_v39 = vpack.c.bf16 %v402_v27, %v402_v27  ;;  %v467_v40 = vpack.c.bf16 %v403_v28, %v403_v28  ;;  %v405_v41 = vmax.f32 %v341_v29, 0.0  ;;  %v216_v8 = vld [vmem:[%s691_s20 + $0x150] sm:$0xff]  ;;  %v219_v15 = vld [vmem:[%s691_s20 + $0x168] sm:$0xff] }
  0x2f   : > { %527 = vst.msk [vmem:[%s725_s26 + $0x60] sm:$0xf] %vm502_vm0, %v462_v31  ;;  %v468_v43 = vpack.c.bf16 %v404_v34, %v404_v34  ;;  %v274_v44 = vmul.f32 %v685_v0, %v206_v20  ;;  %v275_v45 = vmul.f32 %v685_v0, %v207_v25  ;;  %v276_v46 = vmul.f32 %v685_v0, %v208_v30  ;;  %v220_v20 = vld [vmem:[%s691_s20 + $0x170] sm:$0xff]  ;;  %v221_v25 = vld [vmem:[%s691_s20 + $0x178] sm:$0xff] }
  0x30   : > { %528 = vst.msk [vmem:[%s725_s26 + $0x64] sm:$0xf] %vm502_vm0, %v463_v32  ;;  %v469_v48 = vpack.c.bf16 %v405_v41, %v405_v41  ;;  %v277_v49 = vmul.f32 %v685_v0, %v209_v35  ;;  %v278_v50 = vmul.f32 %v685_v0, %v210_v36  ;;  %v279_v51 = vmul.f32 %v685_v0, %v211_v37 }
  0x31   : > { %529 = vst.msk [vmem:[%s725_s26 + $0x68] sm:$0xf] %vm502_vm0, %v464_v33  ;;  %v342_v52 = vadd.f32 %v696_v1, %v274_v44  ;;  %v343_v53 = vadd.f32 %v696_v1, %v275_v45  ;;  %v344_v54 = vadd.f32 %v696_v1, %v276_v46  ;;  %v280_v55 = vmul.f32 %v685_v0, %v212_v42 }
  0x32   : > { %530 = vst.msk [vmem:[%s725_s26 + $0x6c] sm:$0xf] %vm502_vm0, %v465_v38  ;;  %v345_v56 = vadd.f32 %v696_v1, %v277_v49  ;;  %v346_v57 = vadd.f32 %v696_v1, %v278_v50  ;;  %v347_v58 = vadd.f32 %v696_v1, %v279_v51  ;;  %v281_v59 = vmul.f32 %v685_v0, %v213_v47  ;;  %v222_v38 = vld [vmem:[%s691_s20 + $0x180] sm:$0xff] }
  0x33   : > { %531 = vst.msk [vmem:[%s725_s26 + $0x70] sm:$0xf] %vm502_vm0, %v466_v39  ;;  %v406_v61 = vmax.f32 %v342_v52, 0.0  ;;  %v407_v62 = vmax.f32 %v343_v53, 0.0  ;;  %v408_v63 = vmax.f32 %v344_v54, 0.0  ;;  %v348_v2 = vadd.f32 %v696_v1, %v280_v55  ;;  %v225_v53 = vld [vmem:[%s691_s20 + $0x198] sm:$0xff] }
  0x34   : > { %532 = vst.msk [vmem:[%s725_s26 + $0x74] sm:$0xf] %vm502_vm0, %v467_v40  ;;  %v409_v4 = vmax.f32 %v345_v56, 0.0  ;;  %v410_v5 = vmax.f32 %v346_v57, 0.0  ;;  %v411_v6 = vmax.f32 %v347_v58, 0.0  ;;  %v349_v7 = vadd.f32 %v696_v1, %v281_v59  ;;  %v226_v54 = vld [vmem:[%s691_s20 + $0x1a0] sm:$0xff] }
  0x35   : > { %533 = vst.msk [vmem:[%s725_s26 + $0x78] sm:$0xf] %vm502_vm0, %v468_v43  ;;  %v470_v9 = vpack.c.bf16 %v406_v61, %v406_v61  ;;  %v471_v10 = vpack.c.bf16 %v407_v62, %v407_v62  ;;  %v472_v11 = vpack.c.bf16 %v408_v63, %v408_v63  ;;  %v412_v12 = vmax.f32 %v348_v2, 0.0  ;;  %v223_v43 = vld [vmem:[%s691_s20 + $0x188] sm:$0xff] }
  0x36   : > { %534 = vst.msk [vmem:[%s725_s26 + $0x7c] sm:$0xf] %vm502_vm0, %v469_v48  ;;  %v473_v16 = vpack.c.bf16 %v409_v4, %v409_v4  ;;  %v474_v17 = vpack.c.bf16 %v410_v5, %v410_v5  ;;  %v475_v18 = vpack.c.bf16 %v411_v6, %v411_v6  ;;  %v413_v19 = vmax.f32 %v349_v7, 0.0  ;;  %v224_v48 = vld [vmem:[%s691_s20 + $0x190] sm:$0xff]  ;;  %v227_v55 = vld [vmem:[%s691_s20 + $0x1a8] sm:$0xff] }
  0x37   : > { %535 = vst.msk [vmem:[%s725_s26 + $0x80] sm:$0xf] %vm502_vm0, %v470_v9  ;;  %v476_v21 = vpack.c.bf16 %v412_v12, %v412_v12  ;;  %v282_v22 = vmul.f32 %v685_v0, %v214_v60  ;;  %v283_v23 = vmul.f32 %v685_v0, %v215_v3  ;;  %v284_v24 = vmul.f32 %v685_v0, %v216_v8  ;;  %v228_v60 = vld [vmem:[%s691_s20 + $0x1b0] sm:$0xff]  ;;  %v229_v3 = vld [vmem:[%s691_s20 + $0x1b8] sm:$0xff] }
  0x38   : > { %536 = vst.msk [vmem:[%s725_s26 + $0x84] sm:$0xf] %vm502_vm0, %v471_v10  ;;  %v477_v26 = vpack.c.bf16 %v413_v19, %v413_v19  ;;  %v285_v27 = vmul.f32 %v685_v0, %v217_v13  ;;  %v286_v28 = vmul.f32 %v685_v0, %v218_v14  ;;  %v287_v29 = vmul.f32 %v685_v0, %v219_v15 }
  0x39   : > { %537 = vst.msk [vmem:[%s725_s26 + $0x88] sm:$0xf] %vm502_vm0, %v472_v11  ;;  %v350_v30 = vadd.f32 %v696_v1, %v282_v22  ;;  %v351_v31 = vadd.f32 %v696_v1, %v283_v23  ;;  %v352_v32 = vadd.f32 %v696_v1, %v284_v24  ;;  %v288_v33 = vmul.f32 %v685_v0, %v220_v20 }
  0x3a   : > { %538 = vst.msk [vmem:[%s725_s26 + $0x8c] sm:$0xf] %vm502_vm0, %v473_v16  ;;  %v353_v34 = vadd.f32 %v696_v1, %v285_v27  ;;  %v354_v35 = vadd.f32 %v696_v1, %v286_v28  ;;  %v355_v36 = vadd.f32 %v696_v1, %v287_v29  ;;  %v289_v37 = vmul.f32 %v685_v0, %v221_v25  ;;  %v230_v16 = vld [vmem:[%s691_s20 + $0x1c0] sm:$0xff] }
  0x3b   : > { %539 = vst.msk [vmem:[%s725_s26 + $0x90] sm:$0xf] %vm502_vm0, %v474_v17  ;;  %v414_v39 = vmax.f32 %v350_v30, 0.0  ;;  %v415_v40 = vmax.f32 %v351_v31, 0.0  ;;  %v416_v41 = vmax.f32 %v352_v32, 0.0  ;;  %v356_v42 = vadd.f32 %v696_v1, %v288_v33  ;;  %v233_v31 = vld [vmem:[%s691_s20 + $0x1d8] sm:$0xff] }
  0x3c   : > { %540 = vst.msk [vmem:[%s725_s26 + $0x94] sm:$0xf] %vm502_vm0, %v475_v18  ;;  %v417_v44 = vmax.f32 %v353_v34, 0.0  ;;  %v418_v45 = vmax.f32 %v354_v35, 0.0  ;;  %v419_v46 = vmax.f32 %v355_v36, 0.0  ;;  %v357_v47 = vadd.f32 %v696_v1, %v289_v37  ;;  %v234_v32 = vld [vmem:[%s691_s20 + $0x1e0] sm:$0xff] }
  0x3d   : > { %541 = vst.msk [vmem:[%s725_s26 + $0x98] sm:$0xf] %vm502_vm0, %v476_v21  ;;  %v478_v49 = vpack.c.bf16 %v414_v39, %v414_v39  ;;  %v479_v50 = vpack.c.bf16 %v415_v40, %v415_v40  ;;  %v480_v51 = vpack.c.bf16 %v416_v41, %v416_v41  ;;  %v420_v52 = vmax.f32 %v356_v42, 0.0  ;;  %v231_v21 = vld [vmem:[%s691_s20 + $0x1c8] sm:$0xff] }
  0x3e   : > { %542 = vst.msk [vmem:[%s725_s26 + $0x9c] sm:$0xf] %vm502_vm0, %v477_v26  ;;  %v481_v56 = vpack.c.bf16 %v417_v44, %v417_v44  ;;  %v482_v57 = vpack.c.bf16 %v418_v45, %v418_v45  ;;  %v483_v58 = vpack.c.bf16 %v419_v46, %v419_v46  ;;  %v421_v59 = vmax.f32 %v357_v47, 0.0  ;;  %v232_v26 = vld [vmem:[%s691_s20 + $0x1d0] sm:$0xff]  ;;  %v235_v33 = vld [vmem:[%s691_s20 + $0x1e8] sm:$0xff] }
  0x3f   : > { %543 = vst.msk [vmem:[%s725_s26 + $0xa0] sm:$0xf] %vm502_vm0, %v478_v49  ;;  %v484_v61 = vpack.c.bf16 %v420_v52, %v420_v52  ;;  %v290_v62 = vmul.f32 %v685_v0, %v222_v38  ;;  %v291_v63 = vmul.f32 %v685_v0, %v223_v43  ;;  %v292_v2 = vmul.f32 %v685_v0, %v224_v48  ;;  %v236_v38 = vld [vmem:[%s691_s20 + $0x1f0] sm:$0xff]  ;;  %v237_v43 = vld [vmem:[%s691_s20 + $0x1f8] sm:$0xff] }
  0x40   : > { %544 = vst.msk [vmem:[%s725_s26 + $0xa4] sm:$0xf] %vm502_vm0, %v479_v50  ;;  %v485_v4 = vpack.c.bf16 %v421_v59, %v421_v59  ;;  %v293_v5 = vmul.f32 %v685_v0, %v225_v53  ;;  %v294_v6 = vmul.f32 %v685_v0, %v226_v54  ;;  %v295_v7 = vmul.f32 %v685_v0, %v227_v55 }
  0x41   : > { %545 = vst.msk [vmem:[%s725_s26 + $0xa8] sm:$0xf] %vm502_vm0, %v480_v51  ;;  %v358_v8 = vadd.f32 %v696_v1, %v290_v62  ;;  %v359_v9 = vadd.f32 %v696_v1, %v291_v63  ;;  %v360_v10 = vadd.f32 %v696_v1, %v292_v2  ;;  %v296_v11 = vmul.f32 %v685_v0, %v228_v60 }
  0x42   : > { %546 = vst.msk [vmem:[%s725_s26 + $0xac] sm:$0xf] %vm502_vm0, %v481_v56  ;;  %v361_v12 = vadd.f32 %v696_v1, %v293_v5  ;;  %v362_v13 = vadd.f32 %v696_v1, %v294_v6  ;;  %v363_v14 = vadd.f32 %v696_v1, %v295_v7  ;;  %v297_v15 = vmul.f32 %v685_v0, %v229_v3 }
  0x43   : > { %547 = vst.msk [vmem:[%s725_s26 + $0xb0] sm:$0xf] %vm502_vm0, %v482_v57  ;;  %v422_v17 = vmax.f32 %v358_v8, 0.0  ;;  %v423_v18 = vmax.f32 %v359_v9, 0.0  ;;  %v424_v19 = vmax.f32 %v360_v10, 0.0  ;;  %v364_v20 = vadd.f32 %v696_v1, %v296_v11 }
  0x44   : > { %548 = vst.msk [vmem:[%s725_s26 + $0xb4] sm:$0xf] %vm502_vm0, %v483_v58  ;;  %v425_v22 = vmax.f32 %v361_v12, 0.0  ;;  %v426_v23 = vmax.f32 %v362_v13, 0.0  ;;  %v427_v24 = vmax.f32 %v363_v14, 0.0  ;;  %v365_v25 = vadd.f32 %v696_v1, %v297_v15 }
  0x45   : > { %549 = vst.msk [vmem:[%s725_s26 + $0xb8] sm:$0xf] %vm502_vm0, %v484_v61  ;;  %v486_v27 = vpack.c.bf16 %v422_v17, %v422_v17  ;;  %v487_v28 = vpack.c.bf16 %v423_v18, %v423_v18  ;;  %v488_v29 = vpack.c.bf16 %v424_v19, %v424_v19  ;;  %v428_v30 = vmax.f32 %v364_v20, 0.0 }
  0x46   : > { %550 = vst.msk [vmem:[%s725_s26 + $0xbc] sm:$0xf] %vm502_vm0, %v485_v4  ;;  %v489_v34 = vpack.c.bf16 %v425_v22, %v425_v22  ;;  %v490_v35 = vpack.c.bf16 %v426_v23, %v426_v23  ;;  %v491_v36 = vpack.c.bf16 %v427_v24, %v427_v24  ;;  %v429_v37 = vmax.f32 %v365_v25, 0.0 }
  0x47   : > { %551 = vst.msk [vmem:[%s725_s26 + $0xc0] sm:$0xf] %vm502_vm0, %v486_v27  ;;  %v492_v39 = vpack.c.bf16 %v428_v30, %v428_v30  ;;  %v298_v40 = vmul.f32 %v685_v0, %v230_v16  ;;  %v299_v41 = vmul.f32 %v685_v0, %v231_v21  ;;  %v300_v42 = vmul.f32 %v685_v0, %v232_v26 }
  0x48   : > { %552 = vst.msk [vmem:[%s725_s26 + $0xc4] sm:$0xf] %vm502_vm0, %v487_v28  ;;  %v493_v44 = vpack.c.bf16 %v429_v37, %v429_v37  ;;  %v301_v45 = vmul.f32 %v685_v0, %v233_v31  ;;  %v302_v46 = vmul.f32 %v685_v0, %v234_v32  ;;  %v303_v47 = vmul.f32 %v685_v0, %v235_v33 }
  0x49   : > { %553 = vst.msk [vmem:[%s725_s26 + $0xc8] sm:$0xf] %vm502_vm0, %v488_v29  ;;  %v366_v48 = vadd.f32 %v696_v1, %v298_v40  ;;  %v367_v49 = vadd.f32 %v696_v1, %v299_v41  ;;  %v368_v50 = vadd.f32 %v696_v1, %v300_v42  ;;  %v304_v51 = vmul.f32 %v685_v0, %v236_v38 }
  0x4a   : > { %554 = vst.msk [vmem:[%s725_s26 + $0xcc] sm:$0xf] %vm502_vm0, %v489_v34  ;;  %v369_v52 = vadd.f32 %v696_v1, %v301_v45  ;;  %v370_v53 = vadd.f32 %v696_v1, %v302_v46  ;;  %v371_v54 = vadd.f32 %v696_v1, %v303_v47  ;;  %v305_v55 = vmul.f32 %v685_v0, %v237_v43 }
  0x4b   : > { %555 = vst.msk [vmem:[%s725_s26 + $0xd0] sm:$0xf] %vm502_vm0, %v490_v35  ;;  %v430_v56 = vmax.f32 %v366_v48, 0.0  ;;  %v431_v57 = vmax.f32 %v367_v49, 0.0  ;;  %v432_v58 = vmax.f32 %v368_v50, 0.0  ;;  %v372_v59 = vadd.f32 %v696_v1, %v304_v51 }
  0x4c   : > { %556 = vst.msk [vmem:[%s725_s26 + $0xd4] sm:$0xf] %vm502_vm0, %v491_v36  ;;  %v433_v60 = vmax.f32 %v369_v52, 0.0  ;;  %v434_v61 = vmax.f32 %v370_v53, 0.0  ;;  %v435_v62 = vmax.f32 %v371_v54, 0.0  ;;  %v373_v63 = vadd.f32 %v696_v1, %v305_v55 }
  0x4d   : > { %557 = vst.msk [vmem:[%s725_s26 + $0xd8] sm:$0xf] %vm502_vm0, %v492_v39  ;;  %v494_v0 = vpack.c.bf16 %v430_v56, %v430_v56  ;;  %v495_v2 = vpack.c.bf16 %v431_v57, %v431_v57  ;;  %v496_v3 = vpack.c.bf16 %v432_v58, %v432_v58  ;;  %v436_v4 = vmax.f32 %v372_v59, 0.0 }
  0x4e   : > { %558 = vst.msk [vmem:[%s725_s26 + $0xdc] sm:$0xf] %vm502_vm0, %v493_v44  ;;  %v497_v5 = vpack.c.bf16 %v433_v60, %v433_v60  ;;  %v437_v6 = vmax.f32 %v373_v63, 0.0  ;;  %v498_v7 = vpack.c.bf16 %v434_v61, %v434_v61  ;;  %v499_v1 = vpack.c.bf16 %v435_v62, %v435_v62 }
  0x4f   : > { %559 = vst.msk [vmem:[%s725_s26 + $0xe0] sm:$0xf] %vm502_vm0, %v494_v0  ;;  %v500_v8 = vpack.c.bf16 %v436_v4, %v436_v4 }
  0x50   : > { %560 = vst.msk [vmem:[%s725_s26 + $0xe4] sm:$0xf] %vm502_vm0, %v495_v2  ;;  %v501_v9 = vpack.c.bf16 %v437_v6, %v437_v6 }
  0x51   : > { %561 = vst.msk [vmem:[%s725_s26 + $0xe8] sm:$0xf] %vm502_vm0, %v496_v3 }
  0x52   : > { %562 = vst.msk [vmem:[%s725_s26 + $0xec] sm:$0xf] %vm502_vm0, %v497_v5 }
  0x53   : > { %563 = vst.msk [vmem:[%s725_s26 + $0xf0] sm:$0xf] %vm502_vm0, %v498_v7 }
  0x54   : > { %564 = vst.msk [vmem:[%s725_s26 + $0xf4] sm:$0xf] %vm502_vm0, %v499_v1 }
  0x55   : > { %565 = vst.msk [vmem:[%s725_s26 + $0xf8] sm:$0xf] %vm502_vm0, %v500_v8 }
  0x56   : > { %566 = vst.msk [vmem:[%s725_s26 + $0xfc] sm:$0xf] %vm502_vm0, %v501_v9 }
  0x57 PF: > { %s13_s12 = sadd.s32 1, %s650_s12  }
  0x58   : > { %p10_p4 = scmp.ge.s32.totalorder %s13_s12, 6  }
  0x5a   :  { %12 = sbr.rel (!%p10_p4) target bundleno = 1 (0x1), region = 62 }

// kernel: _lambda_.26
= control target key start
LH: loop header
LB: loop body
LE: loop exit
PB: predicated region body
PF: predicated region fallthrough
CT: control target
= control target key end

     0   :  { %s744_s9 = smov 0   ;;  %s746_s10 = smov 0   ;;  %s834_s0 = inlined_call_operand.vmem [shape: bf16[2048,16], index: 0, kind: input, shape index: {}]   ;;  %s835_s1 = inlined_call_operand.vmem [shape: bf16[16,128], index: 1, kind: input, shape index: {}]   ;;  %s836_s2 = inlined_call_operand.vmem [shape: f32[2048,128], index: 2, kind: output, shape index: {}]  }
   0x1   :  { %s748_s11 = smov 0  }
   0x2 LB: > { %s24_s12 = sadd.s32 1, %s723_s10  ;;  %p570_p0 = scmp.ge.s32.totalorder %s727_s11, 1  ;;  %s727_s11 = sphi %s748_s11, %s12_s11   ;;  %s723_s10 = sphi %s746_s10, %s838_s10   ;;  %s719_s9 = sphi %s744_s9, %s837_s9  }
   0x3   : > { %p26_p1 = scmp.ge.s32.totalorder %s24_s12, 8  ;;  %p136_p2 = scmp.lt.s32.totalorder %s727_s11, 9 }
   0x5   : > { %s840_s12 = smov (%p26_p1, %s24_s12), 0  ;;  %p137_p3 = pnand %p570_p0, %p136_p2 }
   0x6   : > { %s571_s15 = sshll.u32 (!%p137_p3), %s719_s9, 5 }
   0x7   : > { %140 = sbr.rel (%p137_p3) target bundleno = 208 (0xd0), region = 28  ;;  %p166_p4 = scmp.lt.s32.totalorder (!%p137_p3), %s571_s15, 255 }
   0xc   : > { %v677_v0 = vld [vmem:[%s835_s1] sm:$0xff]  ;;  %s842_s15 = smov (!%p166_p4, %s571_s15), 255  ;;  %vm305_vm0 = vcmask 130048  }
   0xd   : > { %361 = vmatpush.bf16.msra.mxu0 %v677_v0  ;;  %678 = vmatpush.bf16.msra.mxu1 %v677_v0  ;;  %s572_s16 = sshll.u32 %s842_s15, 2  ;;  %s574_s20 = sshll.u32 %s842_s15, 3 }
   0xe   : > { %679 = vmatpush.bf16.msra.mxu2 %v677_v0  ;;  %680 = vmatpush.bf16.msra.mxu3 %v677_v0  ;;  %s169_s19 = scalar_lea.vmem %s834_s0, %s572_s16  ;;  %s791_s23 = scalar_lea.vmem %s836_s2, %s574_s20 }
   0xf   : > { %v661_v1 = vld [vmem:[%s169_s19] sm:$0xff]  ;;  %v662_v5 = vld [vmem:[%s169_s19 + $0x8] sm:$0xff]  ;;  %v663_v9 = vld [vmem:[%s169_s19 + $0x10] sm:$0xff] }
  0x10   : > { %v665_v2 = vld [vmem:[%s169_s19 + $0x20] sm:$0xff]  ;;  %643 = vmatmul.msk.bf16.vlgmr.msra.gmra.mxu0 %vm305_vm0, %v661_v1  ;;  %v666_v6 = vld [vmem:[%s169_s19 + $0x28] sm:$0xff]  ;;  %v667_v10 = vld [vmem:[%s169_s19 + $0x30] sm:$0xff] }
  0x11   : > { %v669_v3 = vld [vmem:[%s169_s19 + $0x40] sm:$0xff]  ;;  %647 = vmatmul.msk.bf16.vlgmr.msra.gmra.mxu1 %vm305_vm0, %v665_v2  ;;  %v670_v7 = vld [vmem:[%s169_s19 + $0x48] sm:$0xff]  ;;  %v671_v11 = vld [vmem:[%s169_s19 + $0x50] sm:$0xff] }
  0x12   : > { %v673_v4 = vld [vmem:[%s169_s19 + $0x60] sm:$0xff]  ;;  %651 = vmatmul.msk.bf16.vlgmr.msra.gmra.mxu2 %vm305_vm0, %v669_v3  ;;  %v674_v8 = vld [vmem:[%s169_s19 + $0x68] sm:$0xff]  ;;  %v675_v12 = vld [vmem:[%s169_s19 + $0x70] sm:$0xff] }
  0x13   : > { %655 = vmatmul.msk.bf16.vlgmr.msra.gmra.mxu3 %vm305_vm0, %v673_v4  ;;  %v664_v13 = vld [vmem:[%s169_s19 + $0x18] sm:$0xff] }
  0x14   : > { %v668_v14 = vld [vmem:[%s169_s19 + $0x38] sm:$0xff] }
  0x15   : > { %v672_v15 = vld [vmem:[%s169_s19 + $0x58] sm:$0xff] }
  0x16   : > { %v676_v16 = vld [vmem:[%s169_s19 + $0x78] sm:$0xff] }
  0x20   : > { %644 = vmatmul.msk.bf16.gmra.mxu0 %vm305_vm0, %v662_v5 }
  0x21   : > { %648 = vmatmul.msk.bf16.gmra.mxu1 %vm305_vm0, %v666_v6 }
  0x22   : > { %652 = vmatmul.msk.bf16.gmra.mxu2 %vm305_vm0, %v670_v7 }
  0x23   : > { %656 = vmatmul.msk.bf16.gmra.mxu3 %vm305_vm0, %v674_v8 }
  0x30   : > { %645 = vmatmul.msk.bf16.gmra.mxu0 %vm305_vm0, %v663_v9 }
  0x31   : > { %649 = vmatmul.msk.bf16.gmra.mxu1 %vm305_vm0, %v667_v10 }
  0x32   : > { %653 = vmatmul.msk.bf16.gmra.mxu2 %vm305_vm0, %v671_v11 }
  0x33   : > { %657 = vmatmul.msk.bf16.gmra.mxu3 %vm305_vm0, %v675_v12 }
  0x40   : > { %646 = vmatmul.msk.bf16.gmra.mxu0 %vm305_vm0, %v664_v13 }
  0x41   : > { %650 = vmatmul.msk.bf16.gmra.mxu1 %vm305_vm0, %v668_v14 }
  0x42   : > { %654 = vmatmul.msk.bf16.gmra.mxu2 %vm305_vm0, %v672_v15 }
  0x43   : > { %658 = vmatmul.msk.bf16.gmra.mxu3 %vm305_vm0, %v676_v16 }
  0x8d   : > { %v363_v17 = vpop.f32.mrf.mxu0 }
  0x8e   : > { %v383_v18 = vpop.f32.mrf.mxu1  ;;  %443 = vst [vmem:[%s791_s23] sm:$0xff] %v363_v17 }
  0x8f   : > { %451 = vst [vmem:[%s791_s23 + $0x40] sm:$0xff] %v383_v18 }
  0x95   : > { %v403_v19 = vpop.f32.mrf.mxu2  ;;  %v365_v21 = vpop.f32.mrf.mxu0 }
  0x96   : > { %v423_v20 = vpop.f32.mrf.mxu3  ;;  %459 = vst [vmem:[%s791_s23 + $0x80] sm:$0xff] %v403_v19  ;;  %v385_v22 = vpop.f32.mrf.mxu1 }
  0x97   : > { %467 = vst [vmem:[%s791_s23 + $0xc0] sm:$0xff] %v423_v20 }
  0x98   : > { %444 = vst [vmem:[%s791_s23 + $0x8] sm:$0xff] %v365_v21 }
  0x99   : > { %452 = vst [vmem:[%s791_s23 + $0x48] sm:$0xff] %v385_v22 }
  0x9d   : > { %v405_v23 = vpop.f32.mrf.mxu2  ;;  %v368_v25 = vpop.f32.mrf.mxu0 }
  0x9e   : > { %v425_v24 = vpop.f32.mrf.mxu3  ;;  %460 = vst [vmem:[%s791_s23 + $0x88] sm:$0xff] %v405_v23  ;;  %v388_v26 = vpop.f32.mrf.mxu1 }
  0x9f   : > { %468 = vst [vmem:[%s791_s23 + $0xc8] sm:$0xff] %v425_v24 }
  0xa0   : > { %445 = vst [vmem:[%s791_s23 + $0x10] sm:$0xff] %v368_v25 }
  0xa1   : > { %453 = vst [vmem:[%s791_s23 + $0x50] sm:$0xff] %v388_v26 }
  0xa5   : > { %v408_v27 = vpop.f32.mrf.mxu2  ;;  %v370_v29 = vpop.f32.mrf.mxu0 }
  0xa6   : > { %v428_v28 = vpop.f32.mrf.mxu3  ;;  %461 = vst [vmem:[%s791_s23 + $0x90] sm:$0xff] %v408_v27  ;;  %v390_v30 = vpop.f32.mrf.mxu1 }
  0xa7   : > { %469 = vst [vmem:[%s791_s23 + $0xd0] sm:$0xff] %v428_v28 }
  0xa8   : > { %446 = vst [vmem:[%s791_s23 + $0x18] sm:$0xff] %v370_v29 }
  0xa9   : > { %454 = vst [vmem:[%s791_s23 + $0x58] sm:$0xff] %v390_v30 }
  0xad   : > { %v410_v31 = vpop.f32.mrf.mxu2  ;;  %v373_v33 = vpop.f32.mrf.mxu0 }
  0xae   : > { %v430_v32 = vpop.f32.mrf.mxu3  ;;  %462 = vst [vmem:[%s791_s23 + $0x98] sm:$0xff] %v410_v31  ;;  %v393_v34 = vpop.f32.mrf.mxu1 }
  0xaf   : > { %470 = vst [vmem:[%s791_s23 + $0xd8] sm:$0xff] %v430_v32 }
  0xb0   : > { %447 = vst [vmem:[%s791_s23 + $0x20] sm:$0xff] %v373_v33 }
  0xb1   : > { %455 = vst [vmem:[%s791_s23 + $0x60] sm:$0xff] %v393_v34 }
  0xb5   : > { %v413_v35 = vpop.f32.mrf.mxu2  ;;  %v375_v37 = vpop.f32.mrf.mxu0 }
  0xb6   : > { %v433_v36 = vpop.f32.mrf.mxu3  ;;  %463 = vst [vmem:[%s791_s23 + $0xa0] sm:$0xff] %v413_v35  ;;  %v395_v38 = vpop.f32.mrf.mxu1 }
  0xb7   : > { %471 = vst [vmem:[%s791_s23 + $0xe0] sm:$0xff] %v433_v36 }
  0xb8   : > { %448 = vst [vmem:[%s791_s23 + $0x28] sm:$0xff] %v375_v37 }
  0xb9   : > { %456 = vst [vmem:[%s791_s23 + $0x68] sm:$0xff] %v395_v38 }
  0xbd   : > { %v415_v39 = vpop.f32.mrf.mxu2  ;;  %v378_v41 = vpop.f32.mrf.mxu0 }
  0xbe   : > { %v435_v40 = vpop.f32.mrf.mxu3  ;;  %464 = vst [vmem:[%s791_s23 + $0xa8] sm:$0xff] %v415_v39  ;;  %v398_v42 = vpop.f32.mrf.mxu1 }
  0xbf   : > { %472 = vst [vmem:[%s791_s23 + $0xe8] sm:$0xff] %v435_v40 }
  0xc0   : > { %449 = vst [vmem:[%s791_s23 + $0x30] sm:$0xff] %v378_v41 }
  0xc1   : > { %457 = vst [vmem:[%s791_s23 + $0x70] sm:$0xff] %v398_v42 }
  0xc5   : > { %v418_v43 = vpop.f32.mrf.mxu2  ;;  %v380_v45 = vpop.f32.mrf.mxu0 }
  0xc6   : > { %v438_v44 = vpop.f32.mrf.mxu3  ;;  %465 = vst [vmem:[%s791_s23 + $0xb0] sm:$0xff] %v418_v43  ;;  %v400_v46 = vpop.f32.mrf.mxu1 }
  0xc7   : > { %473 = vst [vmem:[%s791_s23 + $0xf0] sm:$0xff] %v438_v44 }
  0xc8   : > { %450 = vst [vmem:[%s791_s23 + $0x38] sm:$0xff] %v380_v45 }
  0xc9   : > { %458 = vst [vmem:[%s791_s23 + $0x78] sm:$0xff] %v400_v46 }
  0xcd   : > { %v420_v47 = vpop.f32.mrf.mxu2 }
  0xce   : > { %v440_v48 = vpop.f32.mrf.mxu3  ;;  %466 = vst [vmem:[%s791_s23 + $0xb8] sm:$0xff] %v420_v47 }
  0xcf   : > { %474 = vst [vmem:[%s791_s23 + $0xf8] sm:$0xff] %v440_v48 }
  0xd0 PF: > { %s12_s11 = sadd.s32 1, %s727_s11   ;;  %s837_s9 = smov %s723_s10 }
  0xd1   : > { %p9_p5 = scmp.ge.s32.totalorder %s12_s11, 10   ;;  %s838_s10 = smov %s840_s12 }
  0xd3   :  { %11 = sbr.rel (!%p9_p5) target bundleno = 2 (0x2), region = 61 }

// kernel: _lambda_.27
= control target key start
LH: loop header
LB: loop body
LE: loop exit
PB: predicated region body
PF: predicated region fallthrough
CT: control target
= control target key end

     0   :  { %s286_s0 = inlined_call_operand.vmem [shape: f32[48,512], index: 0, kind: input, shape index: {}]   ;;  %s287_s1 = inlined_call_operand.vmem [shape: f32[48,512], index: 1, kind: output, shape index: {}]  }
   0x1   :  { %v8_v0 = vld [vmem:[%s286_s0] sm:$0xff]  ;;  %v9_v1 = vld [vmem:[%s286_s0 + $0x8] sm:$0xff]  ;;  %v10_v2 = vld [vmem:[%s286_s0 + $0x10] sm:$0xff] }
   0x2   :  { %84 = vtanh.f32 %v8_v0  ;;  %v11_v3 = vld [vmem:[%s286_s0 + $0x18] sm:$0xff]  ;;  %v12_v4 = vld [vmem:[%s286_s0 + $0x20] sm:$0xff]  ;;  %v13_v5 = vld [vmem:[%s286_s0 + $0x28] sm:$0xff] }
   0x3   :  { %86 = vtanh.f32 %v9_v1  ;;  %v14_v6 = vld [vmem:[%s286_s0 + $0x30] sm:$0xff]  ;;  %v15_v7 = vld [vmem:[%s286_s0 + $0x38] sm:$0xff]  ;;  %v16_v8 = vld [vmem:[%s286_s0 + $0x40] sm:$0xff] }
   0x4   :  { %88 = vtanh.f32 %v10_v2  ;;  %v17_v10 = vld [vmem:[%s286_s0 + $0x48] sm:$0xff]  ;;  %v18_v12 = vld [vmem:[%s286_s0 + $0x50] sm:$0xff]  ;;  %v19_v14 = vld [vmem:[%s286_s0 + $0x58] sm:$0xff] }
   0x5   :  { %90 = vtanh.f32 %v11_v3  ;;  %v20_v16 = vld [vmem:[%s286_s0 + $0x60] sm:$0xff]  ;;  %v21_v18 = vld [vmem:[%s286_s0 + $0x68] sm:$0xff]  ;;  %v22_v20 = vld [vmem:[%s286_s0 + $0x70] sm:$0xff] }
   0x6   :  { %92 = vtanh.f32 %v12_v4  ;;  %v23_v22 = vld [vmem:[%s286_s0 + $0x78] sm:$0xff]  ;;  %v24_v24 = vld [vmem:[%s286_s0 + $0x80] sm:$0xff]  ;;  %v25_v26 = vld [vmem:[%s286_s0 + $0x88] sm:$0xff] }
   0x7   :  { %94 = vtanh.f32 %v13_v5  ;;  %v26_v28 = vld [vmem:[%s286_s0 + $0x90] sm:$0xff]  ;;  %v27_v30 = vld [vmem:[%s286_s0 + $0x98] sm:$0xff]  ;;  %v28_v32 = vld [vmem:[%s286_s0 + $0xa0] sm:$0xff] }
   0x8   :  { %v85_v9 = vpop.eup %84  ;;  %96 = vtanh.f32 %v14_v6  ;;  %v29_v34 = vld [vmem:[%s286_s0 + $0xa8] sm:$0xff]  ;;  %v30_v36 = vld [vmem:[%s286_s0 + $0xb0] sm:$0xff]  ;;  %v31_v38 = vld [vmem:[%s286_s0 + $0xb8] sm:$0xff] }
   0x9   :  { %v87_v11 = vpop.eup %86  ;;  %56 = vst [vmem:[%s287_s1] sm:$0xff] %v85_v9  ;;  %98 = vtanh.f32 %v15_v7 }
   0xa   :  { %v89_v13 = vpop.eup %88  ;;  %57 = vst [vmem:[%s287_s1 + $0x8] sm:$0xff] %v87_v11  ;;  %100 = vtanh.f32 %v16_v8 }
   0xb   :  { %v91_v15 = vpop.eup %90  ;;  %58 = vst [vmem:[%s287_s1 + $0x10] sm:$0xff] %v89_v13  ;;  %102 = vtanh.f32 %v17_v10 }
   0xc   :  { %v93_v17 = vpop.eup %92  ;;  %59 = vst [vmem:[%s287_s1 + $0x18] sm:$0xff] %v91_v15  ;;  %104 = vtanh.f32 %v18_v12 }
   0xd   :  { %v95_v19 = vpop.eup %94  ;;  %60 = vst [vmem:[%s287_s1 + $0x20] sm:$0xff] %v93_v17  ;;  %106 = vtanh.f32 %v19_v14 }
   0xe   :  { %v97_v21 = vpop.eup %96  ;;  %61 = vst [vmem:[%s287_s1 + $0x28] sm:$0xff] %v95_v19  ;;  %108 = vtanh.f32 %v20_v16 }
   0xf   :  { %v99_v23 = vpop.eup %98  ;;  %62 = vst [vmem:[%s287_s1 + $0x30] sm:$0xff] %v97_v21  ;;  %110 = vtanh.f32 %v21_v18 }
  0x10   :  { %v101_v25 = vpop.eup %100  ;;  %63 = vst [vmem:[%s287_s1 + $0x38] sm:$0xff] %v99_v23  ;;  %112 = vtanh.f32 %v22_v20 }
  0x11   :  { %v103_v27 = vpop.eup %102  ;;  %64 = vst [vmem:[%s287_s1 + $0x40] sm:$0xff] %v101_v25  ;;  %114 = vtanh.f32 %v23_v22 }
  0x12   :  { %v105_v29 = vpop.eup %104  ;;  %65 = vst [vmem:[%s287_s1 + $0x48] sm:$0xff] %v103_v27  ;;  %116 = vtanh.f32 %v24_v24 }
  0x13   :  { %v107_v31 = vpop.eup %106  ;;  %66 = vst [vmem:[%s287_s1 + $0x50] sm:$0xff] %v105_v29  ;;  %118 = vtanh.f32 %v25_v26 }
  0x14   :  { %v109_v33 = vpop.eup %108  ;;  %67 = vst [vmem:[%s287_s1 + $0x58] sm:$0xff] %v107_v31  ;;  %120 = vtanh.f32 %v26_v28 }
  0x15   :  { %v111_v35 = vpop.eup %110  ;;  %68 = vst [vmem:[%s287_s1 + $0x60] sm:$0xff] %v109_v33  ;;  %122 = vtanh.f32 %v27_v30 }
  0x16   :  { %v113_v37 = vpop.eup %112  ;;  %69 = vst [vmem:[%s287_s1 + $0x68] sm:$0xff] %v111_v35  ;;  %124 = vtanh.f32 %v28_v32 }
  0x17   :  { %v115_v39 = vpop.eup %114  ;;  %70 = vst [vmem:[%s287_s1 + $0x70] sm:$0xff] %v113_v37  ;;  %126 = vtanh.f32 %v29_v34 }
  0x18   :  { %v117_v40 = vpop.eup %116  ;;  %71 = vst [vmem:[%s287_s1 + $0x78] sm:$0xff] %v115_v39  ;;  %128 = vtanh.f32 %v30_v36 }
  0x19   :  { %v119_v41 = vpop.eup %118  ;;  %72 = vst [vmem:[%s287_s1 + $0x80] sm:$0xff] %v117_v40  ;;  %130 = vtanh.f32 %v31_v38 }
  0x1a   :  { %v121_v42 = vpop.eup %120  ;;  %73 = vst [vmem:[%s287_s1 + $0x88] sm:$0xff] %v119_v41 }
  0x1b   :  { %v123_v43 = vpop.eup %122  ;;  %74 = vst [vmem:[%s287_s1 + $0x90] sm:$0xff] %v121_v42 }
  0x1c   :  { %v125_v44 = vpop.eup %124  ;;  %75 = vst [vmem:[%s287_s1 + $0x98] sm:$0xff] %v123_v43 }
  0x1d   :  { %v127_v45 = vpop.eup %126  ;;  %76 = vst [vmem:[%s287_s1 + $0xa0] sm:$0xff] %v125_v44 }
  0x1e   :  { %v129_v46 = vpop.eup %128  ;;  %77 = vst [vmem:[%s287_s1 + $0xa8] sm:$0xff] %v127_v45 }
  0x1f   :  { %v131_v47 = vpop.eup %130  ;;  %78 = vst [vmem:[%s287_s1 + $0xb0] sm:$0xff] %v129_v46 }
  0x20   :  { %79 = vst [vmem:[%s287_s1 + $0xb8] sm:$0xff] %v131_v47 }

</bundles_post_ra>
